<compile_context>
chip_gen: v7x
topology: tpu7x:2x2x1
jax: 0.10.0
libtpu: 0.0.40
codegen_flags: <defaults>
</compile_context>

<pallas_src>
import numpy as np
import jax
import jax.numpy as jnp
from jax.experimental import pallas as pl
from jax.experimental.pallas import tpu as pltpu

LANE = 128  # lane-dense padding for HBM input features / output channels


# ---------------------------------------------------------------------------
# parameter init (deterministic, PyTorch-style uniform fan-in scaling)
# ---------------------------------------------------------------------------
def _uniform(key, shape, scale):
    return jax.random.uniform(key, shape, jnp.float32, -scale, scale)


def _init_linear(key, d_in, d_out):
    k1, k2 = jax.random.split(key)
    s = 1.0 / float(np.sqrt(d_in))
    W = _uniform(k1, (d_in, d_out), s)   # stored pre-transposed: y = x @ W + b
    b = _uniform(k2, (1, d_out), s)
    return W, b


def init_layer_params(key, *, has_x_model, has_rec_linear,
                      d_in, x_hidden, gru_in, hidden, d_out):
    keys = list(jax.random.split(key, 32))
    ki = iter(keys)
    p = {}
    if has_x_model:
        p["xW1"], p["xb1"] = _init_linear(next(ki), d_in, x_hidden)
        p["xW2"], p["xb2"] = _init_linear(next(ki), x_hidden, gru_in)
    s = 1.0 / float(np.sqrt(hidden))
    # FullGRUODECell_Autonomous: lin_hr / lin_hz / lin_hh (bias=False on the h-linears)
    p["oWr"] = _uniform(next(ki), (hidden, hidden), s)
    p["oWz"] = _uniform(next(ki), (hidden, hidden), s)
    p["oWh"] = _uniform(next(ki), (hidden, hidden), s)
    # torch.nn.GRU (single layer), split per-gate, pre-transposed
    for name, din in (("gWir", gru_in), ("gWiz", gru_in), ("gWin", gru_in),
                      ("gWhr", hidden), ("gWhz", hidden), ("gWhn", hidden)):
        p[name] = _uniform(next(ki), (din, hidden), s)
    for name in ("gbir", "gbiz", "gbin", "gbhr", "gbhz", "gbhn"):
        p[name] = _uniform(next(ki), (1, hidden), s)
    if has_rec_linear:
        p["rW"], p["rb"] = _init_linear(next(ki), gru_in, d_out)
    return p


# ---------------------------------------------------------------------------
# host-side replication of forward()'s while-loop step counting
# (the PyTorch module uses only times[0]; float32 accumulation mimics the
#  float32 tensor arithmetic of the original loop)
# ---------------------------------------------------------------------------
def compute_euler_steps(times_row, delta_t):
    times_row = np.asarray(times_row, dtype=np.float32)
    dt = np.float32(delta_t)
    thresh = np.float32(0.001) * dt
    current = np.float32(times_row[0]) - np.float32(1.0)
    counts = []
    for obs in times_row:
        c = 0
        while current < np.float32(obs) - thresh:
            current = np.float32(current + dt)
            c += 1
        counts.append(c)
    return np.asarray(counts, dtype=np.int32)


# ---------------------------------------------------------------------------
# weight fusion: per-gate matrices -> CONTIGUOUS wide slabs (no per-gate padding)
# ---------------------------------------------------------------------------
def fuse_params(p1, p2, *, hidden, d_in, f_pad, d_out, out_pad):
    cat = lambda mats: jnp.concatenate(mats, axis=1)

    # pad x_model's first matmul to the lane-dense input width (zero rows are inert)
    xW1p = jnp.zeros((f_pad, p1["xW1"].shape[1]), jnp.float32).at[:d_in, :].set(p1["xW1"])
    # pad rec_linear to a lane-dense 128-wide output (extra lanes sliced off in wrapper)
    rWp = jnp.zeros((hidden, out_pad), jnp.float32).at[:, :d_out].set(p2["rW"])
    rbp = jnp.zeros((1, out_pad), jnp.float32).at[:, :d_out].set(p2["rb"])

    def layer_slabs(p):
        return [
            cat([p["oWr"], p["oWz"]]),                           # (H, 2H)
            p["oWh"],                                            # (H, H)
            cat([p["gWir"], p["gWiz"], p["gWin"]]),              # (gru_in, 3H)
            cat([p["gbir"] + p["gbhr"],                          # fold b_hr into r slot
                 p["gbiz"] + p["gbhz"],                          # fold b_hz into z slot
                 p["gbin"]]),                                    # (1, 3H)
            cat([p["gWhr"], p["gWhz"], p["gWhn"]]),              # (H, 3H)
            p["gbhn"],                                           # (1, H)
        ]

    params = [xW1p, p1["xb1"], p1["xW2"], p1["xb2"]]
    params += layer_slabs(p1)
    params += layer_slabs(p2)
    params += [rWp, rbp]
    return params, len(params)


# ---------------------------------------------------------------------------
# fused two-layer kernel: interleaved recurrences, scratch-streamed outputs
# ---------------------------------------------------------------------------
def build_kernel(*, T, Bt, hidden, f_pad, out_pad, delta_t, steps,
                 last_activation, n_params):
    H = hidden

    def kernel(x_ref, *refs):
        params = refs[:n_params]
        out_ref = refs[n_params]
        h2_sc = refs[n_params + 1]

        (xW1, xb1, xW2, xb2,
         oW1, oWh1, gWi1, gbi1, gWh1, gbhn1,
         oW2, oWh2, gWi2, gbi2, gWh2, gbhn2,
         rW, rb) = [p[...] for p in params]

        x = x_ref[...].reshape(T * Bt, f_pad)                    # lane-dense input slab

        # ---- hoisted, batched over all timesteps (layer 1) ----
        x1 = jnp.maximum(jnp.dot(x, xW1, preferred_element_type=jnp.float32) + xb1, 0.0)
        x1 = jnp.dot(x1, xW2, preferred_element_type=jnp.float32) + xb2       # (T*Bt, H)
        gi1_all = jnp.dot(x1, gWi1, preferred_element_type=jnp.float32) + gbi1  # (T*Bt, 3H)

        gbhn1_b = jnp.broadcast_to(gbhn1, (Bt, H))               # hoisted broadcasts
        gbhn2_b = jnp.broadcast_to(gbhn2, (Bt, H))

        def euler(h, oW, oWh, n):
            # FullGRUODECell_Autonomous explicit-Euler steps
            for _ in range(n):
                rz = jnp.dot(h, oW, preferred_element_type=jnp.float32)       # (Bt, 2H)
                r = jax.nn.sigmoid(rz[:, 0:H])
                z = jax.nn.sigmoid(rz[:, H:2 * H])
                u = jnp.tanh(jnp.dot(r * h, oWh, preferred_element_type=jnp.float32))
                h = h + delta_t * ((1.0 - z) * (u - h))
            return h

        def gru(h, gi, gWh, gbhn_b):
            # torch.nn.GRU cell, gate order r|z|n packed contiguously
            gh = jnp.dot(h, gWh, preferred_element_type=jnp.float32)          # (Bt, 3H)
            r = jax.nn.sigmoid(gi[:, 0:H] + gh[:, 0:H])
            z = jax.nn.sigmoid(gi[:, H:2 * H] + gh[:, H:2 * H])
            n = jnp.tanh(gi[:, 2 * H:3 * H] + r * (gh[:, 2 * H:3 * H] + gbhn_b))
            return (1.0 - z) * n + z * h

        def layer1_step(t, h1):
            h1 = euler(h1, oW1, oWh1, steps[t])
            return gru(h1, gi1_all[t * Bt:(t + 1) * Bt, :], gWh1, gbhn1_b)

        def layer2_step(t, x2, h2):
            h2 = euler(h2, oW2, oWh2, steps[t])
            gi2 = jnp.dot(x2, gWi2, preferred_element_type=jnp.float32) + gbi2
            h2 = gru(h2, gi2, gWh2, gbhn2_b)
            h2_sc[t * Bt:(t + 1) * Bt, :] = h2                   # stream to VMEM scratch
            return h2

        h1 = jnp.zeros((Bt, H), jnp.float32)
        h2 = jnp.zeros((Bt, H), jnp.float32)

        # ---- software-pipelined interleave of the two serial recurrences ----
        # macro-step t: layer-1 advances to t while layer-2 processes t-1; the two
        # chains are data-independent within a macro-step, so their MXU/EUP latency
        # can be hidden against each other.
        h1 = layer1_step(0, h1)
        x2_prev = h1
        for t in range(1, T):
            h1_next = layer1_step(t, h1)
            h2 = layer2_step(t - 1, x2_prev, h2)
            h1 = h1_next
            x2_prev = h1
        h2 = layer2_step(T - 1, x2_prev, h2)

        # ---- hoisted epilogue: rec_linear over the whole slab, lane-dense output ----
        y = jnp.dot(h2_sc[...], rW, preferred_element_type=jnp.float32) + rb  # (T*Bt,128)
        if last_activation == "tanh":
            y = jnp.tanh(y)
        elif last_activation == "sigmoid":
            y = jax.nn.sigmoid(y)
        elif last_activation == "softplus":
            y = jax.nn.softplus(y)
        out_ref[...] = y.reshape(T, Bt, out_pad).astype(out_ref.dtype)

    return kernel


def multi_layer_ode_forward(H_in, times, p1, p2, *, hidden, delta_t,
                            last_activation, output_size):
    B, T, d_in = H_in.shape
    f_pad = LANE
    out_pad = LANE

    # batch tile: at least one 8-sublane group, at most 128 rows (fills the MXU M dim);
    # remaining batch tiles become "parallel" grid steps (sharded across TCs on v7x).
    Bt = min(128, ((B + 7) // 8) * 8)
    nb = -(-B // Bt)
    Bp = nb * Bt

    steps = tuple(int(s) for s in compute_euler_steps(np.asarray(times)[0], delta_t))

    # time-major (T, Bp, f_pad): batch padded to the tile size, features lane-dense.
    X = jnp.zeros((T, Bp, f_pad), jnp.float32)
    X = X.at[:, :B, :d_in].set(jnp.transpose(H_in, (1, 0, 2)).astype(jnp.float32))

    params, n_params = fuse_params(p1, p2, hidden=hidden, d_in=d_in, f_pad=f_pad,
                                   d_out=output_size, out_pad=out_pad)

    kernel = build_kernel(T=T, Bt=Bt, hidden=hidden, f_pad=f_pad, out_pad=out_pad,
                          delta_t=delta_t, steps=steps,
                          last_activation=last_activation, n_params=n_params)

    out = pl.pallas_call(
        kernel,
        out_shape=jax.ShapeDtypeStruct((T, Bp, out_pad), jnp.float32),
        grid=(nb,),
        in_specs=[pl.BlockSpec((T, Bt, f_pad), lambda i: (0, i, 0))]
                 + [pl.BlockSpec(w.shape, lambda i: (0, 0)) for w in params],
        out_specs=pl.BlockSpec((T, Bt, out_pad), lambda i: (0, i, 0)),
        scratch_shapes=[pltpu.VMEM((T * Bt, hidden), jnp.float32)],
        compiler_params=pltpu.CompilerParams(
            dimension_semantics=("parallel",),
            vmem_limit_bytes=32 * 1024 * 1024),
    )(X, *params)

    out = out[:, :B, :output_size]              # drop batch / lane padding
    return jnp.transpose(out, (1, 0, 2))        # (B, T, d_out)


# ---------------------------------------------------------------------------
# pure-JAX reference (for correctness check)
# ---------------------------------------------------------------------------
def ref_layer(H, steps, p, *, has_x_model, has_rec_linear, last_activation,
              delta_t, hidden):
    B, T, _ = H.shape
    if has_x_model:
        HH = jnp.maximum(H @ p["xW1"] + p["xb1"], 0.0) @ p["xW2"] + p["xb2"]
    else:
        HH = H
    h = jnp.zeros((B, hidden), jnp.float32)
    steps_np = np.asarray(steps)
    outs = []
    for t in range(T):
        for _ in range(int(steps_np[t])):
            r = jax.nn.sigmoid(h @ p["oWr"])
            z = jax.nn.sigmoid(h @ p["oWz"])
            u = jnp.tanh((r * h) @ p["oWh"])
            h = h + delta_t * ((1.0 - z) * (u - h))
        x = HH[:, t, :]
        gr = jax.nn.sigmoid(x @ p["gWir"] + p["gbir"] + h @ p["gWhr"] + p["gbhr"])
        gz = jax.nn.sigmoid(x @ p["gWiz"] + p["gbiz"] + h @ p["gWhz"] + p["gbhz"])
        gn = jnp.tanh(x @ p["gWin"] + p["gbin"] + gr * (h @ p["gWhn"] + p["gbhn"]))
        h = (1.0 - gz) * gn + gz * h
        outs.append(h)
    out = jnp.stack(outs, axis=1)
    if has_rec_linear:
        out = out @ p["rW"] + p["rb"]
        if last_activation == "tanh":
            out = jnp.tanh(out)
        elif last_activation == "sigmoid":
            out = jax.nn.sigmoid(out)
        elif last_activation == "softplus":
            out = jax.nn.softplus(out)
    return out


# ---------------------------------------------------------------------------
# main
# ---------------------------------------------------------------------------
if __name__ == "__main__":
    # Multi_Layer_ODENetwork config (num_layer=2: First_ODENetwork -> Last_ODENetwork)
    B, T = 2, 8
    input_size = 6
    hidden_size = 24          # == gru_input_size (required by the module's reshapes)
    gru_input_size = 24
    x_hidden = 48
    output_size = 6
    delta_t = 1.0
    last_activation = "identity"

    key = jax.random.PRNGKey(0)
    kH, k1, k2 = jax.random.split(key, 3)
    H = jax.random.normal(kH, (B, T, input_size), jnp.float32)
    times = np.tile(np.arange(T, dtype=np.float32)[None, :], (B, 1))

    # Layer 1: First_ODENetwork (x_model + GRU-ODE, no rec_linear)
    p1 = init_layer_params(k1, has_x_model=True, has_rec_linear=False,
                           d_in=input_size, x_hidden=x_hidden,
                           gru_in=gru_input_size, hidden=hidden_size,
                           d_out=hidden_size)
    # Layer 2: Last_ODENetwork (GRU-ODE + rec_linear + activation)
    p2 = init_layer_params(k2, has_x_model=False, has_rec_linear=True,
                           d_in=gru_input_size, x_hidden=x_hidden,
                           gru_in=gru_input_size, hidden=hidden_size,
                           d_out=output_size)

    out = multi_layer_ode_forward(H, times, p1, p2,
                                  hidden=hidden_size, delta_t=delta_t,
                                  last_activation=last_activation,
                                  output_size=output_size)
    out = jax.block_until_ready(out)

    # reference check
    steps = compute_euler_steps(times[0], delta_t)
    ref_mid = ref_layer(H, steps, p1, has_x_model=True, has_rec_linear=False,
                        last_activation="identity", delta_t=delta_t, hidden=hidden_size)
    ref_out = ref_layer(ref_mid, steps, p2, has_x_model=False, has_rec_linear=True,
                        last_activation=last_activation, delta_t=delta_t,
                        hidden=hidden_size)
    np.testing.assert_allclose(np.asarray(out), np.asarray(ref_out),
                               atol=2e-3, rtol=2e-3)

    print("KERNEL_OK")
</pallas_src>

<mosaic_0001>
module attributes {stable_mosaic.version = 11 : i64} {
  func.func @kernel(%arg0: i32, %arg1: memref<8x8x128xf32, #tpu.memory_space<vmem>>, %arg2: memref<128x48xf32, #tpu.memory_space<vmem>>, %arg3: memref<1x48xf32, #tpu.memory_space<vmem>>, %arg4: memref<48x24xf32, #tpu.memory_space<vmem>>, %arg5: memref<1x24xf32, #tpu.memory_space<vmem>>, %arg6: memref<24x48xf32, #tpu.memory_space<vmem>>, %arg7: memref<24x24xf32, #tpu.memory_space<vmem>>, %arg8: memref<24x72xf32, #tpu.memory_space<vmem>>, %arg9: memref<1x72xf32, #tpu.memory_space<vmem>>, %arg10: memref<24x72xf32, #tpu.memory_space<vmem>>, %arg11: memref<1x24xf32, #tpu.memory_space<vmem>>, %arg12: memref<24x48xf32, #tpu.memory_space<vmem>>, %arg13: memref<24x24xf32, #tpu.memory_space<vmem>>, %arg14: memref<24x72xf32, #tpu.memory_space<vmem>>, %arg15: memref<1x72xf32, #tpu.memory_space<vmem>>, %arg16: memref<24x72xf32, #tpu.memory_space<vmem>>, %arg17: memref<1x24xf32, #tpu.memory_space<vmem>>, %arg18: memref<24x128xf32, #tpu.memory_space<vmem>>, %arg19: memref<1x128xf32, #tpu.memory_space<vmem>>, %arg20: memref<8x8x128xf32, #tpu.memory_space<vmem>>, %arg21: memref<64x24xf32, #tpu.memory_space<vmem>>) attributes {dimension_semantics = [#tpu.dimension_semantics<parallel>], iteration_bounds = array<i64: 1>, scalar_prefetch = 0 : i64, scratch_operands = 1 : i64, tpu.core_type = #tpu.core_type<tc>, window_params = [{transform_indices = @transform_0, window_bounds = array<i64: 8, 8, 128>}, {pipeline_mode = #tpu.pipeline_mode<synchronous>, transform_indices = @transform_1, window_bounds = array<i64: 128, 48>}, {pipeline_mode = #tpu.pipeline_mode<synchronous>, transform_indices = @transform_2, window_bounds = array<i64: 1, 48>}, {pipeline_mode = #tpu.pipeline_mode<synchronous>, transform_indices = @transform_3, window_bounds = array<i64: 48, 24>}, {pipeline_mode = #tpu.pipeline_mode<synchronous>, transform_indices = @transform_4, window_bounds = array<i64: 1, 24>}, {pipeline_mode = #tpu.pipeline_mode<synchronous>, transform_indices = @transform_5, window_bounds = array<i64: 24, 48>}, {pipeline_mode = #tpu.pipeline_mode<synchronous>, transform_indices = @transform_6, window_bounds = array<i64: 24, 24>}, {pipeline_mode = #tpu.pipeline_mode<synchronous>, transform_indices = @transform_7, window_bounds = array<i64: 24, 72>}, {pipeline_mode = #tpu.pipeline_mode<synchronous>, transform_indices = @transform_8, window_bounds = array<i64: 1, 72>}, {pipeline_mode = #tpu.pipeline_mode<synchronous>, transform_indices = @transform_9, window_bounds = array<i64: 24, 72>}, {pipeline_mode = #tpu.pipeline_mode<synchronous>, transform_indices = @transform_10, window_bounds = array<i64: 1, 24>}, {pipeline_mode = #tpu.pipeline_mode<synchronous>, transform_indices = @transform_11, window_bounds = array<i64: 24, 48>}, {pipeline_mode = #tpu.pipeline_mode<synchronous>, transform_indices = @transform_12, window_bounds = array<i64: 24, 24>}, {pipeline_mode = #tpu.pipeline_mode<synchronous>, transform_indices = @transform_13, window_bounds = array<i64: 24, 72>}, {pipeline_mode = #tpu.pipeline_mode<synchronous>, transform_indices = @transform_14, window_bounds = array<i64: 1, 72>}, {pipeline_mode = #tpu.pipeline_mode<synchronous>, transform_indices = @transform_15, window_bounds = array<i64: 24, 72>}, {pipeline_mode = #tpu.pipeline_mode<synchronous>, transform_indices = @transform_16, window_bounds = array<i64: 1, 24>}, {pipeline_mode = #tpu.pipeline_mode<synchronous>, transform_indices = @transform_17, window_bounds = array<i64: 24, 128>}, {pipeline_mode = #tpu.pipeline_mode<synchronous>, transform_indices = @transform_18, window_bounds = array<i64: 1, 128>}, {transform_indices = @transform_19, window_bounds = array<i64: 8, 8, 128>}]} {
    %c0 = arith.constant 0 : index
    %c0_0 = arith.constant 0 : index
    %0 = vector.load %arg2[%c0, %c0_0] : memref<128x48xf32, #tpu.memory_space<vmem>>, vector<128x48xf32>
    %c0_1 = arith.constant 0 : index
    %c0_2 = arith.constant 0 : index
    %1 = vector.load %arg3[%c0_1, %c0_2] : memref<1x48xf32, #tpu.memory_space<vmem>>, vector<1x48xf32>
    %c0_3 = arith.constant 0 : index
    %c0_4 = arith.constant 0 : index
    %2 = vector.load %arg4[%c0_3, %c0_4] : memref<48x24xf32, #tpu.memory_space<vmem>>, vector<48x24xf32>
    %c0_5 = arith.constant 0 : index
    %c0_6 = arith.constant 0 : index
    %3 = vector.load %arg5[%c0_5, %c0_6] : memref<1x24xf32, #tpu.memory_space<vmem>>, vector<1x24xf32>
    %c0_7 = arith.constant 0 : index
    %c0_8 = arith.constant 0 : index
    %4 = vector.load %arg6[%c0_7, %c0_8] : memref<24x48xf32, #tpu.memory_space<vmem>>, vector<24x48xf32>
    %c0_9 = arith.constant 0 : index
    %c0_10 = arith.constant 0 : index
    %5 = vector.load %arg7[%c0_9, %c0_10] : memref<24x24xf32, #tpu.memory_space<vmem>>, vector<24x24xf32>
    %c0_11 = arith.constant 0 : index
    %c0_12 = arith.constant 0 : index
    %6 = vector.load %arg8[%c0_11, %c0_12] : memref<24x72xf32, #tpu.memory_space<vmem>>, vector<24x72xf32>
    %c0_13 = arith.constant 0 : index
    %c0_14 = arith.constant 0 : index
    %7 = vector.load %arg9[%c0_13, %c0_14] : memref<1x72xf32, #tpu.memory_space<vmem>>, vector<1x72xf32>
    %c0_15 = arith.constant 0 : index
    %c0_16 = arith.constant 0 : index
    %8 = vector.load %arg10[%c0_15, %c0_16] : memref<24x72xf32, #tpu.memory_space<vmem>>, vector<24x72xf32>
    %c0_17 = arith.constant 0 : index
    %c0_18 = arith.constant 0 : index
    %9 = vector.load %arg11[%c0_17, %c0_18] : memref<1x24xf32, #tpu.memory_space<vmem>>, vector<1x24xf32>
    %c0_19 = arith.constant 0 : index
    %c0_20 = arith.constant 0 : index
    %10 = vector.load %arg12[%c0_19, %c0_20] : memref<24x48xf32, #tpu.memory_space<vmem>>, vector<24x48xf32>
    %c0_21 = arith.constant 0 : index
    %c0_22 = arith.constant 0 : index
    %11 = vector.load %arg13[%c0_21, %c0_22] : memref<24x24xf32, #tpu.memory_space<vmem>>, vector<24x24xf32>
    %c0_23 = arith.constant 0 : index
    %c0_24 = arith.constant 0 : index
    %12 = vector.load %arg14[%c0_23, %c0_24] : memref<24x72xf32, #tpu.memory_space<vmem>>, vector<24x72xf32>
    %c0_25 = arith.constant 0 : index
    %c0_26 = arith.constant 0 : index
    %13 = vector.load %arg15[%c0_25, %c0_26] : memref<1x72xf32, #tpu.memory_space<vmem>>, vector<1x72xf32>
    %c0_27 = arith.constant 0 : index
    %c0_28 = arith.constant 0 : index
    %14 = vector.load %arg16[%c0_27, %c0_28] : memref<24x72xf32, #tpu.memory_space<vmem>>, vector<24x72xf32>
    %c0_29 = arith.constant 0 : index
    %c0_30 = arith.constant 0 : index
    %15 = vector.load %arg17[%c0_29, %c0_30] : memref<1x24xf32, #tpu.memory_space<vmem>>, vector<1x24xf32>
    %c0_31 = arith.constant 0 : index
    %c0_32 = arith.constant 0 : index
    %16 = vector.load %arg18[%c0_31, %c0_32] : memref<24x128xf32, #tpu.memory_space<vmem>>, vector<24x128xf32>
    %c0_33 = arith.constant 0 : index
    %c0_34 = arith.constant 0 : index
    %17 = vector.load %arg19[%c0_33, %c0_34] : memref<1x128xf32, #tpu.memory_space<vmem>>, vector<1x128xf32>
    %c0_35 = arith.constant 0 : index
    %c0_36 = arith.constant 0 : index
    %c0_37 = arith.constant 0 : index
    %18 = vector.load %arg1[%c0_35, %c0_36, %c0_37] : memref<8x8x128xf32, #tpu.memory_space<vmem>>, vector<8x8x128xf32>
    %19 = vector.shape_cast %18 : vector<8x8x128xf32> to vector<64x128xf32>
    %cst = arith.constant dense<0.000000e+00> : vector<64x48xf32>
    %20 = tpu.matmul %19, %0, %cst {dimension_numbers = #tpu.dot_dimension_numbers<[1], [0], [0], [1], [0, 0, 1, 1], [], []>} : vector<64x128xf32>, vector<128x48xf32>, vector<64x48xf32> -> vector<64x48xf32>
    %21 = vector.broadcast %1 : vector<1x48xf32> to vector<64x48xf32>
    %22 = arith.addf %20, %21 : vector<64x48xf32>
    %cst_38 = arith.constant 0.000000e+00 : f32
    %23 = vector.broadcast %cst_38 : f32 to vector<64x48xf32>
    %24 = arith.maximumf %22, %23 : vector<64x48xf32>
    %cst_39 = arith.constant dense<0.000000e+00> : vector<64x24xf32>
    %25 = tpu.matmul %24, %2, %cst_39 {dimension_numbers = #tpu.dot_dimension_numbers<[1], [0], [0], [1], [0, 0, 1, 1], [], []>} : vector<64x48xf32>, vector<48x24xf32>, vector<64x24xf32> -> vector<64x24xf32>
    %26 = vector.broadcast %3 : vector<1x24xf32> to vector<64x24xf32>
    %27 = arith.addf %25, %26 : vector<64x24xf32>
    %cst_40 = arith.constant dense<0.000000e+00> : vector<64x72xf32>
    %28 = tpu.matmul %27, %6, %cst_40 {dimension_numbers = #tpu.dot_dimension_numbers<[1], [0], [0], [1], [0, 0, 1, 1], [], []>} : vector<64x24xf32>, vector<24x72xf32>, vector<64x72xf32> -> vector<64x72xf32>
    %29 = vector.broadcast %7 : vector<1x72xf32> to vector<64x72xf32>
    %30 = arith.addf %28, %29 : vector<64x72xf32>
    %31 = vector.shape_cast %9 : vector<1x24xf32> to vector<1x24xf32>
    %32 = vector.broadcast %31 : vector<1x24xf32> to vector<8x24xf32>
    %33 = vector.shape_cast %15 : vector<1x24xf32> to vector<1x24xf32>
    %34 = vector.broadcast %33 : vector<1x24xf32> to vector<8x24xf32>
    %cst_41 = arith.constant 0.000000e+00 : f32
    %35 = vector.broadcast %cst_41 : f32 to vector<8x24xf32>
    %cst_42 = arith.constant 0.000000e+00 : f32
    %36 = vector.broadcast %cst_42 : f32 to vector<8x24xf32>
    %cst_43 = arith.constant dense<0.000000e+00> : vector<8x48xf32>
    %37 = tpu.matmul %35, %4, %cst_43 {dimension_numbers = #tpu.dot_dimension_numbers<[1], [0], [0], [1], [0, 0, 1, 1], [], []>} : vector<8x24xf32>, vector<24x48xf32>, vector<8x48xf32> -> vector<8x48xf32>
    %38 = vector.extract_strided_slice %37 {offsets = [0, 0], sizes = [8, 24], strides = [1, 1]} : vector<8x48xf32> to vector<8x24xf32>
    %39 = arith.negf %38 : vector<8x24xf32>
    %40 = math.exp %39 : vector<8x24xf32>
    %cst_44 = arith.constant 1.000000e+00 : f32
    %41 = vector.broadcast %cst_44 : f32 to vector<8x24xf32>
    %42 = arith.addf %41, %40 : vector<8x24xf32>
    %43 = arith.divf %41, %42 : vector<8x24xf32>
    %44 = vector.extract_strided_slice %37 {offsets = [0, 24], sizes = [8, 24], strides = [1, 1]} : vector<8x48xf32> to vector<8x24xf32>
    %45 = arith.negf %44 : vector<8x24xf32>
    %46 = math.exp %45 : vector<8x24xf32>
    %cst_45 = arith.constant 1.000000e+00 : f32
    %47 = vector.broadcast %cst_45 : f32 to vector<8x24xf32>
    %48 = arith.addf %47, %46 : vector<8x24xf32>
    %49 = arith.divf %47, %48 : vector<8x24xf32>
    %50 = arith.mulf %43, %35 : vector<8x24xf32>
    %cst_46 = arith.constant dense<0.000000e+00> : vector<8x24xf32>
    %51 = tpu.matmul %50, %5, %cst_46 {dimension_numbers = #tpu.dot_dimension_numbers<[1], [0], [0], [1], [0, 0, 1, 1], [], []>} : vector<8x24xf32>, vector<24x24xf32>, vector<8x24xf32> -> vector<8x24xf32>
    %52 = math.tanh %51 : vector<8x24xf32>
    %cst_47 = arith.constant 1.000000e+00 : f32
    %53 = vector.broadcast %cst_47 : f32 to vector<8x24xf32>
    %54 = arith.subf %53, %49 : vector<8x24xf32>
    %55 = arith.subf %52, %35 : vector<8x24xf32>
    %56 = arith.mulf %54, %55 : vector<8x24xf32>
    %cst_48 = arith.constant 1.000000e+00 : f32
    %57 = vector.broadcast %cst_48 : f32 to vector<8x24xf32>
    %58 = arith.mulf %57, %56 : vector<8x24xf32>
    %59 = arith.addf %35, %58 : vector<8x24xf32>
    %60 = vector.extract_strided_slice %30 {offsets = [0, 0], sizes = [8, 72], strides = [1, 1]} : vector<64x72xf32> to vector<8x72xf32>
    %cst_49 = arith.constant dense<0.000000e+00> : vector<8x72xf32>
    %61 = tpu.matmul %59, %8, %cst_49 {dimension_numbers = #tpu.dot_dimension_numbers<[1], [0], [0], [1], [0, 0, 1, 1], [], []>} : vector<8x24xf32>, vector<24x72xf32>, vector<8x72xf32> -> vector<8x72xf32>
    %62 = vector.extract_strided_slice %60 {offsets = [0, 0], sizes = [8, 24], strides = [1, 1]} : vector<8x72xf32> to vector<8x24xf32>
    %63 = vector.extract_strided_slice %61 {offsets = [0, 0], sizes = [8, 24], strides = [1, 1]} : vector<8x72xf32> to vector<8x24xf32>
    %64 = arith.addf %62, %63 : vector<8x24xf32>
    %65 = arith.negf %64 : vector<8x24xf32>
    %66 = math.exp %65 : vector<8x24xf32>
    %cst_50 = arith.constant 1.000000e+00 : f32
    %67 = vector.broadcast %cst_50 : f32 to vector<8x24xf32>
    %68 = arith.addf %67, %66 : vector<8x24xf32>
    %69 = arith.divf %67, %68 : vector<8x24xf32>
    %70 = vector.extract_strided_slice %60 {offsets = [0, 24], sizes = [8, 24], strides = [1, 1]} : vector<8x72xf32> to vector<8x24xf32>
    %71 = vector.extract_strided_slice %61 {offsets = [0, 24], sizes = [8, 24], strides = [1, 1]} : vector<8x72xf32> to vector<8x24xf32>
    %72 = arith.addf %70, %71 : vector<8x24xf32>
    %73 = arith.negf %72 : vector<8x24xf32>
    %74 = math.exp %73 : vector<8x24xf32>
    %cst_51 = arith.constant 1.000000e+00 : f32
    %75 = vector.broadcast %cst_51 : f32 to vector<8x24xf32>
    %76 = arith.addf %75, %74 : vector<8x24xf32>
    %77 = arith.divf %75, %76 : vector<8x24xf32>
    %78 = vector.extract_strided_slice %60 {offsets = [0, 48], sizes = [8, 24], strides = [1, 1]} : vector<8x72xf32> to vector<8x24xf32>
    %79 = vector.extract_strided_slice %61 {offsets = [0, 48], sizes = [8, 24], strides = [1, 1]} : vector<8x72xf32> to vector<8x24xf32>
    %80 = arith.addf %79, %32 : vector<8x24xf32>
    %81 = arith.mulf %69, %80 : vector<8x24xf32>
    %82 = arith.addf %78, %81 : vector<8x24xf32>
    %83 = math.tanh %82 : vector<8x24xf32>
    %cst_52 = arith.constant 1.000000e+00 : f32
    %84 = vector.broadcast %cst_52 : f32 to vector<8x24xf32>
    %85 = arith.subf %84, %77 : vector<8x24xf32>
    %86 = arith.mulf %85, %83 : vector<8x24xf32>
    %87 = arith.mulf %77, %59 : vector<8x24xf32>
    %88 = arith.addf %86, %87 : vector<8x24xf32>
    %cst_53 = arith.constant dense<0.000000e+00> : vector<8x48xf32>
    %89 = tpu.matmul %88, %4, %cst_53 {dimension_numbers = #tpu.dot_dimension_numbers<[1], [0], [0], [1], [0, 0, 1, 1], [], []>} : vector<8x24xf32>, vector<24x48xf32>, vector<8x48xf32> -> vector<8x48xf32>
    %90 = vector.extract_strided_slice %89 {offsets = [0, 0], sizes = [8, 24], strides = [1, 1]} : vector<8x48xf32> to vector<8x24xf32>
    %91 = arith.negf %90 : vector<8x24xf32>
    %92 = math.exp %91 : vector<8x24xf32>
    %cst_54 = arith.constant 1.000000e+00 : f32
    %93 = vector.broadcast %cst_54 : f32 to vector<8x24xf32>
    %94 = arith.addf %93, %92 : vector<8x24xf32>
    %95 = arith.divf %93, %94 : vector<8x24xf32>
    %96 = vector.extract_strided_slice %89 {offsets = [0, 24], sizes = [8, 24], strides = [1, 1]} : vector<8x48xf32> to vector<8x24xf32>
    %97 = arith.negf %96 : vector<8x24xf32>
    %98 = math.exp %97 : vector<8x24xf32>
    %cst_55 = arith.constant 1.000000e+00 : f32
    %99 = vector.broadcast %cst_55 : f32 to vector<8x24xf32>
    %100 = arith.addf %99, %98 : vector<8x24xf32>
    %101 = arith.divf %99, %100 : vector<8x24xf32>
    %102 = arith.mulf %95, %88 : vector<8x24xf32>
    %cst_56 = arith.constant dense<0.000000e+00> : vector<8x24xf32>
    %103 = tpu.matmul %102, %5, %cst_56 {dimension_numbers = #tpu.dot_dimension_numbers<[1], [0], [0], [1], [0, 0, 1, 1], [], []>} : vector<8x24xf32>, vector<24x24xf32>, vector<8x24xf32> -> vector<8x24xf32>
    %104 = math.tanh %103 : vector<8x24xf32>
    %cst_57 = arith.constant 1.000000e+00 : f32
    %105 = vector.broadcast %cst_57 : f32 to vector<8x24xf32>
    %106 = arith.subf %105, %101 : vector<8x24xf32>
    %107 = arith.subf %104, %88 : vector<8x24xf32>
    %108 = arith.mulf %106, %107 : vector<8x24xf32>
    %cst_58 = arith.constant 1.000000e+00 : f32
    %109 = vector.broadcast %cst_58 : f32 to vector<8x24xf32>
    %110 = arith.mulf %109, %108 : vector<8x24xf32>
    %111 = arith.addf %88, %110 : vector<8x24xf32>
    %112 = vector.extract_strided_slice %30 {offsets = [8, 0], sizes = [8, 72], strides = [1, 1]} : vector<64x72xf32> to vector<8x72xf32>
    %cst_59 = arith.constant dense<0.000000e+00> : vector<8x72xf32>
    %113 = tpu.matmul %111, %8, %cst_59 {dimension_numbers = #tpu.dot_dimension_numbers<[1], [0], [0], [1], [0, 0, 1, 1], [], []>} : vector<8x24xf32>, vector<24x72xf32>, vector<8x72xf32> -> vector<8x72xf32>
    %114 = vector.extract_strided_slice %112 {offsets = [0, 0], sizes = [8, 24], strides = [1, 1]} : vector<8x72xf32> to vector<8x24xf32>
    %115 = vector.extract_strided_slice %113 {offsets = [0, 0], sizes = [8, 24], strides = [1, 1]} : vector<8x72xf32> to vector<8x24xf32>
    %116 = arith.addf %114, %115 : vector<8x24xf32>
    %117 = arith.negf %116 : vector<8x24xf32>
    %118 = math.exp %117 : vector<8x24xf32>
    %cst_60 = arith.constant 1.000000e+00 : f32
    %119 = vector.broadcast %cst_60 : f32 to vector<8x24xf32>
    %120 = arith.addf %119, %118 : vector<8x24xf32>
    %121 = arith.divf %119, %120 : vector<8x24xf32>
    %122 = vector.extract_strided_slice %112 {offsets = [0, 24], sizes = [8, 24], strides = [1, 1]} : vector<8x72xf32> to vector<8x24xf32>
    %123 = vector.extract_strided_slice %113 {offsets = [0, 24], sizes = [8, 24], strides = [1, 1]} : vector<8x72xf32> to vector<8x24xf32>
    %124 = arith.addf %122, %123 : vector<8x24xf32>
    %125 = arith.negf %124 : vector<8x24xf32>
    %126 = math.exp %125 : vector<8x24xf32>
    %cst_61 = arith.constant 1.000000e+00 : f32
    %127 = vector.broadcast %cst_61 : f32 to vector<8x24xf32>
    %128 = arith.addf %127, %126 : vector<8x24xf32>
    %129 = arith.divf %127, %128 : vector<8x24xf32>
    %130 = vector.extract_strided_slice %112 {offsets = [0, 48], sizes = [8, 24], strides = [1, 1]} : vector<8x72xf32> to vector<8x24xf32>
    %131 = vector.extract_strided_slice %113 {offsets = [0, 48], sizes = [8, 24], strides = [1, 1]} : vector<8x72xf32> to vector<8x24xf32>
    %132 = arith.addf %131, %32 : vector<8x24xf32>
    %133 = arith.mulf %121, %132 : vector<8x24xf32>
    %134 = arith.addf %130, %133 : vector<8x24xf32>
    %135 = math.tanh %134 : vector<8x24xf32>
    %cst_62 = arith.constant 1.000000e+00 : f32
    %136 = vector.broadcast %cst_62 : f32 to vector<8x24xf32>
    %137 = arith.subf %136, %129 : vector<8x24xf32>
    %138 = arith.mulf %137, %135 : vector<8x24xf32>
    %139 = arith.mulf %129, %111 : vector<8x24xf32>
    %140 = arith.addf %138, %139 : vector<8x24xf32>
    %cst_63 = arith.constant dense<0.000000e+00> : vector<8x48xf32>
    %141 = tpu.matmul %36, %10, %cst_63 {dimension_numbers = #tpu.dot_dimension_numbers<[1], [0], [0], [1], [0, 0, 1, 1], [], []>} : vector<8x24xf32>, vector<24x48xf32>, vector<8x48xf32> -> vector<8x48xf32>
    %142 = vector.extract_strided_slice %141 {offsets = [0, 0], sizes = [8, 24], strides = [1, 1]} : vector<8x48xf32> to vector<8x24xf32>
    %143 = arith.negf %142 : vector<8x24xf32>
    %144 = math.exp %143 : vector<8x24xf32>
    %cst_64 = arith.constant 1.000000e+00 : f32
    %145 = vector.broadcast %cst_64 : f32 to vector<8x24xf32>
    %146 = arith.addf %145, %144 : vector<8x24xf32>
    %147 = arith.divf %145, %146 : vector<8x24xf32>
    %148 = vector.extract_strided_slice %141 {offsets = [0, 24], sizes = [8, 24], strides = [1, 1]} : vector<8x48xf32> to vector<8x24xf32>
    %149 = arith.negf %148 : vector<8x24xf32>
    %150 = math.exp %149 : vector<8x24xf32>
    %cst_65 = arith.constant 1.000000e+00 : f32
    %151 = vector.broadcast %cst_65 : f32 to vector<8x24xf32>
    %152 = arith.addf %151, %150 : vector<8x24xf32>
    %153 = arith.divf %151, %152 : vector<8x24xf32>
    %154 = arith.mulf %147, %36 : vector<8x24xf32>
    %cst_66 = arith.constant dense<0.000000e+00> : vector<8x24xf32>
    %155 = tpu.matmul %154, %11, %cst_66 {dimension_numbers = #tpu.dot_dimension_numbers<[1], [0], [0], [1], [0, 0, 1, 1], [], []>} : vector<8x24xf32>, vector<24x24xf32>, vector<8x24xf32> -> vector<8x24xf32>
    %156 = math.tanh %155 : vector<8x24xf32>
    %cst_67 = arith.constant 1.000000e+00 : f32
    %157 = vector.broadcast %cst_67 : f32 to vector<8x24xf32>
    %158 = arith.subf %157, %153 : vector<8x24xf32>
    %159 = arith.subf %156, %36 : vector<8x24xf32>
    %160 = arith.mulf %158, %159 : vector<8x24xf32>
    %cst_68 = arith.constant 1.000000e+00 : f32
    %161 = vector.broadcast %cst_68 : f32 to vector<8x24xf32>
    %162 = arith.mulf %161, %160 : vector<8x24xf32>
    %163 = arith.addf %36, %162 : vector<8x24xf32>
    %cst_69 = arith.constant dense<0.000000e+00> : vector<8x72xf32>
    %164 = tpu.matmul %88, %12, %cst_69 {dimension_numbers = #tpu.dot_dimension_numbers<[1], [0], [0], [1], [0, 0, 1, 1], [], []>} : vector<8x24xf32>, vector<24x72xf32>, vector<8x72xf32> -> vector<8x72xf32>
    %165 = vector.broadcast %13 : vector<1x72xf32> to vector<8x72xf32>
    %166 = arith.addf %164, %165 : vector<8x72xf32>
    %cst_70 = arith.constant dense<0.000000e+00> : vector<8x72xf32>
    %167 = tpu.matmul %163, %14, %cst_70 {dimension_numbers = #tpu.dot_dimension_numbers<[1], [0], [0], [1], [0, 0, 1, 1], [], []>} : vector<8x24xf32>, vector<24x72xf32>, vector<8x72xf32> -> vector<8x72xf32>
    %168 = vector.extract_strided_slice %166 {offsets = [0, 0], sizes = [8, 24], strides = [1, 1]} : vector<8x72xf32> to vector<8x24xf32>
    %169 = vector.extract_strided_slice %167 {offsets = [0, 0], sizes = [8, 24], strides = [1, 1]} : vector<8x72xf32> to vector<8x24xf32>
    %170 = arith.addf %168, %169 : vector<8x24xf32>
    %171 = arith.negf %170 : vector<8x24xf32>
    %172 = math.exp %171 : vector<8x24xf32>
    %cst_71 = arith.constant 1.000000e+00 : f32
    %173 = vector.broadcast %cst_71 : f32 to vector<8x24xf32>
    %174 = arith.addf %173, %172 : vector<8x24xf32>
    %175 = arith.divf %173, %174 : vector<8x24xf32>
    %176 = vector.extract_strided_slice %166 {offsets = [0, 24], sizes = [8, 24], strides = [1, 1]} : vector<8x72xf32> to vector<8x24xf32>
    %177 = vector.extract_strided_slice %167 {offsets = [0, 24], sizes = [8, 24], strides = [1, 1]} : vector<8x72xf32> to vector<8x24xf32>
    %178 = arith.addf %176, %177 : vector<8x24xf32>
    %179 = arith.negf %178 : vector<8x24xf32>
    %180 = math.exp %179 : vector<8x24xf32>
    %cst_72 = arith.constant 1.000000e+00 : f32
    %181 = vector.broadcast %cst_72 : f32 to vector<8x24xf32>
    %182 = arith.addf %181, %180 : vector<8x24xf32>
    %183 = arith.divf %181, %182 : vector<8x24xf32>
    %184 = vector.extract_strided_slice %166 {offsets = [0, 48], sizes = [8, 24], strides = [1, 1]} : vector<8x72xf32> to vector<8x24xf32>
    %185 = vector.extract_strided_slice %167 {offsets = [0, 48], sizes = [8, 24], strides = [1, 1]} : vector<8x72xf32> to vector<8x24xf32>
    %186 = arith.addf %185, %34 : vector<8x24xf32>
    %187 = arith.mulf %175, %186 : vector<8x24xf32>
    %188 = arith.addf %184, %187 : vector<8x24xf32>
    %189 = math.tanh %188 : vector<8x24xf32>
    %cst_73 = arith.constant 1.000000e+00 : f32
    %190 = vector.broadcast %cst_73 : f32 to vector<8x24xf32>
    %191 = arith.subf %190, %183 : vector<8x24xf32>
    %192 = arith.mulf %191, %189 : vector<8x24xf32>
    %193 = arith.mulf %183, %163 : vector<8x24xf32>
    %194 = arith.addf %192, %193 : vector<8x24xf32>
    %c0_74 = arith.constant 0 : index
    %c0_75 = arith.constant 0 : index
    %195 = vector.load %arg21[%c0_74, %c0_75] : memref<64x24xf32, #tpu.memory_space<vmem>>, vector<8x24xf32>
    tpu.vector_store %arg21[%c0_74, %c0_75], %194 {strides = array<i32>} : memref<64x24xf32, #tpu.memory_space<vmem>>, vector<8x24xf32>,
    %cst_76 = arith.constant dense<0.000000e+00> : vector<8x48xf32>
    %196 = tpu.matmul %140, %4, %cst_76 {dimension_numbers = #tpu.dot_dimension_numbers<[1], [0], [0], [1], [0, 0, 1, 1], [], []>} : vector<8x24xf32>, vector<24x48xf32>, vector<8x48xf32> -> vector<8x48xf32>
    %197 = vector.extract_strided_slice %196 {offsets = [0, 0], sizes = [8, 24], strides = [1, 1]} : vector<8x48xf32> to vector<8x24xf32>
    %198 = arith.negf %197 : vector<8x24xf32>
    %199 = math.exp %198 : vector<8x24xf32>
    %cst_77 = arith.constant 1.000000e+00 : f32
    %200 = vector.broadcast %cst_77 : f32 to vector<8x24xf32>
    %201 = arith.addf %200, %199 : vector<8x24xf32>
    %202 = arith.divf %200, %201 : vector<8x24xf32>
    %203 = vector.extract_strided_slice %196 {offsets = [0, 24], sizes = [8, 24], strides = [1, 1]} : vector<8x48xf32> to vector<8x24xf32>
    %204 = arith.negf %203 : vector<8x24xf32>
    %205 = math.exp %204 : vector<8x24xf32>
    %cst_78 = arith.constant 1.000000e+00 : f32
    %206 = vector.broadcast %cst_78 : f32 to vector<8x24xf32>
    %207 = arith.addf %206, %205 : vector<8x24xf32>
    %208 = arith.divf %206, %207 : vector<8x24xf32>
    %209 = arith.mulf %202, %140 : vector<8x24xf32>
    %cst_79 = arith.constant dense<0.000000e+00> : vector<8x24xf32>
    %210 = tpu.matmul %209, %5, %cst_79 {dimension_numbers = #tpu.dot_dimension_numbers<[1], [0], [0], [1], [0, 0, 1, 1], [], []>} : vector<8x24xf32>, vector<24x24xf32>, vector<8x24xf32> -> vector<8x24xf32>
    %211 = math.tanh %210 : vector<8x24xf32>
    %cst_80 = arith.constant 1.000000e+00 : f32
    %212 = vector.broadcast %cst_80 : f32 to vector<8x24xf32>
    %213 = arith.subf %212, %208 : vector<8x24xf32>
    %214 = arith.subf %211, %140 : vector<8x24xf32>
    %215 = arith.mulf %213, %214 : vector<8x24xf32>
    %cst_81 = arith.constant 1.000000e+00 : f32
    %216 = vector.broadcast %cst_81 : f32 to vector<8x24xf32>
    %217 = arith.mulf %216, %215 : vector<8x24xf32>
    %218 = arith.addf %140, %217 : vector<8x24xf32>
    %219 = vector.extract_strided_slice %30 {offsets = [16, 0], sizes = [8, 72], strides = [1, 1]} : vector<64x72xf32> to vector<8x72xf32>
    %cst_82 = arith.constant dense<0.000000e+00> : vector<8x72xf32>
    %220 = tpu.matmul %218, %8, %cst_82 {dimension_numbers = #tpu.dot_dimension_numbers<[1], [0], [0], [1], [0, 0, 1, 1], [], []>} : vector<8x24xf32>, vector<24x72xf32>, vector<8x72xf32> -> vector<8x72xf32>
    %221 = vector.extract_strided_slice %219 {offsets = [0, 0], sizes = [8, 24], strides = [1, 1]} : vector<8x72xf32> to vector<8x24xf32>
    %222 = vector.extract_strided_slice %220 {offsets = [0, 0], sizes = [8, 24], strides = [1, 1]} : vector<8x72xf32> to vector<8x24xf32>
    %223 = arith.addf %221, %222 : vector<8x24xf32>
    %224 = arith.negf %223 : vector<8x24xf32>
    %225 = math.exp %224 : vector<8x24xf32>
    %cst_83 = arith.constant 1.000000e+00 : f32
    %226 = vector.broadcast %cst_83 : f32 to vector<8x24xf32>
    %227 = arith.addf %226, %225 : vector<8x24xf32>
    %228 = arith.divf %226, %227 : vector<8x24xf32>
    %229 = vector.extract_strided_slice %219 {offsets = [0, 24], sizes = [8, 24], strides = [1, 1]} : vector<8x72xf32> to vector<8x24xf32>
    %230 = vector.extract_strided_slice %220 {offsets = [0, 24], sizes = [8, 24], strides = [1, 1]} : vector<8x72xf32> to vector<8x24xf32>
    %231 = arith.addf %229, %230 : vector<8x24xf32>
    %232 = arith.negf %231 : vector<8x24xf32>
    %233 = math.exp %232 : vector<8x24xf32>
    %cst_84 = arith.constant 1.000000e+00 : f32
    %234 = vector.broadcast %cst_84 : f32 to vector<8x24xf32>
    %235 = arith.addf %234, %233 : vector<8x24xf32>
    %236 = arith.divf %234, %235 : vector<8x24xf32>
    %237 = vector.extract_strided_slice %219 {offsets = [0, 48], sizes = [8, 24], strides = [1, 1]} : vector<8x72xf32> to vector<8x24xf32>
    %238 = vector.extract_strided_slice %220 {offsets = [0, 48], sizes = [8, 24], strides = [1, 1]} : vector<8x72xf32> to vector<8x24xf32>
    %239 = arith.addf %238, %32 : vector<8x24xf32>
    %240 = arith.mulf %228, %239 : vector<8x24xf32>
    %241 = arith.addf %237, %240 : vector<8x24xf32>
    %242 = math.tanh %241 : vector<8x24xf32>
    %cst_85 = arith.constant 1.000000e+00 : f32
    %243 = vector.broadcast %cst_85 : f32 to vector<8x24xf32>
    %244 = arith.subf %243, %236 : vector<8x24xf32>
    %245 = arith.mulf %244, %242 : vector<8x24xf32>
    %246 = arith.mulf %236, %218 : vector<8x24xf32>
    %247 = arith.addf %245, %246 : vector<8x24xf32>
    %cst_86 = arith.constant dense<0.000000e+00> : vector<8x48xf32>
    %248 = tpu.matmul %194, %10, %cst_86 {dimension_numbers = #tpu.dot_dimension_numbers<[1], [0], [0], [1], [0, 0, 1, 1], [], []>} : vector<8x24xf32>, vector<24x48xf32>, vector<8x48xf32> -> vector<8x48xf32>
    %249 = vector.extract_strided_slice %248 {offsets = [0, 0], sizes = [8, 24], strides = [1, 1]} : vector<8x48xf32> to vector<8x24xf32>
    %250 = arith.negf %249 : vector<8x24xf32>
    %251 = math.exp %250 : vector<8x24xf32>
    %cst_87 = arith.constant 1.000000e+00 : f32
    %252 = vector.broadcast %cst_87 : f32 to vector<8x24xf32>
    %253 = arith.addf %252, %251 : vector<8x24xf32>
    %254 = arith.divf %252, %253 : vector<8x24xf32>
    %255 = vector.extract_strided_slice %248 {offsets = [0, 24], sizes = [8, 24], strides = [1, 1]} : vector<8x48xf32> to vector<8x24xf32>
    %256 = arith.negf %255 : vector<8x24xf32>
    %257 = math.exp %256 : vector<8x24xf32>
    %cst_88 = arith.constant 1.000000e+00 : f32
    %258 = vector.broadcast %cst_88 : f32 to vector<8x24xf32>
    %259 = arith.addf %258, %257 : vector<8x24xf32>
    %260 = arith.divf %258, %259 : vector<8x24xf32>
    %261 = arith.mulf %254, %194 : vector<8x24xf32>
    %cst_89 = arith.constant dense<0.000000e+00> : vector<8x24xf32>
    %262 = tpu.matmul %261, %11, %cst_89 {dimension_numbers = #tpu.dot_dimension_numbers<[1], [0], [0], [1], [0, 0, 1, 1], [], []>} : vector<8x24xf32>, vector<24x24xf32>, vector<8x24xf32> -> vector<8x24xf32>
    %263 = math.tanh %262 : vector<8x24xf32>
    %cst_90 = arith.constant 1.000000e+00 : f32
    %264 = vector.broadcast %cst_90 : f32 to vector<8x24xf32>
    %265 = arith.subf %264, %260 : vector<8x24xf32>
    %266 = arith.subf %263, %194 : vector<8x24xf32>
    %267 = arith.mulf %265, %266 : vector<8x24xf32>
    %cst_91 = arith.constant 1.000000e+00 : f32
    %268 = vector.broadcast %cst_91 : f32 to vector<8x24xf32>
    %269 = arith.mulf %268, %267 : vector<8x24xf32>
    %270 = arith.addf %194, %269 : vector<8x24xf32>
    %cst_92 = arith.constant dense<0.000000e+00> : vector<8x72xf32>
    %271 = tpu.matmul %140, %12, %cst_92 {dimension_numbers = #tpu.dot_dimension_numbers<[1], [0], [0], [1], [0, 0, 1, 1], [], []>} : vector<8x24xf32>, vector<24x72xf32>, vector<8x72xf32> -> vector<8x72xf32>
    %272 = vector.broadcast %13 : vector<1x72xf32> to vector<8x72xf32>
    %273 = arith.addf %271, %272 : vector<8x72xf32>
    %cst_93 = arith.constant dense<0.000000e+00> : vector<8x72xf32>
    %274 = tpu.matmul %270, %14, %cst_93 {dimension_numbers = #tpu.dot_dimension_numbers<[1], [0], [0], [1], [0, 0, 1, 1], [], []>} : vector<8x24xf32>, vector<24x72xf32>, vector<8x72xf32> -> vector<8x72xf32>
    %275 = vector.extract_strided_slice %273 {offsets = [0, 0], sizes = [8, 24], strides = [1, 1]} : vector<8x72xf32> to vector<8x24xf32>
    %276 = vector.extract_strided_slice %274 {offsets = [0, 0], sizes = [8, 24], strides = [1, 1]} : vector<8x72xf32> to vector<8x24xf32>
    %277 = arith.addf %275, %276 : vector<8x24xf32>
    %278 = arith.negf %277 : vector<8x24xf32>
    %279 = math.exp %278 : vector<8x24xf32>
    %cst_94 = arith.constant 1.000000e+00 : f32
    %280 = vector.broadcast %cst_94 : f32 to vector<8x24xf32>
    %281 = arith.addf %280, %279 : vector<8x24xf32>
    %282 = arith.divf %280, %281 : vector<8x24xf32>
    %283 = vector.extract_strided_slice %273 {offsets = [0, 24], sizes = [8, 24], strides = [1, 1]} : vector<8x72xf32> to vector<8x24xf32>
    %284 = vector.extract_strided_slice %274 {offsets = [0, 24], sizes = [8, 24], strides = [1, 1]} : vector<8x72xf32> to vector<8x24xf32>
    %285 = arith.addf %283, %284 : vector<8x24xf32>
    %286 = arith.negf %285 : vector<8x24xf32>
    %287 = math.exp %286 : vector<8x24xf32>
    %cst_95 = arith.constant 1.000000e+00 : f32
    %288 = vector.broadcast %cst_95 : f32 to vector<8x24xf32>
    %289 = arith.addf %288, %287 : vector<8x24xf32>
    %290 = arith.divf %288, %289 : vector<8x24xf32>
    %291 = vector.extract_strided_slice %273 {offsets = [0, 48], sizes = [8, 24], strides = [1, 1]} : vector<8x72xf32> to vector<8x24xf32>
    %292 = vector.extract_strided_slice %274 {offsets = [0, 48], sizes = [8, 24], strides = [1, 1]} : vector<8x72xf32> to vector<8x24xf32>
    %293 = arith.addf %292, %34 : vector<8x24xf32>
    %294 = arith.mulf %282, %293 : vector<8x24xf32>
    %295 = arith.addf %291, %294 : vector<8x24xf32>
    %296 = math.tanh %295 : vector<8x24xf32>
    %cst_96 = arith.constant 1.000000e+00 : f32
    %297 = vector.broadcast %cst_96 : f32 to vector<8x24xf32>
    %298 = arith.subf %297, %290 : vector<8x24xf32>
    %299 = arith.mulf %298, %296 : vector<8x24xf32>
    %300 = arith.mulf %290, %270 : vector<8x24xf32>
    %301 = arith.addf %299, %300 : vector<8x24xf32>
    %c8 = arith.constant 8 : index
    %c0_97 = arith.constant 0 : index
    %302 = vector.load %arg21[%c8, %c0_97] : memref<64x24xf32, #tpu.memory_space<vmem>>, vector<8x24xf32>
    tpu.vector_store %arg21[%c8, %c0_97], %301 {strides = array<i32>} : memref<64x24xf32, #tpu.memory_space<vmem>>, vector<8x24xf32>,
    %cst_98 = arith.constant dense<0.000000e+00> : vector<8x48xf32>
    %303 = tpu.matmul %247, %4, %cst_98 {dimension_numbers = #tpu.dot_dimension_numbers<[1], [0], [0], [1], [0, 0, 1, 1], [], []>} : vector<8x24xf32>, vector<24x48xf32>, vector<8x48xf32> -> vector<8x48xf32>
    %304 = vector.extract_strided_slice %303 {offsets = [0, 0], sizes = [8, 24], strides = [1, 1]} : vector<8x48xf32> to vector<8x24xf32>
    %305 = arith.negf %304 : vector<8x24xf32>
    %306 = math.exp %305 : vector<8x24xf32>
    %cst_99 = arith.constant 1.000000e+00 : f32
    %307 = vector.broadcast %cst_99 : f32 to vector<8x24xf32>
    %308 = arith.addf %307, %306 : vector<8x24xf32>
    %309 = arith.divf %307, %308 : vector<8x24xf32>
    %310 = vector.extract_strided_slice %303 {offsets = [0, 24], sizes = [8, 24], strides = [1, 1]} : vector<8x48xf32> to vector<8x24xf32>
    %311 = arith.negf %310 : vector<8x24xf32>
    %312 = math.exp %311 : vector<8x24xf32>
    %cst_100 = arith.constant 1.000000e+00 : f32
    %313 = vector.broadcast %cst_100 : f32 to vector<8x24xf32>
    %314 = arith.addf %313, %312 : vector<8x24xf32>
    %315 = arith.divf %313, %314 : vector<8x24xf32>
    %316 = arith.mulf %309, %247 : vector<8x24xf32>
    %cst_101 = arith.constant dense<0.000000e+00> : vector<8x24xf32>
    %317 = tpu.matmul %316, %5, %cst_101 {dimension_numbers = #tpu.dot_dimension_numbers<[1], [0], [0], [1], [0, 0, 1, 1], [], []>} : vector<8x24xf32>, vector<24x24xf32>, vector<8x24xf32> -> vector<8x24xf32>
    %318 = math.tanh %317 : vector<8x24xf32>
    %cst_102 = arith.constant 1.000000e+00 : f32
    %319 = vector.broadcast %cst_102 : f32 to vector<8x24xf32>
    %320 = arith.subf %319, %315 : vector<8x24xf32>
    %321 = arith.subf %318, %247 : vector<8x24xf32>
    %322 = arith.mulf %320, %321 : vector<8x24xf32>
    %cst_103 = arith.constant 1.000000e+00 : f32
    %323 = vector.broadcast %cst_103 : f32 to vector<8x24xf32>
    %324 = arith.mulf %323, %322 : vector<8x24xf32>
    %325 = arith.addf %247, %324 : vector<8x24xf32>
    %326 = vector.extract_strided_slice %30 {offsets = [24, 0], sizes = [8, 72], strides = [1, 1]} : vector<64x72xf32> to vector<8x72xf32>
    %cst_104 = arith.constant dense<0.000000e+00> : vector<8x72xf32>
    %327 = tpu.matmul %325, %8, %cst_104 {dimension_numbers = #tpu.dot_dimension_numbers<[1], [0], [0], [1], [0, 0, 1, 1], [], []>} : vector<8x24xf32>, vector<24x72xf32>, vector<8x72xf32> -> vector<8x72xf32>
    %328 = vector.extract_strided_slice %326 {offsets = [0, 0], sizes = [8, 24], strides = [1, 1]} : vector<8x72xf32> to vector<8x24xf32>
    %329 = vector.extract_strided_slice %327 {offsets = [0, 0], sizes = [8, 24], strides = [1, 1]} : vector<8x72xf32> to vector<8x24xf32>
    %330 = arith.addf %328, %329 : vector<8x24xf32>
    %331 = arith.negf %330 : vector<8x24xf32>
    %332 = math.exp %331 : vector<8x24xf32>
    %cst_105 = arith.constant 1.000000e+00 : f32
    %333 = vector.broadcast %cst_105 : f32 to vector<8x24xf32>
    %334 = arith.addf %333, %332 : vector<8x24xf32>
    %335 = arith.divf %333, %334 : vector<8x24xf32>
    %336 = vector.extract_strided_slice %326 {offsets = [0, 24], sizes = [8, 24], strides = [1, 1]} : vector<8x72xf32> to vector<8x24xf32>
    %337 = vector.extract_strided_slice %327 {offsets = [0, 24], sizes = [8, 24], strides = [1, 1]} : vector<8x72xf32> to vector<8x24xf32>
    %338 = arith.addf %336, %337 : vector<8x24xf32>
    %339 = arith.negf %338 : vector<8x24xf32>
    %340 = math.exp %339 : vector<8x24xf32>
    %cst_106 = arith.constant 1.000000e+00 : f32
    %341 = vector.broadcast %cst_106 : f32 to vector<8x24xf32>
    %342 = arith.addf %341, %340 : vector<8x24xf32>
    %343 = arith.divf %341, %342 : vector<8x24xf32>
    %344 = vector.extract_strided_slice %326 {offsets = [0, 48], sizes = [8, 24], strides = [1, 1]} : vector<8x72xf32> to vector<8x24xf32>
    %345 = vector.extract_strided_slice %327 {offsets = [0, 48], sizes = [8, 24], strides = [1, 1]} : vector<8x72xf32> to vector<8x24xf32>
    %346 = arith.addf %345, %32 : vector<8x24xf32>
    %347 = arith.mulf %335, %346 : vector<8x24xf32>
    %348 = arith.addf %344, %347 : vector<8x24xf32>
    %349 = math.tanh %348 : vector<8x24xf32>
    %cst_107 = arith.constant 1.000000e+00 : f32
    %350 = vector.broadcast %cst_107 : f32 to vector<8x24xf32>
    %351 = arith.subf %350, %343 : vector<8x24xf32>
    %352 = arith.mulf %351, %349 : vector<8x24xf32>
    %353 = arith.mulf %343, %325 : vector<8x24xf32>
    %354 = arith.addf %352, %353 : vector<8x24xf32>
    %cst_108 = arith.constant dense<0.000000e+00> : vector<8x48xf32>
    %355 = tpu.matmul %301, %10, %cst_108 {dimension_numbers = #tpu.dot_dimension_numbers<[1], [0], [0], [1], [0, 0, 1, 1], [], []>} : vector<8x24xf32>, vector<24x48xf32>, vector<8x48xf32> -> vector<8x48xf32>
    %356 = vector.extract_strided_slice %355 {offsets = [0, 0], sizes = [8, 24], strides = [1, 1]} : vector<8x48xf32> to vector<8x24xf32>
    %357 = arith.negf %356 : vector<8x24xf32>
    %358 = math.exp %357 : vector<8x24xf32>
    %cst_109 = arith.constant 1.000000e+00 : f32
    %359 = vector.broadcast %cst_109 : f32 to vector<8x24xf32>
    %360 = arith.addf %359, %358 : vector<8x24xf32>
    %361 = arith.divf %359, %360 : vector<8x24xf32>
    %362 = vector.extract_strided_slice %355 {offsets = [0, 24], sizes = [8, 24], strides = [1, 1]} : vector<8x48xf32> to vector<8x24xf32>
    %363 = arith.negf %362 : vector<8x24xf32>
    %364 = math.exp %363 : vector<8x24xf32>
    %cst_110 = arith.constant 1.000000e+00 : f32
    %365 = vector.broadcast %cst_110 : f32 to vector<8x24xf32>
    %366 = arith.addf %365, %364 : vector<8x24xf32>
    %367 = arith.divf %365, %366 : vector<8x24xf32>
    %368 = arith.mulf %361, %301 : vector<8x24xf32>
    %cst_111 = arith.constant dense<0.000000e+00> : vector<8x24xf32>
    %369 = tpu.matmul %368, %11, %cst_111 {dimension_numbers = #tpu.dot_dimension_numbers<[1], [0], [0], [1], [0, 0, 1, 1], [], []>} : vector<8x24xf32>, vector<24x24xf32>, vector<8x24xf32> -> vector<8x24xf32>
    %370 = math.tanh %369 : vector<8x24xf32>
    %cst_112 = arith.constant 1.000000e+00 : f32
    %371 = vector.broadcast %cst_112 : f32 to vector<8x24xf32>
    %372 = arith.subf %371, %367 : vector<8x24xf32>
    %373 = arith.subf %370, %301 : vector<8x24xf32>
    %374 = arith.mulf %372, %373 : vector<8x24xf32>
    %cst_113 = arith.constant 1.000000e+00 : f32
    %375 = vector.broadcast %cst_113 : f32 to vector<8x24xf32>
    %376 = arith.mulf %375, %374 : vector<8x24xf32>
    %377 = arith.addf %301, %376 : vector<8x24xf32>
    %cst_114 = arith.constant dense<0.000000e+00> : vector<8x72xf32>
    %378 = tpu.matmul %247, %12, %cst_114 {dimension_numbers = #tpu.dot_dimension_numbers<[1], [0], [0], [1], [0, 0, 1, 1], [], []>} : vector<8x24xf32>, vector<24x72xf32>, vector<8x72xf32> -> vector<8x72xf32>
    %379 = vector.broadcast %13 : vector<1x72xf32> to vector<8x72xf32>
    %380 = arith.addf %378, %379 : vector<8x72xf32>
    %cst_115 = arith.constant dense<0.000000e+00> : vector<8x72xf32>
    %381 = tpu.matmul %377, %14, %cst_115 {dimension_numbers = #tpu.dot_dimension_numbers<[1], [0], [0], [1], [0, 0, 1, 1], [], []>} : vector<8x24xf32>, vector<24x72xf32>, vector<8x72xf32> -> vector<8x72xf32>
    %382 = vector.extract_strided_slice %380 {offsets = [0, 0], sizes = [8, 24], strides = [1, 1]} : vector<8x72xf32> to vector<8x24xf32>
    %383 = vector.extract_strided_slice %381 {offsets = [0, 0], sizes = [8, 24], strides = [1, 1]} : vector<8x72xf32> to vector<8x24xf32>
    %384 = arith.addf %382, %383 : vector<8x24xf32>
    %385 = arith.negf %384 : vector<8x24xf32>
    %386 = math.exp %385 : vector<8x24xf32>
    %cst_116 = arith.constant 1.000000e+00 : f32
    %387 = vector.broadcast %cst_116 : f32 to vector<8x24xf32>
    %388 = arith.addf %387, %386 : vector<8x24xf32>
    %389 = arith.divf %387, %388 : vector<8x24xf32>
    %390 = vector.extract_strided_slice %380 {offsets = [0, 24], sizes = [8, 24], strides = [1, 1]} : vector<8x72xf32> to vector<8x24xf32>
    %391 = vector.extract_strided_slice %381 {offsets = [0, 24], sizes = [8, 24], strides = [1, 1]} : vector<8x72xf32> to vector<8x24xf32>
    %392 = arith.addf %390, %391 : vector<8x24xf32>
    %393 = arith.negf %392 : vector<8x24xf32>
    %394 = math.exp %393 : vector<8x24xf32>
    %cst_117 = arith.constant 1.000000e+00 : f32
    %395 = vector.broadcast %cst_117 : f32 to vector<8x24xf32>
    %396 = arith.addf %395, %394 : vector<8x24xf32>
    %397 = arith.divf %395, %396 : vector<8x24xf32>
    %398 = vector.extract_strided_slice %380 {offsets = [0, 48], sizes = [8, 24], strides = [1, 1]} : vector<8x72xf32> to vector<8x24xf32>
    %399 = vector.extract_strided_slice %381 {offsets = [0, 48], sizes = [8, 24], strides = [1, 1]} : vector<8x72xf32> to vector<8x24xf32>
    %400 = arith.addf %399, %34 : vector<8x24xf32>
    %401 = arith.mulf %389, %400 : vector<8x24xf32>
    %402 = arith.addf %398, %401 : vector<8x24xf32>
    %403 = math.tanh %402 : vector<8x24xf32>
    %cst_118 = arith.constant 1.000000e+00 : f32
    %404 = vector.broadcast %cst_118 : f32 to vector<8x24xf32>
    %405 = arith.subf %404, %397 : vector<8x24xf32>
    %406 = arith.mulf %405, %403 : vector<8x24xf32>
    %407 = arith.mulf %397, %377 : vector<8x24xf32>
    %408 = arith.addf %406, %407 : vector<8x24xf32>
    %c16 = arith.constant 16 : index
    %c0_119 = arith.constant 0 : index
    %409 = vector.load %arg21[%c16, %c0_119] : memref<64x24xf32, #tpu.memory_space<vmem>>, vector<8x24xf32>
    tpu.vector_store %arg21[%c16, %c0_119], %408 {strides = array<i32>} : memref<64x24xf32, #tpu.memory_space<vmem>>, vector<8x24xf32>,
    %cst_120 = arith.constant dense<0.000000e+00> : vector<8x48xf32>
    %410 = tpu.matmul %354, %4, %cst_120 {dimension_numbers = #tpu.dot_dimension_numbers<[1], [0], [0], [1], [0, 0, 1, 1], [], []>} : vector<8x24xf32>, vector<24x48xf32>, vector<8x48xf32> -> vector<8x48xf32>
    %411 = vector.extract_strided_slice %410 {offsets = [0, 0], sizes = [8, 24], strides = [1, 1]} : vector<8x48xf32> to vector<8x24xf32>
    %412 = arith.negf %411 : vector<8x24xf32>
    %413 = math.exp %412 : vector<8x24xf32>
    %cst_121 = arith.constant 1.000000e+00 : f32
    %414 = vector.broadcast %cst_121 : f32 to vector<8x24xf32>
    %415 = arith.addf %414, %413 : vector<8x24xf32>
    %416 = arith.divf %414, %415 : vector<8x24xf32>
    %417 = vector.extract_strided_slice %410 {offsets = [0, 24], sizes = [8, 24], strides = [1, 1]} : vector<8x48xf32> to vector<8x24xf32>
    %418 = arith.negf %417 : vector<8x24xf32>
    %419 = math.exp %418 : vector<8x24xf32>
    %cst_122 = arith.constant 1.000000e+00 : f32
    %420 = vector.broadcast %cst_122 : f32 to vector<8x24xf32>
    %421 = arith.addf %420, %419 : vector<8x24xf32>
    %422 = arith.divf %420, %421 : vector<8x24xf32>
    %423 = arith.mulf %416, %354 : vector<8x24xf32>
    %cst_123 = arith.constant dense<0.000000e+00> : vector<8x24xf32>
    %424 = tpu.matmul %423, %5, %cst_123 {dimension_numbers = #tpu.dot_dimension_numbers<[1], [0], [0], [1], [0, 0, 1, 1], [], []>} : vector<8x24xf32>, vector<24x24xf32>, vector<8x24xf32> -> vector<8x24xf32>
    %425 = math.tanh %424 : vector<8x24xf32>
    %cst_124 = arith.constant 1.000000e+00 : f32
    %426 = vector.broadcast %cst_124 : f32 to vector<8x24xf32>
    %427 = arith.subf %426, %422 : vector<8x24xf32>
    %428 = arith.subf %425, %354 : vector<8x24xf32>
    %429 = arith.mulf %427, %428 : vector<8x24xf32>
    %cst_125 = arith.constant 1.000000e+00 : f32
    %430 = vector.broadcast %cst_125 : f32 to vector<8x24xf32>
    %431 = arith.mulf %430, %429 : vector<8x24xf32>
    %432 = arith.addf %354, %431 : vector<8x24xf32>
    %433 = vector.extract_strided_slice %30 {offsets = [32, 0], sizes = [8, 72], strides = [1, 1]} : vector<64x72xf32> to vector<8x72xf32>
    %cst_126 = arith.constant dense<0.000000e+00> : vector<8x72xf32>
    %434 = tpu.matmul %432, %8, %cst_126 {dimension_numbers = #tpu.dot_dimension_numbers<[1], [0], [0], [1], [0, 0, 1, 1], [], []>} : vector<8x24xf32>, vector<24x72xf32>, vector<8x72xf32> -> vector<8x72xf32>
    %435 = vector.extract_strided_slice %433 {offsets = [0, 0], sizes = [8, 24], strides = [1, 1]} : vector<8x72xf32> to vector<8x24xf32>
    %436 = vector.extract_strided_slice %434 {offsets = [0, 0], sizes = [8, 24], strides = [1, 1]} : vector<8x72xf32> to vector<8x24xf32>
    %437 = arith.addf %435, %436 : vector<8x24xf32>
    %438 = arith.negf %437 : vector<8x24xf32>
    %439 = math.exp %438 : vector<8x24xf32>
    %cst_127 = arith.constant 1.000000e+00 : f32
    %440 = vector.broadcast %cst_127 : f32 to vector<8x24xf32>
    %441 = arith.addf %440, %439 : vector<8x24xf32>
    %442 = arith.divf %440, %441 : vector<8x24xf32>
    %443 = vector.extract_strided_slice %433 {offsets = [0, 24], sizes = [8, 24], strides = [1, 1]} : vector<8x72xf32> to vector<8x24xf32>
    %444 = vector.extract_strided_slice %434 {offsets = [0, 24], sizes = [8, 24], strides = [1, 1]} : vector<8x72xf32> to vector<8x24xf32>
    %445 = arith.addf %443, %444 : vector<8x24xf32>
    %446 = arith.negf %445 : vector<8x24xf32>
    %447 = math.exp %446 : vector<8x24xf32>
    %cst_128 = arith.constant 1.000000e+00 : f32
    %448 = vector.broadcast %cst_128 : f32 to vector<8x24xf32>
    %449 = arith.addf %448, %447 : vector<8x24xf32>
    %450 = arith.divf %448, %449 : vector<8x24xf32>
    %451 = vector.extract_strided_slice %433 {offsets = [0, 48], sizes = [8, 24], strides = [1, 1]} : vector<8x72xf32> to vector<8x24xf32>
    %452 = vector.extract_strided_slice %434 {offsets = [0, 48], sizes = [8, 24], strides = [1, 1]} : vector<8x72xf32> to vector<8x24xf32>
    %453 = arith.addf %452, %32 : vector<8x24xf32>
    %454 = arith.mulf %442, %453 : vector<8x24xf32>
    %455 = arith.addf %451, %454 : vector<8x24xf32>
    %456 = math.tanh %455 : vector<8x24xf32>
    %cst_129 = arith.constant 1.000000e+00 : f32
    %457 = vector.broadcast %cst_129 : f32 to vector<8x24xf32>
    %458 = arith.subf %457, %450 : vector<8x24xf32>
    %459 = arith.mulf %458, %456 : vector<8x24xf32>
    %460 = arith.mulf %450, %432 : vector<8x24xf32>
    %461 = arith.addf %459, %460 : vector<8x24xf32>
    %cst_130 = arith.constant dense<0.000000e+00> : vector<8x48xf32>
    %462 = tpu.matmul %408, %10, %cst_130 {dimension_numbers = #tpu.dot_dimension_numbers<[1], [0], [0], [1], [0, 0, 1, 1], [], []>} : vector<8x24xf32>, vector<24x48xf32>, vector<8x48xf32> -> vector<8x48xf32>
    %463 = vector.extract_strided_slice %462 {offsets = [0, 0], sizes = [8, 24], strides = [1, 1]} : vector<8x48xf32> to vector<8x24xf32>
    %464 = arith.negf %463 : vector<8x24xf32>
    %465 = math.exp %464 : vector<8x24xf32>
    %cst_131 = arith.constant 1.000000e+00 : f32
    %466 = vector.broadcast %cst_131 : f32 to vector<8x24xf32>
    %467 = arith.addf %466, %465 : vector<8x24xf32>
    %468 = arith.divf %466, %467 : vector<8x24xf32>
    %469 = vector.extract_strided_slice %462 {offsets = [0, 24], sizes = [8, 24], strides = [1, 1]} : vector<8x48xf32> to vector<8x24xf32>
    %470 = arith.negf %469 : vector<8x24xf32>
    %471 = math.exp %470 : vector<8x24xf32>
    %cst_132 = arith.constant 1.000000e+00 : f32
    %472 = vector.broadcast %cst_132 : f32 to vector<8x24xf32>
    %473 = arith.addf %472, %471 : vector<8x24xf32>
    %474 = arith.divf %472, %473 : vector<8x24xf32>
    %475 = arith.mulf %468, %408 : vector<8x24xf32>
    %cst_133 = arith.constant dense<0.000000e+00> : vector<8x24xf32>
    %476 = tpu.matmul %475, %11, %cst_133 {dimension_numbers = #tpu.dot_dimension_numbers<[1], [0], [0], [1], [0, 0, 1, 1], [], []>} : vector<8x24xf32>, vector<24x24xf32>, vector<8x24xf32> -> vector<8x24xf32>
    %477 = math.tanh %476 : vector<8x24xf32>
    %cst_134 = arith.constant 1.000000e+00 : f32
    %478 = vector.broadcast %cst_134 : f32 to vector<8x24xf32>
    %479 = arith.subf %478, %474 : vector<8x24xf32>
    %480 = arith.subf %477, %408 : vector<8x24xf32>
    %481 = arith.mulf %479, %480 : vector<8x24xf32>
    %cst_135 = arith.constant 1.000000e+00 : f32
    %482 = vector.broadcast %cst_135 : f32 to vector<8x24xf32>
    %483 = arith.mulf %482, %481 : vector<8x24xf32>
    %484 = arith.addf %408, %483 : vector<8x24xf32>
    %cst_136 = arith.constant dense<0.000000e+00> : vector<8x72xf32>
    %485 = tpu.matmul %354, %12, %cst_136 {dimension_numbers = #tpu.dot_dimension_numbers<[1], [0], [0], [1], [0, 0, 1, 1], [], []>} : vector<8x24xf32>, vector<24x72xf32>, vector<8x72xf32> -> vector<8x72xf32>
    %486 = vector.broadcast %13 : vector<1x72xf32> to vector<8x72xf32>
    %487 = arith.addf %485, %486 : vector<8x72xf32>
    %cst_137 = arith.constant dense<0.000000e+00> : vector<8x72xf32>
    %488 = tpu.matmul %484, %14, %cst_137 {dimension_numbers = #tpu.dot_dimension_numbers<[1], [0], [0], [1], [0, 0, 1, 1], [], []>} : vector<8x24xf32>, vector<24x72xf32>, vector<8x72xf32> -> vector<8x72xf32>
    %489 = vector.extract_strided_slice %487 {offsets = [0, 0], sizes = [8, 24], strides = [1, 1]} : vector<8x72xf32> to vector<8x24xf32>
    %490 = vector.extract_strided_slice %488 {offsets = [0, 0], sizes = [8, 24], strides = [1, 1]} : vector<8x72xf32> to vector<8x24xf32>
    %491 = arith.addf %489, %490 : vector<8x24xf32>
    %492 = arith.negf %491 : vector<8x24xf32>
    %493 = math.exp %492 : vector<8x24xf32>
    %cst_138 = arith.constant 1.000000e+00 : f32
    %494 = vector.broadcast %cst_138 : f32 to vector<8x24xf32>
    %495 = arith.addf %494, %493 : vector<8x24xf32>
    %496 = arith.divf %494, %495 : vector<8x24xf32>
    %497 = vector.extract_strided_slice %487 {offsets = [0, 24], sizes = [8, 24], strides = [1, 1]} : vector<8x72xf32> to vector<8x24xf32>
    %498 = vector.extract_strided_slice %488 {offsets = [0, 24], sizes = [8, 24], strides = [1, 1]} : vector<8x72xf32> to vector<8x24xf32>
    %499 = arith.addf %497, %498 : vector<8x24xf32>
    %500 = arith.negf %499 : vector<8x24xf32>
    %501 = math.exp %500 : vector<8x24xf32>
    %cst_139 = arith.constant 1.000000e+00 : f32
    %502 = vector.broadcast %cst_139 : f32 to vector<8x24xf32>
    %503 = arith.addf %502, %501 : vector<8x24xf32>
    %504 = arith.divf %502, %503 : vector<8x24xf32>
    %505 = vector.extract_strided_slice %487 {offsets = [0, 48], sizes = [8, 24], strides = [1, 1]} : vector<8x72xf32> to vector<8x24xf32>
    %506 = vector.extract_strided_slice %488 {offsets = [0, 48], sizes = [8, 24], strides = [1, 1]} : vector<8x72xf32> to vector<8x24xf32>
    %507 = arith.addf %506, %34 : vector<8x24xf32>
    %508 = arith.mulf %496, %507 : vector<8x24xf32>
    %509 = arith.addf %505, %508 : vector<8x24xf32>
    %510 = math.tanh %509 : vector<8x24xf32>
    %cst_140 = arith.constant 1.000000e+00 : f32
    %511 = vector.broadcast %cst_140 : f32 to vector<8x24xf32>
    %512 = arith.subf %511, %504 : vector<8x24xf32>
    %513 = arith.mulf %512, %510 : vector<8x24xf32>
    %514 = arith.mulf %504, %484 : vector<8x24xf32>
    %515 = arith.addf %513, %514 : vector<8x24xf32>
    %c24 = arith.constant 24 : index
    %c0_141 = arith.constant 0 : index
    %516 = vector.load %arg21[%c24, %c0_141] : memref<64x24xf32, #tpu.memory_space<vmem>>, vector<8x24xf32>
    tpu.vector_store %arg21[%c24, %c0_141], %515 {strides = array<i32>} : memref<64x24xf32, #tpu.memory_space<vmem>>, vector<8x24xf32>,
    %cst_142 = arith.constant dense<0.000000e+00> : vector<8x48xf32>
    %517 = tpu.matmul %461, %4, %cst_142 {dimension_numbers = #tpu.dot_dimension_numbers<[1], [0], [0], [1], [0, 0, 1, 1], [], []>} : vector<8x24xf32>, vector<24x48xf32>, vector<8x48xf32> -> vector<8x48xf32>
    %518 = vector.extract_strided_slice %517 {offsets = [0, 0], sizes = [8, 24], strides = [1, 1]} : vector<8x48xf32> to vector<8x24xf32>
    %519 = arith.negf %518 : vector<8x24xf32>
    %520 = math.exp %519 : vector<8x24xf32>
    %cst_143 = arith.constant 1.000000e+00 : f32
    %521 = vector.broadcast %cst_143 : f32 to vector<8x24xf32>
    %522 = arith.addf %521, %520 : vector<8x24xf32>
    %523 = arith.divf %521, %522 : vector<8x24xf32>
    %524 = vector.extract_strided_slice %517 {offsets = [0, 24], sizes = [8, 24], strides = [1, 1]} : vector<8x48xf32> to vector<8x24xf32>
    %525 = arith.negf %524 : vector<8x24xf32>
    %526 = math.exp %525 : vector<8x24xf32>
    %cst_144 = arith.constant 1.000000e+00 : f32
    %527 = vector.broadcast %cst_144 : f32 to vector<8x24xf32>
    %528 = arith.addf %527, %526 : vector<8x24xf32>
    %529 = arith.divf %527, %528 : vector<8x24xf32>
    %530 = arith.mulf %523, %461 : vector<8x24xf32>
    %cst_145 = arith.constant dense<0.000000e+00> : vector<8x24xf32>
    %531 = tpu.matmul %530, %5, %cst_145 {dimension_numbers = #tpu.dot_dimension_numbers<[1], [0], [0], [1], [0, 0, 1, 1], [], []>} : vector<8x24xf32>, vector<24x24xf32>, vector<8x24xf32> -> vector<8x24xf32>
    %532 = math.tanh %531 : vector<8x24xf32>
    %cst_146 = arith.constant 1.000000e+00 : f32
    %533 = vector.broadcast %cst_146 : f32 to vector<8x24xf32>
    %534 = arith.subf %533, %529 : vector<8x24xf32>
    %535 = arith.subf %532, %461 : vector<8x24xf32>
    %536 = arith.mulf %534, %535 : vector<8x24xf32>
    %cst_147 = arith.constant 1.000000e+00 : f32
    %537 = vector.broadcast %cst_147 : f32 to vector<8x24xf32>
    %538 = arith.mulf %537, %536 : vector<8x24xf32>
    %539 = arith.addf %461, %538 : vector<8x24xf32>
    %540 = vector.extract_strided_slice %30 {offsets = [40, 0], sizes = [8, 72], strides = [1, 1]} : vector<64x72xf32> to vector<8x72xf32>
    %cst_148 = arith.constant dense<0.000000e+00> : vector<8x72xf32>
    %541 = tpu.matmul %539, %8, %cst_148 {dimension_numbers = #tpu.dot_dimension_numbers<[1], [0], [0], [1], [0, 0, 1, 1], [], []>} : vector<8x24xf32>, vector<24x72xf32>, vector<8x72xf32> -> vector<8x72xf32>
    %542 = vector.extract_strided_slice %540 {offsets = [0, 0], sizes = [8, 24], strides = [1, 1]} : vector<8x72xf32> to vector<8x24xf32>
    %543 = vector.extract_strided_slice %541 {offsets = [0, 0], sizes = [8, 24], strides = [1, 1]} : vector<8x72xf32> to vector<8x24xf32>
    %544 = arith.addf %542, %543 : vector<8x24xf32>
    %545 = arith.negf %544 : vector<8x24xf32>
    %546 = math.exp %545 : vector<8x24xf32>
    %cst_149 = arith.constant 1.000000e+00 : f32
    %547 = vector.broadcast %cst_149 : f32 to vector<8x24xf32>
    %548 = arith.addf %547, %546 : vector<8x24xf32>
    %549 = arith.divf %547, %548 : vector<8x24xf32>
    %550 = vector.extract_strided_slice %540 {offsets = [0, 24], sizes = [8, 24], strides = [1, 1]} : vector<8x72xf32> to vector<8x24xf32>
    %551 = vector.extract_strided_slice %541 {offsets = [0, 24], sizes = [8, 24], strides = [1, 1]} : vector<8x72xf32> to vector<8x24xf32>
    %552 = arith.addf %550, %551 : vector<8x24xf32>
    %553 = arith.negf %552 : vector<8x24xf32>
    %554 = math.exp %553 : vector<8x24xf32>
    %cst_150 = arith.constant 1.000000e+00 : f32
    %555 = vector.broadcast %cst_150 : f32 to vector<8x24xf32>
    %556 = arith.addf %555, %554 : vector<8x24xf32>
    %557 = arith.divf %555, %556 : vector<8x24xf32>
    %558 = vector.extract_strided_slice %540 {offsets = [0, 48], sizes = [8, 24], strides = [1, 1]} : vector<8x72xf32> to vector<8x24xf32>
    %559 = vector.extract_strided_slice %541 {offsets = [0, 48], sizes = [8, 24], strides = [1, 1]} : vector<8x72xf32> to vector<8x24xf32>
    %560 = arith.addf %559, %32 : vector<8x24xf32>
    %561 = arith.mulf %549, %560 : vector<8x24xf32>
    %562 = arith.addf %558, %561 : vector<8x24xf32>
    %563 = math.tanh %562 : vector<8x24xf32>
    %cst_151 = arith.constant 1.000000e+00 : f32
    %564 = vector.broadcast %cst_151 : f32 to vector<8x24xf32>
    %565 = arith.subf %564, %557 : vector<8x24xf32>
    %566 = arith.mulf %565, %563 : vector<8x24xf32>
    %567 = arith.mulf %557, %539 : vector<8x24xf32>
    %568 = arith.addf %566, %567 : vector<8x24xf32>
    %cst_152 = arith.constant dense<0.000000e+00> : vector<8x48xf32>
    %569 = tpu.matmul %515, %10, %cst_152 {dimension_numbers = #tpu.dot_dimension_numbers<[1], [0], [0], [1], [0, 0, 1, 1], [], []>} : vector<8x24xf32>, vector<24x48xf32>, vector<8x48xf32> -> vector<8x48xf32>
    %570 = vector.extract_strided_slice %569 {offsets = [0, 0], sizes = [8, 24], strides = [1, 1]} : vector<8x48xf32> to vector<8x24xf32>
    %571 = arith.negf %570 : vector<8x24xf32>
    %572 = math.exp %571 : vector<8x24xf32>
    %cst_153 = arith.constant 1.000000e+00 : f32
    %573 = vector.broadcast %cst_153 : f32 to vector<8x24xf32>
    %574 = arith.addf %573, %572 : vector<8x24xf32>
    %575 = arith.divf %573, %574 : vector<8x24xf32>
    %576 = vector.extract_strided_slice %569 {offsets = [0, 24], sizes = [8, 24], strides = [1, 1]} : vector<8x48xf32> to vector<8x24xf32>
    %577 = arith.negf %576 : vector<8x24xf32>
    %578 = math.exp %577 : vector<8x24xf32>
    %cst_154 = arith.constant 1.000000e+00 : f32
    %579 = vector.broadcast %cst_154 : f32 to vector<8x24xf32>
    %580 = arith.addf %579, %578 : vector<8x24xf32>
    %581 = arith.divf %579, %580 : vector<8x24xf32>
    %582 = arith.mulf %575, %515 : vector<8x24xf32>
    %cst_155 = arith.constant dense<0.000000e+00> : vector<8x24xf32>
    %583 = tpu.matmul %582, %11, %cst_155 {dimension_numbers = #tpu.dot_dimension_numbers<[1], [0], [0], [1], [0, 0, 1, 1], [], []>} : vector<8x24xf32>, vector<24x24xf32>, vector<8x24xf32> -> vector<8x24xf32>
    %584 = math.tanh %583 : vector<8x24xf32>
    %cst_156 = arith.constant 1.000000e+00 : f32
    %585 = vector.broadcast %cst_156 : f32 to vector<8x24xf32>
    %586 = arith.subf %585, %581 : vector<8x24xf32>
    %587 = arith.subf %584, %515 : vector<8x24xf32>
    %588 = arith.mulf %586, %587 : vector<8x24xf32>
    %cst_157 = arith.constant 1.000000e+00 : f32
    %589 = vector.broadcast %cst_157 : f32 to vector<8x24xf32>
    %590 = arith.mulf %589, %588 : vector<8x24xf32>
    %591 = arith.addf %515, %590 : vector<8x24xf32>
    %cst_158 = arith.constant dense<0.000000e+00> : vector<8x72xf32>
    %592 = tpu.matmul %461, %12, %cst_158 {dimension_numbers = #tpu.dot_dimension_numbers<[1], [0], [0], [1], [0, 0, 1, 1], [], []>} : vector<8x24xf32>, vector<24x72xf32>, vector<8x72xf32> -> vector<8x72xf32>
    %593 = vector.broadcast %13 : vector<1x72xf32> to vector<8x72xf32>
    %594 = arith.addf %592, %593 : vector<8x72xf32>
    %cst_159 = arith.constant dense<0.000000e+00> : vector<8x72xf32>
    %595 = tpu.matmul %591, %14, %cst_159 {dimension_numbers = #tpu.dot_dimension_numbers<[1], [0], [0], [1], [0, 0, 1, 1], [], []>} : vector<8x24xf32>, vector<24x72xf32>, vector<8x72xf32> -> vector<8x72xf32>
    %596 = vector.extract_strided_slice %594 {offsets = [0, 0], sizes = [8, 24], strides = [1, 1]} : vector<8x72xf32> to vector<8x24xf32>
    %597 = vector.extract_strided_slice %595 {offsets = [0, 0], sizes = [8, 24], strides = [1, 1]} : vector<8x72xf32> to vector<8x24xf32>
    %598 = arith.addf %596, %597 : vector<8x24xf32>
    %599 = arith.negf %598 : vector<8x24xf32>
    %600 = math.exp %599 : vector<8x24xf32>
    %cst_160 = arith.constant 1.000000e+00 : f32
    %601 = vector.broadcast %cst_160 : f32 to vector<8x24xf32>
    %602 = arith.addf %601, %600 : vector<8x24xf32>
    %603 = arith.divf %601, %602 : vector<8x24xf32>
    %604 = vector.extract_strided_slice %594 {offsets = [0, 24], sizes = [8, 24], strides = [1, 1]} : vector<8x72xf32> to vector<8x24xf32>
    %605 = vector.extract_strided_slice %595 {offsets = [0, 24], sizes = [8, 24], strides = [1, 1]} : vector<8x72xf32> to vector<8x24xf32>
    %606 = arith.addf %604, %605 : vector<8x24xf32>
    %607 = arith.negf %606 : vector<8x24xf32>
    %608 = math.exp %607 : vector<8x24xf32>
    %cst_161 = arith.constant 1.000000e+00 : f32
    %609 = vector.broadcast %cst_161 : f32 to vector<8x24xf32>
    %610 = arith.addf %609, %608 : vector<8x24xf32>
    %611 = arith.divf %609, %610 : vector<8x24xf32>
    %612 = vector.extract_strided_slice %594 {offsets = [0, 48], sizes = [8, 24], strides = [1, 1]} : vector<8x72xf32> to vector<8x24xf32>
    %613 = vector.extract_strided_slice %595 {offsets = [0, 48], sizes = [8, 24], strides = [1, 1]} : vector<8x72xf32> to vector<8x24xf32>
    %614 = arith.addf %613, %34 : vector<8x24xf32>
    %615 = arith.mulf %603, %614 : vector<8x24xf32>
    %616 = arith.addf %612, %615 : vector<8x24xf32>
    %617 = math.tanh %616 : vector<8x24xf32>
    %cst_162 = arith.constant 1.000000e+00 : f32
    %618 = vector.broadcast %cst_162 : f32 to vector<8x24xf32>
    %619 = arith.subf %618, %611 : vector<8x24xf32>
    %620 = arith.mulf %619, %617 : vector<8x24xf32>
    %621 = arith.mulf %611, %591 : vector<8x24xf32>
    %622 = arith.addf %620, %621 : vector<8x24xf32>
    %c32 = arith.constant 32 : index
    %c0_163 = arith.constant 0 : index
    %623 = vector.load %arg21[%c32, %c0_163] : memref<64x24xf32, #tpu.memory_space<vmem>>, vector<8x24xf32>
    tpu.vector_store %arg21[%c32, %c0_163], %622 {strides = array<i32>} : memref<64x24xf32, #tpu.memory_space<vmem>>, vector<8x24xf32>,
    %cst_164 = arith.constant dense<0.000000e+00> : vector<8x48xf32>
    %624 = tpu.matmul %568, %4, %cst_164 {dimension_numbers = #tpu.dot_dimension_numbers<[1], [0], [0], [1], [0, 0, 1, 1], [], []>} : vector<8x24xf32>, vector<24x48xf32>, vector<8x48xf32> -> vector<8x48xf32>
    %625 = vector.extract_strided_slice %624 {offsets = [0, 0], sizes = [8, 24], strides = [1, 1]} : vector<8x48xf32> to vector<8x24xf32>
    %626 = arith.negf %625 : vector<8x24xf32>
    %627 = math.exp %626 : vector<8x24xf32>
    %cst_165 = arith.constant 1.000000e+00 : f32
    %628 = vector.broadcast %cst_165 : f32 to vector<8x24xf32>
    %629 = arith.addf %628, %627 : vector<8x24xf32>
    %630 = arith.divf %628, %629 : vector<8x24xf32>
    %631 = vector.extract_strided_slice %624 {offsets = [0, 24], sizes = [8, 24], strides = [1, 1]} : vector<8x48xf32> to vector<8x24xf32>
    %632 = arith.negf %631 : vector<8x24xf32>
    %633 = math.exp %632 : vector<8x24xf32>
    %cst_166 = arith.constant 1.000000e+00 : f32
    %634 = vector.broadcast %cst_166 : f32 to vector<8x24xf32>
    %635 = arith.addf %634, %633 : vector<8x24xf32>
    %636 = arith.divf %634, %635 : vector<8x24xf32>
    %637 = arith.mulf %630, %568 : vector<8x24xf32>
    %cst_167 = arith.constant dense<0.000000e+00> : vector<8x24xf32>
    %638 = tpu.matmul %637, %5, %cst_167 {dimension_numbers = #tpu.dot_dimension_numbers<[1], [0], [0], [1], [0, 0, 1, 1], [], []>} : vector<8x24xf32>, vector<24x24xf32>, vector<8x24xf32> -> vector<8x24xf32>
    %639 = math.tanh %638 : vector<8x24xf32>
    %cst_168 = arith.constant 1.000000e+00 : f32
    %640 = vector.broadcast %cst_168 : f32 to vector<8x24xf32>
    %641 = arith.subf %640, %636 : vector<8x24xf32>
    %642 = arith.subf %639, %568 : vector<8x24xf32>
    %643 = arith.mulf %641, %642 : vector<8x24xf32>
    %cst_169 = arith.constant 1.000000e+00 : f32
    %644 = vector.broadcast %cst_169 : f32 to vector<8x24xf32>
    %645 = arith.mulf %644, %643 : vector<8x24xf32>
    %646 = arith.addf %568, %645 : vector<8x24xf32>
    %647 = vector.extract_strided_slice %30 {offsets = [48, 0], sizes = [8, 72], strides = [1, 1]} : vector<64x72xf32> to vector<8x72xf32>
    %cst_170 = arith.constant dense<0.000000e+00> : vector<8x72xf32>
    %648 = tpu.matmul %646, %8, %cst_170 {dimension_numbers = #tpu.dot_dimension_numbers<[1], [0], [0], [1], [0, 0, 1, 1], [], []>} : vector<8x24xf32>, vector<24x72xf32>, vector<8x72xf32> -> vector<8x72xf32>
    %649 = vector.extract_strided_slice %647 {offsets = [0, 0], sizes = [8, 24], strides = [1, 1]} : vector<8x72xf32> to vector<8x24xf32>
    %650 = vector.extract_strided_slice %648 {offsets = [0, 0], sizes = [8, 24], strides = [1, 1]} : vector<8x72xf32> to vector<8x24xf32>
    %651 = arith.addf %649, %650 : vector<8x24xf32>
    %652 = arith.negf %651 : vector<8x24xf32>
    %653 = math.exp %652 : vector<8x24xf32>
    %cst_171 = arith.constant 1.000000e+00 : f32
    %654 = vector.broadcast %cst_171 : f32 to vector<8x24xf32>
    %655 = arith.addf %654, %653 : vector<8x24xf32>
    %656 = arith.divf %654, %655 : vector<8x24xf32>
    %657 = vector.extract_strided_slice %647 {offsets = [0, 24], sizes = [8, 24], strides = [1, 1]} : vector<8x72xf32> to vector<8x24xf32>
    %658 = vector.extract_strided_slice %648 {offsets = [0, 24], sizes = [8, 24], strides = [1, 1]} : vector<8x72xf32> to vector<8x24xf32>
    %659 = arith.addf %657, %658 : vector<8x24xf32>
    %660 = arith.negf %659 : vector<8x24xf32>
    %661 = math.exp %660 : vector<8x24xf32>
    %cst_172 = arith.constant 1.000000e+00 : f32
    %662 = vector.broadcast %cst_172 : f32 to vector<8x24xf32>
    %663 = arith.addf %662, %661 : vector<8x24xf32>
    %664 = arith.divf %662, %663 : vector<8x24xf32>
    %665 = vector.extract_strided_slice %647 {offsets = [0, 48], sizes = [8, 24], strides = [1, 1]} : vector<8x72xf32> to vector<8x24xf32>
    %666 = vector.extract_strided_slice %648 {offsets = [0, 48], sizes = [8, 24], strides = [1, 1]} : vector<8x72xf32> to vector<8x24xf32>
    %667 = arith.addf %666, %32 : vector<8x24xf32>
    %668 = arith.mulf %656, %667 : vector<8x24xf32>
    %669 = arith.addf %665, %668 : vector<8x24xf32>
    %670 = math.tanh %669 : vector<8x24xf32>
    %cst_173 = arith.constant 1.000000e+00 : f32
    %671 = vector.broadcast %cst_173 : f32 to vector<8x24xf32>
    %672 = arith.subf %671, %664 : vector<8x24xf32>
    %673 = arith.mulf %672, %670 : vector<8x24xf32>
    %674 = arith.mulf %664, %646 : vector<8x24xf32>
    %675 = arith.addf %673, %674 : vector<8x24xf32>
    %cst_174 = arith.constant dense<0.000000e+00> : vector<8x48xf32>
    %676 = tpu.matmul %622, %10, %cst_174 {dimension_numbers = #tpu.dot_dimension_numbers<[1], [0], [0], [1], [0, 0, 1, 1], [], []>} : vector<8x24xf32>, vector<24x48xf32>, vector<8x48xf32> -> vector<8x48xf32>
    %677 = vector.extract_strided_slice %676 {offsets = [0, 0], sizes = [8, 24], strides = [1, 1]} : vector<8x48xf32> to vector<8x24xf32>
    %678 = arith.negf %677 : vector<8x24xf32>
    %679 = math.exp %678 : vector<8x24xf32>
    %cst_175 = arith.constant 1.000000e+00 : f32
    %680 = vector.broadcast %cst_175 : f32 to vector<8x24xf32>
    %681 = arith.addf %680, %679 : vector<8x24xf32>
    %682 = arith.divf %680, %681 : vector<8x24xf32>
    %683 = vector.extract_strided_slice %676 {offsets = [0, 24], sizes = [8, 24], strides = [1, 1]} : vector<8x48xf32> to vector<8x24xf32>
    %684 = arith.negf %683 : vector<8x24xf32>
    %685 = math.exp %684 : vector<8x24xf32>
    %cst_176 = arith.constant 1.000000e+00 : f32
    %686 = vector.broadcast %cst_176 : f32 to vector<8x24xf32>
    %687 = arith.addf %686, %685 : vector<8x24xf32>
    %688 = arith.divf %686, %687 : vector<8x24xf32>
    %689 = arith.mulf %682, %622 : vector<8x24xf32>
    %cst_177 = arith.constant dense<0.000000e+00> : vector<8x24xf32>
    %690 = tpu.matmul %689, %11, %cst_177 {dimension_numbers = #tpu.dot_dimension_numbers<[1], [0], [0], [1], [0, 0, 1, 1], [], []>} : vector<8x24xf32>, vector<24x24xf32>, vector<8x24xf32> -> vector<8x24xf32>
    %691 = math.tanh %690 : vector<8x24xf32>
    %cst_178 = arith.constant 1.000000e+00 : f32
    %692 = vector.broadcast %cst_178 : f32 to vector<8x24xf32>
    %693 = arith.subf %692, %688 : vector<8x24xf32>
    %694 = arith.subf %691, %622 : vector<8x24xf32>
    %695 = arith.mulf %693, %694 : vector<8x24xf32>
    %cst_179 = arith.constant 1.000000e+00 : f32
    %696 = vector.broadcast %cst_179 : f32 to vector<8x24xf32>
    %697 = arith.mulf %696, %695 : vector<8x24xf32>
    %698 = arith.addf %622, %697 : vector<8x24xf32>
    %cst_180 = arith.constant dense<0.000000e+00> : vector<8x72xf32>
    %699 = tpu.matmul %568, %12, %cst_180 {dimension_numbers = #tpu.dot_dimension_numbers<[1], [0], [0], [1], [0, 0, 1, 1], [], []>} : vector<8x24xf32>, vector<24x72xf32>, vector<8x72xf32> -> vector<8x72xf32>
    %700 = vector.broadcast %13 : vector<1x72xf32> to vector<8x72xf32>
    %701 = arith.addf %699, %700 : vector<8x72xf32>
    %cst_181 = arith.constant dense<0.000000e+00> : vector<8x72xf32>
    %702 = tpu.matmul %698, %14, %cst_181 {dimension_numbers = #tpu.dot_dimension_numbers<[1], [0], [0], [1], [0, 0, 1, 1], [], []>} : vector<8x24xf32>, vector<24x72xf32>, vector<8x72xf32> -> vector<8x72xf32>
    %703 = vector.extract_strided_slice %701 {offsets = [0, 0], sizes = [8, 24], strides = [1, 1]} : vector<8x72xf32> to vector<8x24xf32>
    %704 = vector.extract_strided_slice %702 {offsets = [0, 0], sizes = [8, 24], strides = [1, 1]} : vector<8x72xf32> to vector<8x24xf32>
    %705 = arith.addf %703, %704 : vector<8x24xf32>
    %706 = arith.negf %705 : vector<8x24xf32>
    %707 = math.exp %706 : vector<8x24xf32>
    %cst_182 = arith.constant 1.000000e+00 : f32
    %708 = vector.broadcast %cst_182 : f32 to vector<8x24xf32>
    %709 = arith.addf %708, %707 : vector<8x24xf32>
    %710 = arith.divf %708, %709 : vector<8x24xf32>
    %711 = vector.extract_strided_slice %701 {offsets = [0, 24], sizes = [8, 24], strides = [1, 1]} : vector<8x72xf32> to vector<8x24xf32>
    %712 = vector.extract_strided_slice %702 {offsets = [0, 24], sizes = [8, 24], strides = [1, 1]} : vector<8x72xf32> to vector<8x24xf32>
    %713 = arith.addf %711, %712 : vector<8x24xf32>
    %714 = arith.negf %713 : vector<8x24xf32>
    %715 = math.exp %714 : vector<8x24xf32>
    %cst_183 = arith.constant 1.000000e+00 : f32
    %716 = vector.broadcast %cst_183 : f32 to vector<8x24xf32>
    %717 = arith.addf %716, %715 : vector<8x24xf32>
    %718 = arith.divf %716, %717 : vector<8x24xf32>
    %719 = vector.extract_strided_slice %701 {offsets = [0, 48], sizes = [8, 24], strides = [1, 1]} : vector<8x72xf32> to vector<8x24xf32>
    %720 = vector.extract_strided_slice %702 {offsets = [0, 48], sizes = [8, 24], strides = [1, 1]} : vector<8x72xf32> to vector<8x24xf32>
    %721 = arith.addf %720, %34 : vector<8x24xf32>
    %722 = arith.mulf %710, %721 : vector<8x24xf32>
    %723 = arith.addf %719, %722 : vector<8x24xf32>
    %724 = math.tanh %723 : vector<8x24xf32>
    %cst_184 = arith.constant 1.000000e+00 : f32
    %725 = vector.broadcast %cst_184 : f32 to vector<8x24xf32>
    %726 = arith.subf %725, %718 : vector<8x24xf32>
    %727 = arith.mulf %726, %724 : vector<8x24xf32>
    %728 = arith.mulf %718, %698 : vector<8x24xf32>
    %729 = arith.addf %727, %728 : vector<8x24xf32>
    %c40 = arith.constant 40 : index
    %c0_185 = arith.constant 0 : index
    %730 = vector.load %arg21[%c40, %c0_185] : memref<64x24xf32, #tpu.memory_space<vmem>>, vector<8x24xf32>
    tpu.vector_store %arg21[%c40, %c0_185], %729 {strides = array<i32>} : memref<64x24xf32, #tpu.memory_space<vmem>>, vector<8x24xf32>,
    %cst_186 = arith.constant dense<0.000000e+00> : vector<8x48xf32>
    %731 = tpu.matmul %675, %4, %cst_186 {dimension_numbers = #tpu.dot_dimension_numbers<[1], [0], [0], [1], [0, 0, 1, 1], [], []>} : vector<8x24xf32>, vector<24x48xf32>, vector<8x48xf32> -> vector<8x48xf32>
    %732 = vector.extract_strided_slice %731 {offsets = [0, 0], sizes = [8, 24], strides = [1, 1]} : vector<8x48xf32> to vector<8x24xf32>
    %733 = arith.negf %732 : vector<8x24xf32>
    %734 = math.exp %733 : vector<8x24xf32>
    %cst_187 = arith.constant 1.000000e+00 : f32
    %735 = vector.broadcast %cst_187 : f32 to vector<8x24xf32>
    %736 = arith.addf %735, %734 : vector<8x24xf32>
    %737 = arith.divf %735, %736 : vector<8x24xf32>
    %738 = vector.extract_strided_slice %731 {offsets = [0, 24], sizes = [8, 24], strides = [1, 1]} : vector<8x48xf32> to vector<8x24xf32>
    %739 = arith.negf %738 : vector<8x24xf32>
    %740 = math.exp %739 : vector<8x24xf32>
    %cst_188 = arith.constant 1.000000e+00 : f32
    %741 = vector.broadcast %cst_188 : f32 to vector<8x24xf32>
    %742 = arith.addf %741, %740 : vector<8x24xf32>
    %743 = arith.divf %741, %742 : vector<8x24xf32>
    %744 = arith.mulf %737, %675 : vector<8x24xf32>
    %cst_189 = arith.constant dense<0.000000e+00> : vector<8x24xf32>
    %745 = tpu.matmul %744, %5, %cst_189 {dimension_numbers = #tpu.dot_dimension_numbers<[1], [0], [0], [1], [0, 0, 1, 1], [], []>} : vector<8x24xf32>, vector<24x24xf32>, vector<8x24xf32> -> vector<8x24xf32>
    %746 = math.tanh %745 : vector<8x24xf32>
    %cst_190 = arith.constant 1.000000e+00 : f32
    %747 = vector.broadcast %cst_190 : f32 to vector<8x24xf32>
    %748 = arith.subf %747, %743 : vector<8x24xf32>
    %749 = arith.subf %746, %675 : vector<8x24xf32>
    %750 = arith.mulf %748, %749 : vector<8x24xf32>
    %cst_191 = arith.constant 1.000000e+00 : f32
    %751 = vector.broadcast %cst_191 : f32 to vector<8x24xf32>
    %752 = arith.mulf %751, %750 : vector<8x24xf32>
    %753 = arith.addf %675, %752 : vector<8x24xf32>
    %754 = vector.extract_strided_slice %30 {offsets = [56, 0], sizes = [8, 72], strides = [1, 1]} : vector<64x72xf32> to vector<8x72xf32>
    %cst_192 = arith.constant dense<0.000000e+00> : vector<8x72xf32>
    %755 = tpu.matmul %753, %8, %cst_192 {dimension_numbers = #tpu.dot_dimension_numbers<[1], [0], [0], [1], [0, 0, 1, 1], [], []>} : vector<8x24xf32>, vector<24x72xf32>, vector<8x72xf32> -> vector<8x72xf32>
    %756 = vector.extract_strided_slice %754 {offsets = [0, 0], sizes = [8, 24], strides = [1, 1]} : vector<8x72xf32> to vector<8x24xf32>
    %757 = vector.extract_strided_slice %755 {offsets = [0, 0], sizes = [8, 24], strides = [1, 1]} : vector<8x72xf32> to vector<8x24xf32>
    %758 = arith.addf %756, %757 : vector<8x24xf32>
    %759 = arith.negf %758 : vector<8x24xf32>
    %760 = math.exp %759 : vector<8x24xf32>
    %cst_193 = arith.constant 1.000000e+00 : f32
    %761 = vector.broadcast %cst_193 : f32 to vector<8x24xf32>
    %762 = arith.addf %761, %760 : vector<8x24xf32>
    %763 = arith.divf %761, %762 : vector<8x24xf32>
    %764 = vector.extract_strided_slice %754 {offsets = [0, 24], sizes = [8, 24], strides = [1, 1]} : vector<8x72xf32> to vector<8x24xf32>
    %765 = vector.extract_strided_slice %755 {offsets = [0, 24], sizes = [8, 24], strides = [1, 1]} : vector<8x72xf32> to vector<8x24xf32>
    %766 = arith.addf %764, %765 : vector<8x24xf32>
    %767 = arith.negf %766 : vector<8x24xf32>
    %768 = math.exp %767 : vector<8x24xf32>
    %cst_194 = arith.constant 1.000000e+00 : f32
    %769 = vector.broadcast %cst_194 : f32 to vector<8x24xf32>
    %770 = arith.addf %769, %768 : vector<8x24xf32>
    %771 = arith.divf %769, %770 : vector<8x24xf32>
    %772 = vector.extract_strided_slice %754 {offsets = [0, 48], sizes = [8, 24], strides = [1, 1]} : vector<8x72xf32> to vector<8x24xf32>
    %773 = vector.extract_strided_slice %755 {offsets = [0, 48], sizes = [8, 24], strides = [1, 1]} : vector<8x72xf32> to vector<8x24xf32>
    %774 = arith.addf %773, %32 : vector<8x24xf32>
    %775 = arith.mulf %763, %774 : vector<8x24xf32>
    %776 = arith.addf %772, %775 : vector<8x24xf32>
    %777 = math.tanh %776 : vector<8x24xf32>
    %cst_195 = arith.constant 1.000000e+00 : f32
    %778 = vector.broadcast %cst_195 : f32 to vector<8x24xf32>
    %779 = arith.subf %778, %771 : vector<8x24xf32>
    %780 = arith.mulf %779, %777 : vector<8x24xf32>
    %781 = arith.mulf %771, %753 : vector<8x24xf32>
    %782 = arith.addf %780, %781 : vector<8x24xf32>
    %cst_196 = arith.constant dense<0.000000e+00> : vector<8x48xf32>
    %783 = tpu.matmul %729, %10, %cst_196 {dimension_numbers = #tpu.dot_dimension_numbers<[1], [0], [0], [1], [0, 0, 1, 1], [], []>} : vector<8x24xf32>, vector<24x48xf32>, vector<8x48xf32> -> vector<8x48xf32>
    %784 = vector.extract_strided_slice %783 {offsets = [0, 0], sizes = [8, 24], strides = [1, 1]} : vector<8x48xf32> to vector<8x24xf32>
    %785 = arith.negf %784 : vector<8x24xf32>
    %786 = math.exp %785 : vector<8x24xf32>
    %cst_197 = arith.constant 1.000000e+00 : f32
    %787 = vector.broadcast %cst_197 : f32 to vector<8x24xf32>
    %788 = arith.addf %787, %786 : vector<8x24xf32>
    %789 = arith.divf %787, %788 : vector<8x24xf32>
    %790 = vector.extract_strided_slice %783 {offsets = [0, 24], sizes = [8, 24], strides = [1, 1]} : vector<8x48xf32> to vector<8x24xf32>
    %791 = arith.negf %790 : vector<8x24xf32>
    %792 = math.exp %791 : vector<8x24xf32>
    %cst_198 = arith.constant 1.000000e+00 : f32
    %793 = vector.broadcast %cst_198 : f32 to vector<8x24xf32>
    %794 = arith.addf %793, %792 : vector<8x24xf32>
    %795 = arith.divf %793, %794 : vector<8x24xf32>
    %796 = arith.mulf %789, %729 : vector<8x24xf32>
    %cst_199 = arith.constant dense<0.000000e+00> : vector<8x24xf32>
    %797 = tpu.matmul %796, %11, %cst_199 {dimension_numbers = #tpu.dot_dimension_numbers<[1], [0], [0], [1], [0, 0, 1, 1], [], []>} : vector<8x24xf32>, vector<24x24xf32>, vector<8x24xf32> -> vector<8x24xf32>
    %798 = math.tanh %797 : vector<8x24xf32>
    %cst_200 = arith.constant 1.000000e+00 : f32
    %799 = vector.broadcast %cst_200 : f32 to vector<8x24xf32>
    %800 = arith.subf %799, %795 : vector<8x24xf32>
    %801 = arith.subf %798, %729 : vector<8x24xf32>
    %802 = arith.mulf %800, %801 : vector<8x24xf32>
    %cst_201 = arith.constant 1.000000e+00 : f32
    %803 = vector.broadcast %cst_201 : f32 to vector<8x24xf32>
    %804 = arith.mulf %803, %802 : vector<8x24xf32>
    %805 = arith.addf %729, %804 : vector<8x24xf32>
    %cst_202 = arith.constant dense<0.000000e+00> : vector<8x72xf32>
    %806 = tpu.matmul %675, %12, %cst_202 {dimension_numbers = #tpu.dot_dimension_numbers<[1], [0], [0], [1], [0, 0, 1, 1], [], []>} : vector<8x24xf32>, vector<24x72xf32>, vector<8x72xf32> -> vector<8x72xf32>
    %807 = vector.broadcast %13 : vector<1x72xf32> to vector<8x72xf32>
    %808 = arith.addf %806, %807 : vector<8x72xf32>
    %cst_203 = arith.constant dense<0.000000e+00> : vector<8x72xf32>
    %809 = tpu.matmul %805, %14, %cst_203 {dimension_numbers = #tpu.dot_dimension_numbers<[1], [0], [0], [1], [0, 0, 1, 1], [], []>} : vector<8x24xf32>, vector<24x72xf32>, vector<8x72xf32> -> vector<8x72xf32>
    %810 = vector.extract_strided_slice %808 {offsets = [0, 0], sizes = [8, 24], strides = [1, 1]} : vector<8x72xf32> to vector<8x24xf32>
    %811 = vector.extract_strided_slice %809 {offsets = [0, 0], sizes = [8, 24], strides = [1, 1]} : vector<8x72xf32> to vector<8x24xf32>
    %812 = arith.addf %810, %811 : vector<8x24xf32>
    %813 = arith.negf %812 : vector<8x24xf32>
    %814 = math.exp %813 : vector<8x24xf32>
    %cst_204 = arith.constant 1.000000e+00 : f32
    %815 = vector.broadcast %cst_204 : f32 to vector<8x24xf32>
    %816 = arith.addf %815, %814 : vector<8x24xf32>
    %817 = arith.divf %815, %816 : vector<8x24xf32>
    %818 = vector.extract_strided_slice %808 {offsets = [0, 24], sizes = [8, 24], strides = [1, 1]} : vector<8x72xf32> to vector<8x24xf32>
    %819 = vector.extract_strided_slice %809 {offsets = [0, 24], sizes = [8, 24], strides = [1, 1]} : vector<8x72xf32> to vector<8x24xf32>
    %820 = arith.addf %818, %819 : vector<8x24xf32>
    %821 = arith.negf %820 : vector<8x24xf32>
    %822 = math.exp %821 : vector<8x24xf32>
    %cst_205 = arith.constant 1.000000e+00 : f32
    %823 = vector.broadcast %cst_205 : f32 to vector<8x24xf32>
    %824 = arith.addf %823, %822 : vector<8x24xf32>
    %825 = arith.divf %823, %824 : vector<8x24xf32>
    %826 = vector.extract_strided_slice %808 {offsets = [0, 48], sizes = [8, 24], strides = [1, 1]} : vector<8x72xf32> to vector<8x24xf32>
    %827 = vector.extract_strided_slice %809 {offsets = [0, 48], sizes = [8, 24], strides = [1, 1]} : vector<8x72xf32> to vector<8x24xf32>
    %828 = arith.addf %827, %34 : vector<8x24xf32>
    %829 = arith.mulf %817, %828 : vector<8x24xf32>
    %830 = arith.addf %826, %829 : vector<8x24xf32>
    %831 = math.tanh %830 : vector<8x24xf32>
    %cst_206 = arith.constant 1.000000e+00 : f32
    %832 = vector.broadcast %cst_206 : f32 to vector<8x24xf32>
    %833 = arith.subf %832, %825 : vector<8x24xf32>
    %834 = arith.mulf %833, %831 : vector<8x24xf32>
    %835 = arith.mulf %825, %805 : vector<8x24xf32>
    %836 = arith.addf %834, %835 : vector<8x24xf32>
    %c48 = arith.constant 48 : index
    %c0_207 = arith.constant 0 : index
    %837 = vector.load %arg21[%c48, %c0_207] : memref<64x24xf32, #tpu.memory_space<vmem>>, vector<8x24xf32>
    tpu.vector_store %arg21[%c48, %c0_207], %836 {strides = array<i32>} : memref<64x24xf32, #tpu.memory_space<vmem>>, vector<8x24xf32>,
    %cst_208 = arith.constant dense<0.000000e+00> : vector<8x48xf32>
    %838 = tpu.matmul %836, %10, %cst_208 {dimension_numbers = #tpu.dot_dimension_numbers<[1], [0], [0], [1], [0, 0, 1, 1], [], []>} : vector<8x24xf32>, vector<24x48xf32>, vector<8x48xf32> -> vector<8x48xf32>
    %839 = vector.extract_strided_slice %838 {offsets = [0, 0], sizes = [8, 24], strides = [1, 1]} : vector<8x48xf32> to vector<8x24xf32>
    %840 = arith.negf %839 : vector<8x24xf32>
    %841 = math.exp %840 : vector<8x24xf32>
    %cst_209 = arith.constant 1.000000e+00 : f32
    %842 = vector.broadcast %cst_209 : f32 to vector<8x24xf32>
    %843 = arith.addf %842, %841 : vector<8x24xf32>
    %844 = arith.divf %842, %843 : vector<8x24xf32>
    %845 = vector.extract_strided_slice %838 {offsets = [0, 24], sizes = [8, 24], strides = [1, 1]} : vector<8x48xf32> to vector<8x24xf32>
    %846 = arith.negf %845 : vector<8x24xf32>
    %847 = math.exp %846 : vector<8x24xf32>
    %cst_210 = arith.constant 1.000000e+00 : f32
    %848 = vector.broadcast %cst_210 : f32 to vector<8x24xf32>
    %849 = arith.addf %848, %847 : vector<8x24xf32>
    %850 = arith.divf %848, %849 : vector<8x24xf32>
    %851 = arith.mulf %844, %836 : vector<8x24xf32>
    %cst_211 = arith.constant dense<0.000000e+00> : vector<8x24xf32>
    %852 = tpu.matmul %851, %11, %cst_211 {dimension_numbers = #tpu.dot_dimension_numbers<[1], [0], [0], [1], [0, 0, 1, 1], [], []>} : vector<8x24xf32>, vector<24x24xf32>, vector<8x24xf32> -> vector<8x24xf32>
    %853 = math.tanh %852 : vector<8x24xf32>
    %cst_212 = arith.constant 1.000000e+00 : f32
    %854 = vector.broadcast %cst_212 : f32 to vector<8x24xf32>
    %855 = arith.subf %854, %850 : vector<8x24xf32>
    %856 = arith.subf %853, %836 : vector<8x24xf32>
    %857 = arith.mulf %855, %856 : vector<8x24xf32>
    %cst_213 = arith.constant 1.000000e+00 : f32
    %858 = vector.broadcast %cst_213 : f32 to vector<8x24xf32>
    %859 = arith.mulf %858, %857 : vector<8x24xf32>
    %860 = arith.addf %836, %859 : vector<8x24xf32>
    %cst_214 = arith.constant dense<0.000000e+00> : vector<8x72xf32>
    %861 = tpu.matmul %782, %12, %cst_214 {dimension_numbers = #tpu.dot_dimension_numbers<[1], [0], [0], [1], [0, 0, 1, 1], [], []>} : vector<8x24xf32>, vector<24x72xf32>, vector<8x72xf32> -> vector<8x72xf32>
    %862 = vector.broadcast %13 : vector<1x72xf32> to vector<8x72xf32>
    %863 = arith.addf %861, %862 : vector<8x72xf32>
    %cst_215 = arith.constant dense<0.000000e+00> : vector<8x72xf32>
    %864 = tpu.matmul %860, %14, %cst_215 {dimension_numbers = #tpu.dot_dimension_numbers<[1], [0], [0], [1], [0, 0, 1, 1], [], []>} : vector<8x24xf32>, vector<24x72xf32>, vector<8x72xf32> -> vector<8x72xf32>
    %865 = vector.extract_strided_slice %863 {offsets = [0, 0], sizes = [8, 24], strides = [1, 1]} : vector<8x72xf32> to vector<8x24xf32>
    %866 = vector.extract_strided_slice %864 {offsets = [0, 0], sizes = [8, 24], strides = [1, 1]} : vector<8x72xf32> to vector<8x24xf32>
    %867 = arith.addf %865, %866 : vector<8x24xf32>
    %868 = arith.negf %867 : vector<8x24xf32>
    %869 = math.exp %868 : vector<8x24xf32>
    %cst_216 = arith.constant 1.000000e+00 : f32
    %870 = vector.broadcast %cst_216 : f32 to vector<8x24xf32>
    %871 = arith.addf %870, %869 : vector<8x24xf32>
    %872 = arith.divf %870, %871 : vector<8x24xf32>
    %873 = vector.extract_strided_slice %863 {offsets = [0, 24], sizes = [8, 24], strides = [1, 1]} : vector<8x72xf32> to vector<8x24xf32>
    %874 = vector.extract_strided_slice %864 {offsets = [0, 24], sizes = [8, 24], strides = [1, 1]} : vector<8x72xf32> to vector<8x24xf32>
    %875 = arith.addf %873, %874 : vector<8x24xf32>
    %876 = arith.negf %875 : vector<8x24xf32>
    %877 = math.exp %876 : vector<8x24xf32>
    %cst_217 = arith.constant 1.000000e+00 : f32
    %878 = vector.broadcast %cst_217 : f32 to vector<8x24xf32>
    %879 = arith.addf %878, %877 : vector<8x24xf32>
    %880 = arith.divf %878, %879 : vector<8x24xf32>
    %881 = vector.extract_strided_slice %863 {offsets = [0, 48], sizes = [8, 24], strides = [1, 1]} : vector<8x72xf32> to vector<8x24xf32>
    %882 = vector.extract_strided_slice %864 {offsets = [0, 48], sizes = [8, 24], strides = [1, 1]} : vector<8x72xf32> to vector<8x24xf32>
    %883 = arith.addf %882, %34 : vector<8x24xf32>
    %884 = arith.mulf %872, %883 : vector<8x24xf32>
    %885 = arith.addf %881, %884 : vector<8x24xf32>
    %886 = math.tanh %885 : vector<8x24xf32>
    %cst_218 = arith.constant 1.000000e+00 : f32
    %887 = vector.broadcast %cst_218 : f32 to vector<8x24xf32>
    %888 = arith.subf %887, %880 : vector<8x24xf32>
    %889 = arith.mulf %888, %886 : vector<8x24xf32>
    %890 = arith.mulf %880, %860 : vector<8x24xf32>
    %891 = arith.addf %889, %890 : vector<8x24xf32>
    %c56 = arith.constant 56 : index
    %c0_219 = arith.constant 0 : index
    %892 = vector.load %arg21[%c56, %c0_219] : memref<64x24xf32, #tpu.memory_space<vmem>>, vector<8x24xf32>
    tpu.vector_store %arg21[%c56, %c0_219], %891 {strides = array<i32>} : memref<64x24xf32, #tpu.memory_space<vmem>>, vector<8x24xf32>,
    %c0_220 = arith.constant 0 : index
    %c0_221 = arith.constant 0 : index
    %893 = vector.load %arg21[%c0_220, %c0_221] : memref<64x24xf32, #tpu.memory_space<vmem>>, vector<64x24xf32>
    %cst_222 = arith.constant dense<0.000000e+00> : vector<64x128xf32>
    %894 = tpu.matmul %893, %16, %cst_222 {dimension_numbers = #tpu.dot_dimension_numbers<[1], [0], [0], [1], [0, 0, 1, 1], [], []>} : vector<64x24xf32>, vector<24x128xf32>, vector<64x128xf32> -> vector<64x128xf32>
    %895 = vector.broadcast %17 : vector<1x128xf32> to vector<64x128xf32>
    %896 = arith.addf %894, %895 : vector<64x128xf32>
    %897 = vector.shape_cast %896 : vector<64x128xf32> to vector<8x8x128xf32>
    %c0_223 = arith.constant 0 : index
    %c0_224 = arith.constant 0 : index
    %c0_225 = arith.constant 0 : index
    %898 = vector.load %arg20[%c0_223, %c0_224, %c0_225] : memref<8x8x128xf32, #tpu.memory_space<vmem>>, vector<8x8x128xf32>
    tpu.vector_store %arg20[%c0_223, %c0_224, %c0_225], %897 {strides = array<i32>} : memref<8x8x128xf32, #tpu.memory_space<vmem>>, vector<8x8x128xf32>,
    return
  }
  func.func @transform_0(%arg0: i32) -> (i32, i32, i32) {
    %c0_i32 = arith.constant 0 : i32
    %c0_i32_0 = arith.constant 0 : i32
    %c0_i32_1 = arith.constant 0 : i32
    return %c0_i32, %arg0, %c0_i32_0 : i32, i32, i32
  }
  func.func @transform_1(%arg0: i32) -> (i32, i32) {
    %c0_i32 = arith.constant 0 : i32
    %c0_i32_0 = arith.constant 0 : i32
    %c0_i32_1 = arith.constant 0 : i32
    return %c0_i32, %c0_i32_0 : i32, i32
  }
  func.func @transform_2(%arg0: i32) -> (i32, i32) {
    %c0_i32 = arith.constant 0 : i32
    %c0_i32_0 = arith.constant 0 : i32
    %c0_i32_1 = arith.constant 0 : i32
    return %c0_i32, %c0_i32_0 : i32, i32
  }
  func.func @transform_3(%arg0: i32) -> (i32, i32) {
    %c0_i32 = arith.constant 0 : i32
    %c0_i32_0 = arith.constant 0 : i32
    %c0_i32_1 = arith.constant 0 : i32
    return %c0_i32, %c0_i32_0 : i32, i32
  }
  func.func @transform_4(%arg0: i32) -> (i32, i32) {
    %c0_i32 = arith.constant 0 : i32
    %c0_i32_0 = arith.constant 0 : i32
    %c0_i32_1 = arith.constant 0 : i32
    return %c0_i32, %c0_i32_0 : i32, i32
  }
  func.func @transform_5(%arg0: i32) -> (i32, i32) {
    %c0_i32 = arith.constant 0 : i32
    %c0_i32_0 = arith.constant 0 : i32
    %c0_i32_1 = arith.constant 0 : i32
    return %c0_i32, %c0_i32_0 : i32, i32
  }
  func.func @transform_6(%arg0: i32) -> (i32, i32) {
    %c0_i32 = arith.constant 0 : i32
    %c0_i32_0 = arith.constant 0 : i32
    %c0_i32_1 = arith.constant 0 : i32
    return %c0_i32, %c0_i32_0 : i32, i32
  }
  func.func @transform_7(%arg0: i32) -> (i32, i32) {
    %c0_i32 = arith.constant 0 : i32
    %c0_i32_0 = arith.constant 0 : i32
    %c0_i32_1 = arith.constant 0 : i32
    return %c0_i32, %c0_i32_0 : i32, i32
  }
  func.func @transform_8(%arg0: i32) -> (i32, i32) {
    %c0_i32 = arith.constant 0 : i32
    %c0_i32_0 = arith.constant 0 : i32
    %c0_i32_1 = arith.constant 0 : i32
    return %c0_i32, %c0_i32_0 : i32, i32
  }
  func.func @transform_9(%arg0: i32) -> (i32, i32) {
    %c0_i32 = arith.constant 0 : i32
    %c0_i32_0 = arith.constant 0 : i32
    %c0_i32_1 = arith.constant 0 : i32
    return %c0_i32, %c0_i32_0 : i32, i32
  }
  func.func @transform_10(%arg0: i32) -> (i32, i32) {
    %c0_i32 = arith.constant 0 : i32
    %c0_i32_0 = arith.constant 0 : i32
    %c0_i32_1 = arith.constant 0 : i32
    return %c0_i32, %c0_i32_0 : i32, i32
  }
  func.func @transform_11(%arg0: i32) -> (i32, i32) {
    %c0_i32 = arith.constant 0 : i32
    %c0_i32_0 = arith.constant 0 : i32
    %c0_i32_1 = arith.constant 0 : i32
    return %c0_i32, %c0_i32_0 : i32, i32
  }
  func.func @transform_12(%arg0: i32) -> (i32, i32) {
    %c0_i32 = arith.constant 0 : i32
    %c0_i32_0 = arith.constant 0 : i32
    %c0_i32_1 = arith.constant 0 : i32
    return %c0_i32, %c0_i32_0 : i32, i32
  }
  func.func @transform_13(%arg0: i32) -> (i32, i32) {
    %c0_i32 = arith.constant 0 : i32
    %c0_i32_0 = arith.constant 0 : i32
    %c0_i32_1 = arith.constant 0 : i32
    return %c0_i32, %c0_i32_0 : i32, i32
  }
  func.func @transform_14(%arg0: i32) -> (i32, i32) {
    %c0_i32 = arith.constant 0 : i32
    %c0_i32_0 = arith.constant 0 : i32
    %c0_i32_1 = arith.constant 0 : i32
    return %c0_i32, %c0_i32_0 : i32, i32
  }
  func.func @transform_15(%arg0: i32) -> (i32, i32) {
    %c0_i32 = arith.constant 0 : i32
    %c0_i32_0 = arith.constant 0 : i32
    %c0_i32_1 = arith.constant 0 : i32
    return %c0_i32, %c0_i32_0 : i32, i32
  }
  func.func @transform_16(%arg0: i32) -> (i32, i32) {
    %c0_i32 = arith.constant 0 : i32
    %c0_i32_0 = arith.constant 0 : i32
    %c0_i32_1 = arith.constant 0 : i32
    return %c0_i32, %c0_i32_0 : i32, i32
  }
  func.func @transform_17(%arg0: i32) -> (i32, i32) {
    %c0_i32 = arith.constant 0 : i32
    %c0_i32_0 = arith.constant 0 : i32
    %c0_i32_1 = arith.constant 0 : i32
    return %c0_i32, %c0_i32_0 : i32, i32
  }
  func.func @transform_18(%arg0: i32) -> (i32, i32) {
    %c0_i32 = arith.constant 0 : i32
    %c0_i32_0 = arith.constant 0 : i32
    %c0_i32_1 = arith.constant 0 : i32
    return %c0_i32, %c0_i32_0 : i32, i32
  }
  func.func @transform_19(%arg0: i32) -> (i32, i32, i32) {
    %c0_i32 = arith.constant 0 : i32
    %c0_i32_0 = arith.constant 0 : i32
    %c0_i32_1 = arith.constant 0 : i32
    return %c0_i32, %arg0, %c0_i32_0 : i32, i32, i32
  }
}

</mosaic_0001>

<bundles_post_ra>
// kernel: tpu_custom_call.1
= control target key start
LH: loop header
LB: loop body
LE: loop exit
PB: predicated region body
PF: predicated region fallthrough
CT: control target
= control target key end

     0   :  { %s8399_s0 = inlined_call_operand.vmem [shape: f32[8,8,128], index: 0, kind: input, shape index: {}]   ;;  %s8400_s1 = inlined_call_operand.vmem [shape: f32[128,48], index: 1, kind: input, shape index: {}]   ;;  %s8401_s2 = inlined_call_operand.hbm [shape: f32[1,48], index: 2, kind: input, shape index: {}]   ;;  %s8402_s3 = inlined_call_operand.vmem [shape: f32[48,24], index: 3, kind: input, shape index: {}]   ;;  %s8403_s4 = inlined_call_operand.hbm [shape: f32[1,24], index: 4, kind: input, shape index: {}]   ;;  %s8404_s5 = inlined_call_operand.vmem [shape: f32[24,48], index: 5, kind: input, shape index: {}]   ;;  %s8405_s6 = inlined_call_operand.vmem [shape: f32[24,24], index: 6, kind: input, shape index: {}]   ;;  %s8406_s7 = inlined_call_operand.vmem [shape: f32[24,72], index: 7, kind: input, shape index: {}]   ;;  %s8407_s8 = inlined_call_operand.hbm [shape: f32[1,72], index: 8, kind: input, shape index: {}]   ;;  %s8408_s9 = inlined_call_operand.vmem [shape: f32[24,72], index: 9, kind: input, shape index: {}]   ;;  %s8409_s10 = inlined_call_operand.hbm [shape: f32[1,24], index: 10, kind: input, shape index: {}]   ;;  %s8410_s11 = inlined_call_operand.vmem [shape: f32[24,48], index: 11, kind: input, shape index: {}]   ;;  %s8411_s12 = inlined_call_operand.vmem [shape: f32[24,24], index: 12, kind: input, shape index: {}]   ;;  %s8412_s13 = inlined_call_operand.vmem [shape: f32[24,72], index: 13, kind: input, shape index: {}]   ;;  %s8413_s14 = inlined_call_operand.hbm [shape: f32[1,72], index: 14, kind: input, shape index: {}]   ;;  %s8414_s15 = inlined_call_operand.vmem [shape: f32[24,72], index: 15, kind: input, shape index: {}]   ;;  %s8415_s16 = inlined_call_operand.vmem [shape: f32[1,24], index: 16, kind: input, shape index: {}]   ;;  %s8416_s17 = inlined_call_operand.hbm [shape: f32[24,128], index: 17, kind: input, shape index: {}]   ;;  %s8417_s18 = inlined_call_operand.vmem [shape: f32[1,128], index: 18, kind: input, shape index: {}]   ;;  %s8418_s19 = inlined_call_operand.hbm [shape: f32[8,8,128], index: 19, kind: output, shape index: {}]  }
   0x1   :  { %8423 = sst [smem:[#allocation20_spill]] %s8399_s0 }
   0x2   :  { %8424 = sst [smem:[#allocation21_spill]] %s8400_s1 }
   0x3   :  { %8425 = sst [smem:[#allocation22_spill]] %s8401_s2 }
   0x4   :  { %8426 = sst [smem:[#allocation23_spill]] %s8402_s3 }
   0x5   :  { %24 = vsyncpa [#allocation4], 0 }
   0x6   :  { %25 = vsyncpa [#allocation7], 0 }
   0x7   :  { %26 = vsyncpa [#allocation10], 0 }
   0x8   :  { %27 = vsyncpa [#allocation13], 0 }
   0x9   :  { %28 = vsyncpa [#allocation5], 0  ;;  %s7236_s0 = smov [#allocation6]   ;;  %s7237_s20 = smov [#allocation9]  }
   0xa   :  { %s51_s30 = sshll.u32 %s7236_s0, 4  ;;  %s79_s21 = sshll.u32 %s7237_s20, 4  ;;  %s52_s30 = int_to_ptr.vmem [resolvable:$true] %s51_s30  ;;  %s80_s21 = int_to_ptr.vmem [resolvable:$true] %s79_s21 }
   0xb   :  { %s7072_s2 = scalar_lea.hbm %s8403_s4, 16 }
   0xc   :  { %p7073_p0 = scmp.ne.s32.totalorder %s8403_s4, %s7072_s2  ;;  %p7076_p1 = scmp.lt.u32.totalorder %s7072_s2, %s8403_s4 }
   0xe   :  { %p7078_p2 = pnand %p7076_p1, %p7073_p0 }
  0x10   :  { %7081 = shalt.err (!%p7078_p2)
}
  0x11   :  { %s7082_s26 = scalar_lea.vmem %s52_s30, 16  ;;  %s7086_s27 = scalar_lea.vmem %s52_s30, 32 }
  0x12   :  { %p7083_p3 = scmp.ne.s32.totalorder %s52_s30, %s7082_s26  ;;  %p7087_p4 = scmp.lt.s32.totalorder %s52_s30, %s52_s30 }
  0x13   :  { %p7088_p5 = scmp.lt.s32.totalorder %s7086_s27, %s7082_s26 }
  0x15   :  { %p7089_p6 = por %p7088_p5, %p7087_p4 }
  0x17   :  { %p7090_p7 = pnand %p7089_p6, %p7083_p3 }
  0x19   :  { %7093 = shalt.err (!%p7090_p7)
}
  0x1a   :  { %54 = dma.hbm_to_vmem [thread:$0]  %s8403_s4, 16, %s52_s30, [#allocation7]  }
  0x1b   :  { %s7094_s1 = scalar_lea.hbm %s8409_s10, 16 }
  0x1c   :  { %p7095_p8 = scmp.ne.s32.totalorder %s8409_s10, %s7094_s1  ;;  %p7098_p9 = scmp.lt.u32.totalorder %s7094_s1, %s8409_s10 }
  0x1e   :  { %p7100_p10 = pnand %p7098_p9, %p7095_p8 }
  0x20   :  { %7103 = shalt.err (!%p7100_p10)
}
  0x21   :  { %s7104_s25 = scalar_lea.vmem %s80_s21, 16  ;;  %s7108_s3 = scalar_lea.vmem %s80_s21, 32 }
  0x22   :  { %p7105_p11 = scmp.ne.s32.totalorder %s80_s21, %s7104_s25  ;;  %p7109_p12 = scmp.lt.s32.totalorder %s80_s21, %s80_s21 }
  0x23   :  { %p7110_p13 = scmp.lt.s32.totalorder %s7108_s3, %s7104_s25 }
  0x25   :  { %p7111_p0 = por %p7110_p13, %p7109_p12 }
  0x27   :  { %p7112_p1 = pnand %p7111_p0, %p7105_p11 }
  0x29   :  { %7115 = shalt.err (!%p7112_p1)
}
  0x2a   :  { %82 = dma.hbm_to_vmem [thread:$0]  %s8409_s10, 16, %s80_s21, [#allocation10]  }
  0x2b   :  { %s7238_s26 = smov [#allocation3]   ;;  %s7239_s28 = smov [#allocation8]  }
  0x2c   :  { %s39_s27 = sshll.u32 %s7238_s26, 4  ;;  %s67_s29 = sshll.u32 %s7239_s28, 4  ;;  %s40_s27 = int_to_ptr.vmem [resolvable:$true] %s39_s27  ;;  %s68_s29 = int_to_ptr.vmem [resolvable:$true] %s67_s29 }
  0x2d   :  { %s8427_s1 = sld [smem:[#allocation22_spill]] }
  0x33   :  { %s7116_s22 = scalar_lea.hbm %s8427_s1, 16 }
  0x34   :  { %p7117_p2 = scmp.ne.s32.totalorder %s8427_s1, %s7116_s22  ;;  %p7120_p3 = scmp.lt.u32.totalorder %s7116_s22, %s8427_s1 }
  0x36   :  { %p7122_p4 = pnand %p7120_p3, %p7117_p2 }
  0x38   :  { %7125 = shalt.err (!%p7122_p4)
}
  0x39   :  { %s7126_s10 = scalar_lea.vmem %s40_s27, 16  ;;  %s7130_s21 = scalar_lea.vmem %s40_s27, 32 }
  0x3a   :  { %p7127_p5 = scmp.ne.s32.totalorder %s40_s27, %s7126_s10  ;;  %p7131_p6 = scmp.lt.s32.totalorder %s40_s27, %s40_s27 }
  0x3b   :  { %p7132_p7 = scmp.lt.s32.totalorder %s7130_s21, %s7126_s10 }
  0x3d   :  { %p7133_p8 = por %p7132_p7, %p7131_p6 }
  0x3f   :  { %p7134_p9 = pnand %p7133_p8, %p7127_p5 }
  0x41   :  { %7137 = shalt.err (!%p7134_p9)
}
  0x42   :  { %42 = dma.hbm_to_vmem [thread:$0]  %s8427_s1, 16, %s40_s27, [#allocation4]  }
  0x43   :  { %s7138_s28 = scalar_lea.hbm %s8407_s8, 16 }
  0x44   :  { %p7139_p10 = scmp.ne.s32.totalorder %s8407_s8, %s7138_s28  ;;  %p7142_p11 = scmp.lt.u32.totalorder %s7138_s28, %s8407_s8 }
  0x46   :  { %p7144_p12 = pnand %p7142_p11, %p7139_p10 }
  0x48   :  { %7147 = shalt.err (!%p7144_p12)
}
  0x49   :  { %s7148_s23 = scalar_lea.vmem %s68_s29, 16  ;;  %s7152_s24 = scalar_lea.vmem %s68_s29, 32 }
  0x4a   :  { %p7149_p13 = scmp.ne.s32.totalorder %s68_s29, %s7148_s23  ;;  %p7153_p0 = scmp.lt.s32.totalorder %s68_s29, %s68_s29 }
  0x4b   :  { %p7154_p1 = scmp.lt.s32.totalorder %s7152_s24, %s7148_s23 }
  0x4d   :  { %p7155_p2 = por %p7154_p1, %p7153_p0 }
  0x4f   :  { %p7156_p3 = pnand %p7155_p2, %p7149_p13 }
  0x51   :  { %7159 = shalt.err (!%p7156_p3)
}
  0x52   :  { %70 = dma.hbm_to_vmem [thread:$0]  %s8407_s8, 16, %s68_s29, [#allocation7]  }
  0x53   :  { %s7240_s25 = smov [#allocation11]   ;;  %s7241_s21 = smov [#allocation12]  }
  0x54   :  { %s95_s10 = sshll.u32 %s7240_s25, 4  ;;  %s108_s3 = sshll.u32 %s7241_s21, 4  ;;  %s96_s10 = int_to_ptr.vmem [resolvable:$true] %s95_s10  ;;  %s7400_s3 = int_to_ptr.vmem [resolvable:$true] %s108_s3 }
  0x55   :  { %s7160_s26 = scalar_lea.hbm %s8413_s14, 16 }
  0x56   :  { %p7161_p4 = scmp.ne.s32.totalorder %s8413_s14, %s7160_s26  ;;  %p7164_p5 = scmp.lt.u32.totalorder %s7160_s26, %s8413_s14 }
  0x58   :  { %p7166_p6 = pnand %p7164_p5, %p7161_p4 }
  0x5a   :  { %7169 = shalt.err (!%p7166_p6)
}
  0x5b   :  { %s7170_s8 = scalar_lea.vmem %s96_s10, 16  ;;  %s7174_s29 = scalar_lea.vmem %s96_s10, 32 }
  0x5c   :  { %p7171_p7 = scmp.ne.s32.totalorder %s96_s10, %s7170_s8  ;;  %p7175_p8 = scmp.lt.s32.totalorder %s96_s10, %s96_s10 }
  0x5d   :  { %p7176_p9 = scmp.lt.s32.totalorder %s7174_s29, %s7170_s8 }
  0x5f   :  { %p7177_p10 = por %p7176_p9, %p7175_p8 }
  0x61   :  { %p7178_p11 = pnand %p7177_p10, %p7171_p7 }
  0x63   :  { %7181 = shalt.err (!%p7178_p11)
}
  0x64   :  { %98 = dma.hbm_to_vmem [thread:$0]  %s8413_s14, 16, %s96_s10, [#allocation10]  }
  0x65   :  { %s7182_s1 = scalar_lea.hbm %s8416_s17, 384 }
  0x66   :  { %p7183_p12 = scmp.ne.s32.totalorder %s8416_s17, %s7182_s1  ;;  %p7186_p13 = scmp.lt.u32.totalorder %s7182_s1, %s8416_s17 }
  0x68   :  { %p7188_p0 = pnand %p7186_p13, %p7183_p12 }
  0x6a   :  { %7191 = shalt.err (!%p7188_p0)
}
  0x6b   :  { %s7192_s26 = scalar_lea.vmem %s7400_s3, 384  ;;  %p7197_p2 = scmp.lt.s32.totalorder %s7400_s3, %s7400_s3 }
  0x6c   :  { %p7193_p1 = scmp.ne.s32.totalorder %s7400_s3, %s7192_s26  ;;  %p7198_p3 = scmp.lt.s32.totalorder %s7192_s26, %s7192_s26 }
  0x6e   :  { %p7199_p4 = por %p7198_p3, %p7197_p2 }
  0x70   :  { %p7200_p5 = pnand %p7199_p4, %p7193_p1 }
  0x72   :  { %7203 = shalt.err (!%p7200_p5)
}
  0x73   :  { %s7242_s14 = smov 128   ;;  %s7243_s10 = smov 8  }
  0x74   :  { %114 = dma.hbm_to_vmem [thread:$0]  %s8416_s17, 384, %s7400_s3, [#allocation13], %s7242_s14, %s7242_s14, %s7243_s10  }
  0x75   :  { %7226 = dma.done.wait [#allocation4], 16  }
  0x76   :  { %7227 = vsyncadd [#allocation4], 4294967280 }
  0x77   :  { %7228 = dma.done.wait [#allocation7], 32  }
  0x78   :  { %7229 = vsyncadd [#allocation7], 4294967264 }
  0x79   :  { %7230 = dma.done.wait [#allocation10], 32  }
  0x7a   :  { %7231 = vsyncadd [#allocation10], 4294967264 }
  0x7b   :  { %7232 = dma.done.wait [#allocation13], 384  }
  0x7c   :  { %7233 = vsyncadd [#allocation13], 4294966912  ;;  %s8428_s8 = sld [smem:[#allocation21_spill]]  ;;  %s8429_s26 = sld [smem:[#allocation20_spill]]  ;;  %v165_v41 = vld [vmem:[%s8406_s7] sm:$0xff]  ;;  %v166_v42 = vld [vmem:[%s8406_s7 + $0x8] sm:$0xff] }
  0x7d   :  { %s8430_s23 = sld [smem:[#allocation23_spill]]  ;;  %v6674_v43 = vpack.c.bf16 %v166_v42, %v165_v41  ;;  %v5621_v44 = vld [vmem:[#allocation3] ss:$0 sm:$0xff]  ;;  %vm324_vm0 = vcmask 392192   ;;  %vm7245_vm1 = vmmov 0   ;;  %vm460_vm2 = vcmask 195584  }
  0x7e   :  { %s7247_s22 = smov 24   ;;  %s7249_s29 = smov 104  }
  0x7f   :  { %s7250_s2 = smov 80  }
  0x82   :  { %v135_v0 = vld [vmem:[%s8428_s8] sm:$0xff]  ;;  %v136_v1 = vld [vmem:[%s8428_s8 + $0x8] sm:$0xff]  ;;  %v137_v2 = vld [vmem:[%s8428_s8 + $0x10] sm:$0xff] }
  0x83   :  { %v6630_v3 = vpack.c.bf16 %v136_v1, %v135_v0  ;;  %v138_v4 = vld [vmem:[%s8428_s8 + $0x18] sm:$0xff]  ;;  %v139_v6 = vld [vmem:[%s8428_s8 + $0x20] sm:$0xff]  ;;  %v140_v7 = vld [vmem:[%s8428_s8 + $0x28] sm:$0xff] }
  0x84   :  { %v6634_v5 = vpack.c.bf16 %v138_v4, %v137_v2  ;;  %v6638_v8 = vpack.c.bf16 %v140_v7, %v139_v6  ;;  %v191_v9 = vld [vmem:[%s8429_s26] sm:$0xff]  ;;  %v141_v10 = vld [vmem:[%s8428_s8 + $0x30] sm:$0xff]  ;;  %v142_v11 = vld [vmem:[%s8428_s8 + $0x38] sm:$0xff]  ;;  %v7244_v6 = vmov 0.0|0.0   ;;  %v7246_v7 = vmov 0.0  }
  0x85   :  { %6631 = vmatprep.subr.bf16.mxu0 %v6630_v3  ;;  %6054 = vmatprep.mubr.f32.mxu0 %v191_v9  ;;  %v152_v12 = vld [vmem:[%s8430_s23] sm:$0xff]  ;;  %v153_v13 = vld [vmem:[%s8430_s23 + $0x8] sm:$0xff]  ;;  %v154_v14 = vld [vmem:[%s8430_s23 + $0x10] sm:$0xff]  ;;  %v6642_v15 = vpack.c.bf16 %v142_v11, %v141_v10 }
  0x86   :  { %6633 = vmatpush3.bf16.msra.mxu0 %v6630_v3  ;;  %v6662_v16 = vpack.c.bf16 %v153_v13, %v152_v12  ;;  %v155_v17 = vld [vmem:[%s8430_s23 + $0x18] sm:$0xff]  ;;  %v143_v18 = vld [vmem:[%s8428_s8 + $0x40] sm:$0xff]  ;;  %v144_v19 = vld [vmem:[%s8428_s8 + $0x48] sm:$0xff] }
  0x87   :  { %6635 = vmatprep.subr.bf16.mxu0 %v6634_v5  ;;  %v6666_v20 = vpack.c.bf16 %v155_v17, %v154_v14  ;;  %v6646_v21 = vpack.c.bf16 %v144_v19, %v143_v18  ;;  %v145_v22 = vld [vmem:[%s8428_s8 + $0x50] sm:$0xff]  ;;  %v146_v23 = vld [vmem:[%s8428_s8 + $0x58] sm:$0xff]  ;;  %v147_v25 = vld [vmem:[%s8428_s8 + $0x60] sm:$0xff] }
  0x88   :  { %6850 = vmatprep.subr.bf16.mxu1 %v6662_v16  ;;  %v6650_v24 = vpack.c.bf16 %v146_v23, %v145_v22  ;;  %v148_v26 = vld [vmem:[%s8428_s8 + $0x68] sm:$0xff]  ;;  %v149_v28 = vld [vmem:[%s8428_s8 + $0x70] sm:$0xff]  ;;  %v150_v29 = vld [vmem:[%s8428_s8 + $0x78] sm:$0xff]  ;;  %s7248_s8 = smov 48  }
  0x89   :  { %6853 = vmatpush3.bf16.msra.mxu1 %v6662_v16  ;;  %v6654_v27 = vpack.c.bf16 %v148_v26, %v147_v25  ;;  %v6658_v30 = vpack.c.bf16 %v150_v29, %v149_v28  ;;  %v192_v31 = vld [vmem:[%s8429_s26 + $0x8] sm:$0xff]  ;;  %v193_v32 = vld [vmem:[%s8429_s26 + $0x10] sm:$0xff]  ;;  %v194_v33 = vld [vmem:[%s8429_s26 + $0x18] sm:$0xff] }
  0x8a   :  { %6637 = vmatpush3.bf16.msra.mxu0 %v6634_v5  ;;  %6851 = vmatprep.subr.bf16.mxu1 %v6666_v20  ;;  %v195_v34 = vld [vmem:[%s8429_s26 + $0x20] sm:$0xff]  ;;  %v196_v35 = vld [vmem:[%s8429_s26 + $0x28] sm:$0xff]  ;;  %v197_v36 = vld [vmem:[%s8429_s26 + $0x30] sm:$0xff] }
  0x8b   :  { %6639 = vmatprep.subr.bf16.mxu0 %v6638_v8  ;;  %v198_v37 = vld [vmem:[%s8429_s26 + $0x38] sm:$0xff]  ;;  %v156_v38 = vld [vmem:[%s8430_s23 + $0x20] sm:$0xff]  ;;  %v157_v39 = vld [vmem:[%s8430_s23 + $0x28] sm:$0xff] }
  0x8c   :  { %v6670_v40 = vpack.c.bf16 %v157_v39, %v156_v38  ;;  %v167_v5 = vld [vmem:[%s8406_s7 + $0x10] sm:$0xff]  ;;  %v159_v9 = vld [vmem:[%s8404_s5] sm:$0xff]  ;;  %v160_v10 = vld [vmem:[%s8404_s5 + $0x8] sm:$0xff] }
  0x8d   :  { %6854 = vmatpush3.bf16.msra.mxu1 %v6666_v20  ;;  %v7551_v14 = vpack.c.bf16 %v160_v10, %v159_v9  ;;  %v162_v29 = vld [vmem:[%s8405_s6] sm:$0xff] }
  0x8e   :  { %6641 = vmatpush3.bf16.msra.mxu0 %v6638_v8  ;;  %6852 = vmatprep.subr.bf16.mxu1 %v6670_v40  ;;  %v5622_v8 = vld [vmem:[#allocation6] ss:$0 sm:$0xff] }
  0x8f   :  { %6643 = vmatprep.subr.bf16.mxu0 %v6642_v15 }
  0x91   :  { %6855 = vmatpush3.bf16.msra.mxu1 %v6670_v40 }
  0x92   :  { %6645 = vmatpush3.bf16.msra.mxu0 %v6642_v15  ;;  %6675 = vmatprep.subr.bf16.mxu1 %v6674_v43 }
  0x93   :  { %6647 = vmatprep.subr.bf16.mxu0 %v6646_v21 }
  0x96   :  { %6649 = vmatpush3.bf16.msra.mxu0 %v6646_v21 }
  0x97   :  { %6651 = vmatprep.subr.bf16.mxu0 %v6650_v24 }
  0x9a   :  { %6653 = vmatpush3.bf16.msra.mxu0 %v6650_v24 }
  0x9b   :  { %6655 = vmatprep.subr.bf16.mxu0 %v6654_v27 }
  0x9e   :  { %6657 = vmatpush3.bf16.msra.mxu0 %v6654_v27 }
  0x9f   :  { %6659 = vmatprep.subr.bf16.mxu0 %v6658_v30 }
  0xa2   :  { %6661 = vmatpush3.bf16.msra.mxu0 %v6658_v30  ;;  %v163_v30 = vld [vmem:[%s8405_s6 + $0x8] sm:$0xff] }
  0xa3   :  { %6663 = vmatprep.subr.bf16.mxu0 %v6662_v16 }
  0xa5   :  { %6055 = vmatmul.mubr.f32.vlgmr.msra.gmra.mrb[0].mxu0 %v192_v31  ;;  %v7581_v31 = vpack.c.bf16 %v163_v30, %v162_v29 }
  0xa6   :  { %6057 = vmatprep.mubr.f32.mxu0 %v193_v32  ;;  %6665 = vmatpush3.bf16.msra.mxu0 %v6662_v16  ;;  %v7588_v32 = vld [vmem:[%s8405_s6 + $0x10] sm:$0xff] }
  0xa7   :  { %6667 = vmatprep.subr.bf16.mxu0 %v6666_v20 }
  0xa9   :  { %6058 = vmatmul.mubr.f32.gmra.mrb[2].mxu0 %v194_v33  ;;  %v7592_v33 = vld [vmem:[#allocation8] ss:$0 sm:$0xff] }
  0xaa   :  { %6060 = vmatprep.mubr.f32.mxu0 %v195_v34  ;;  %6669 = vmatpush3.bf16.msra.mxu0 %v6666_v20  ;;  %v7560_v20 = vld [vmem:[%s8404_s5 + $0x10] sm:$0xff] }
  0xab   :  { %6671 = vmatprep.subr.bf16.mxu0 %v6670_v40 }
  0xad   :  { %6061 = vmatmul.mubr.f32.gmra.mrb[4].mxu0 %v196_v35 }
  0xae   :  { %6063 = vmatprep.mubr.f32.mxu0 %v197_v36  ;;  %6673 = vmatpush3.bf16.msra.mxu0 %v6670_v40 }
  0xaf   :  { %6681 = vmatprep.subr.bf16.mxu0 %v7244_v6 }
  0xb1   :  { %6064 = vmatmul.mubr.f32.gmra.mrb[6].mxu0 %v198_v37 }
 0x178   :  { %v6056_v45 = vpop.f32.mrb[0].mxu0 }
 0x179   :  { %v277_v46 = vadd.f32 %v6056_v45, %v5621_v44  ;;  %v271_v47 = vpop.f32.mrb[1].mxu0 }
 0x17a   :  { %v272_v48 = vadd.f32 %v5621_v44, %v271_v47 }
 0x17b   :  { %v311_v51 = vmax.f32 %v277_v46, 0.0 }
 0x17c   :  { %v310_v49 = vmax.f32 %v272_v48, 0.0  ;;  %v6059_v50 = vpop.f32.mrb[2].mxu0 }
 0x17d   :  { %v287_v52 = vadd.f32 %v6059_v50, %v5621_v44  ;;  %v281_v53 = vpop.f32.mrb[3].mxu0 }
 0x17e   :  { %v282_v54 = vadd.f32 %v5621_v44, %v281_v53  ;;  %6078 = vmatprep.mubr.msk.f32.mxu0 %vm324_vm0, %v310_v49 }
 0x17f   :  { %6079 = vmatmul.mubr.msk.f32.vlgmr.msra.gmra.mrb[8].mxu0 %vm324_vm0, %v311_v51  ;;  %v313_v57 = vmax.f32 %v287_v52, 0.0 }
 0x180   :  { %v312_v55 = vmax.f32 %v282_v54, 0.0  ;;  %v6062_v56 = vpop.f32.mrb[4].mxu0  ;;  %6683 = vmatpush3.bf16.msra.mxu0 %v7581_v31 }
 0x181   :  { %v297_v58 = vadd.f32 %v6062_v56, %v5621_v44  ;;  %v291_v59 = vpop.f32.mrb[5].mxu0  ;;  %6121 = vmatprep.subr.mxu0 %v7246_v7 }
 0x182   :  { %v292_v60 = vadd.f32 %v5621_v44, %v291_v59  ;;  %6081 = vmatprep.mubr.msk.f32.mxu0 %vm324_vm0, %v312_v55  ;;  %v170_v59 = vld [vmem:[%s8408_s9 + $0x8] sm:$0xff] }
 0x183   :  { %6082 = vmatmul.mubr.msk.f32.gmra.mrb[10].mxu0 %vm324_vm0, %v313_v57  ;;  %v315_v63 = vmax.f32 %v297_v58, 0.0  ;;  %v169_v58 = vld [vmem:[%s8408_s9] sm:$0xff] }
 0x184   :  { %v314_v61 = vmax.f32 %v292_v60, 0.0  ;;  %v6065_v62 = vpop.f32.mrb[6].mxu0  ;;  %6123 = vmatprep.mubr.msk.f32.mxu0 %vm7245_vm1, %v7246_v7  ;;  %6122 = vmatpush3.msra.mxu0 %v7588_v32  ;;  %v7630_v60 = vpack.c.bf16 %v170_v59, %v169_v58 }
 0x185   :  { %v307_v0 = vadd.f32 %v6065_v62, %v5621_v44  ;;  %v301_v1 = vpop.f32.mrb[7].mxu0  ;;  %6687 = vmatprep.subr.bf16.mxu0 %v7244_v6 }
 0x186   :  { %v302_v2 = vadd.f32 %v5621_v44, %v301_v1  ;;  %6084 = vmatprep.mubr.msk.f32.mxu1 %vm324_vm0, %v314_v61  ;;  %v7637_v61 = vld [vmem:[%s8408_s9 + $0x10] sm:$0xff] }
 0x187   :  { %6085 = vmatmul.mubr.msk.f32.vlgmr.msra.gmra.mrb[0].mxu1 %vm324_vm0, %v315_v63  ;;  %v317_v4 = vmax.f32 %v307_v0, 0.0  ;;  %v5640_v63 = vld [vmem:[#allocation9] ss:$0 sm:$0xff] }
 0x188   :  { %v316_v3 = vmax.f32 %v302_v2, 0.0  ;;  %6677 = vmatpush3.bf16.msra.mxu1 %v6674_v43  ;;  %843 = vrot.lane.b32.xlu1 %v5640_v63, %s7248_s8 }
 0x189   :  { %6094 = vmatprep.subr.mxu1 %v167_v5 }
 0x18a   :  { %6087 = vmatprep.mubr.msk.f32.mxu1 %vm324_vm0, %v316_v3 }
 0x18b   :  { %6088 = vmatmul.mubr.msk.f32.gmra.mrb[2].mxu1 %vm324_vm0, %v317_v4 }
 0x18c   :  { %6095 = vmatpush3.msra.mxu1 %v167_v5 }
 0x18d   :  { %6678 = vmatprep.subr.bf16.mxu1 %v7244_v6 }
 0x1fa   :  { %v7651_v4 = vpop.permute.xlu1 %843 }
 0x252   :  { %v6080_v11 = vpop.f32.mrb[8].mxu0 }
 0x253   :  { %v415_v12 = vpop.f32.mrb[9].mxu0  ;;  %v421_v15 = vadd.f32 %v6080_v11, %v5622_v8 }
 0x254   :  { %v416_v13 = vadd.f32 %v5622_v8, %v415_v12 }
 0x256   :  { %v6083_v16 = vpop.f32.mrb[10].mxu0  ;;  %6096 = vmatprep.mubr.msk.f32.mxu1 %vm460_vm2, %v416_v13 }
 0x257   :  { %v425_v17 = vpop.f32.mrb[11].mxu0  ;;  %6097 = vmatmul.mubr.msk.f32.vlgmr.msra.gmra.mrb[4].mxu1 %vm460_vm2, %v421_v15  ;;  %v431_v19 = vadd.f32 %v6083_v16, %v5622_v8 }
 0x258   :  { %v426_v18 = vadd.f32 %v5622_v8, %v425_v17  ;;  %6680 = vmatpush3.bf16.msra.mxu1 %v7551_v14 }
 0x259   :  { %6112 = vmatprep.subr.mxu1 %v7246_v7 }
 0x25a   :  { %v6086_v21 = vpop.f32.mrb[0].mxu1  ;;  %6099 = vmatprep.mubr.msk.f32.mxu1 %vm460_vm2, %v426_v18 }
 0x25b   :  { %v435_v22 = vpop.f32.mrb[1].mxu1  ;;  %6100 = vmatmul.mubr.msk.f32.gmra.mrb[6].mxu1 %vm460_vm2, %v431_v19  ;;  %v441_v24 = vadd.f32 %v6086_v21, %v5622_v8 }
 0x25c   :  { %v436_v23 = vadd.f32 %v5622_v8, %v435_v22  ;;  %6113 = vmatpush3.msra.mxu1 %v7560_v20 }
 0x25d   :  { %6684 = vmatprep.subr.bf16.mxu1 %v7244_v6 }
 0x25e   :  { %v6089_v25 = vpop.f32.mrb[2].mxu1  ;;  %6102 = vmatprep.mubr.msk.f32.mxu1 %vm460_vm2, %v436_v23 }
 0x25f   :  { %v445_v26 = vpop.f32.mrb[3].mxu1  ;;  %6103 = vmatmul.mubr.msk.f32.gmra.mrb[8].mxu1 %vm460_vm2, %v441_v24  ;;  %v451_v28 = vadd.f32 %v6089_v25, %v5622_v8 }
 0x260   :  { %v446_v27 = vadd.f32 %v5622_v8, %v445_v26 }
 0x262   :  { %6105 = vmatprep.mubr.msk.f32.mxu1 %vm460_vm2, %v446_v27 }
 0x263   :  { %6106 = vmatmul.mubr.msk.f32.gmra.mrb[10].mxu1 %vm460_vm2, %v451_v28 }
 0x264   :  { %6114 = vmatprep.mubr.msk.f32.mxu1 %vm7245_vm1, %v7246_v7 }
 0x267   :  { %6115 = vmatmul.mubr.f32.vlgmr.msra.gmra.mrb[12].mxu1 %v7246_v7 }
 0x268   :  { %6132 = vmatprep.mubr.msk.f32.mxu1 %vm7245_vm1, %v7246_v7  ;;  %6686 = vmatpush3.bf16.msra.mxu1 %v7630_v60 }
 0x269   :  { %6130 = vmatprep.subr.mxu1 %v7246_v7 }
 0x26c   :  { %6131 = vmatpush3.msra.mxu1 %v7637_v61 }
 0x26d   :  { %6690 = vmatprep.subr.bf16.mxu1 %v7244_v6 }
 0x32a   :  { %v6098_v34 = vpop.f32.mrb[4].mxu1 }
 0x32b   :  { %v7595_v35 = vadd.f32 %v6098_v34, %v7592_v33  ;;  %v7597_v36 = vpop.f32.mrb[5].mxu1 }
 0x32c   :  { %v552_v10 = vadd.f32 %v7592_v33, %v7597_v36 }
 0x32e   :  { %v6101_v37 = vpop.f32.mrb[6].mxu1 }
 0x32f   :  { %v7600_v38 = vadd.f32 %v6101_v37, %v7592_v33  ;;  %v561_v39 = vpop.f32.mrb[7].mxu1  ;;  %v173_v37 = vld [vmem:[%s8410_s11] sm:$0xff] }
 0x330   :  { %v7603_v40 = vadd.f32 %v7592_v33, %v561_v39  ;;  %v174_v39 = vld [vmem:[%s8410_s11 + $0x8] sm:$0xff] }
 0x332   :  { %v6104_v41 = vpop.f32.mrb[8].mxu1 }
 0x333   :  { %v7606_v42 = vadd.f32 %v6104_v41, %v7592_v33  ;;  %v571_v43 = vpop.f32.mrb[9].mxu1 }
 0x334   :  { %v7609_v44 = vadd.f32 %v7592_v33, %v571_v43  ;;  %v7673_v43 = vpack.c.bf16 %v174_v39, %v173_v37 }
 0x336   :  { %v6107_v45 = vpop.f32.mrb[10].mxu1 }
 0x337   :  { %v7612_v46 = vadd.f32 %v6107_v45, %v7592_v33  ;;  %v581_v47 = vpop.f32.mrb[11].mxu1 }
 0x338   :  { %v7615_v48 = vadd.f32 %v7592_v33, %v581_v47  ;;  %v179_v47 = vld [vmem:[%s8412_s13] sm:$0xff] }
 0x33a   :  { %v669_v49 = vpop.f32.mrb[12].mxu1 }
 0x33b   :  { %v5642_v50 = vmul.f32 -1.442695, %v669_v49  ;;  %v6116_v51 = vpop.f32.mrb[13].mxu1  ;;  %v180_v49 = vld [vmem:[%s8412_s13 + $0x8] sm:$0xff] }
 0x33c   :  { %v7691_v51 = vpack.c.bf16 %v180_v49, %v179_v47 }
 0x33d   :  { %6872 = vpow2.f32 %v5642_v50  ;;  %v7689_v50 = vld [vmem:[%s8410_s11 + $0x10] sm:$0xff] }
 0x347   :  { %v6873_v52 = vpop.eup %6872 }
 0x348   :  { %v676_v53 = vadd.f32 1.0, %v6873_v52  ;;  %v7703_v52 = vld [vmem:[%s8412_s13 + $0x10] sm:$0xff] }
 0x34a   :  { %6874 = vrcp.f32 %v676_v53 }
 0x354   :  { %v6875_v54 = vpop.eup %6874 }
 0x355   :  { %v679_v55 = vmul.f32 0.0, %v6875_v54  ;;  %v754_v0 = vsub.f32 1.0, %v6875_v54 }
 0x357   :  { %6124 = vmatmul.mubr.msk.f32.vlgmr.msra.gmra.mrb[12].mxu0 %vm460_vm2, %v679_v55 }
 0x358   :  { %6689 = vmatpush3.bf16.msra.mxu0 %v7551_v14  ;;  %6141 = vmatprep.mubr.msk.f32.mxu0 %vm7245_vm1, %v7246_v7 }
 0x359   :  { %6139 = vmatprep.subr.mxu0 %v7246_v7 }
 0x35c   :  { %6140 = vmatpush3.msra.mxu0 %v7560_v20 }
 0x35d   :  { %6693 = vmatprep.subr.bf16.mxu0 %v7244_v6 }
 0x42a   :  { %v749_v56 = vpop.f32.mrb[12].mxu0 }
 0x42b   :  { %6876 = vtanh.f32 %v749_v56  ;;  %v6125_v57 = vpop.f32.mrb[13].mxu0 }
 0x435   :  { %v6877_v62 = vpop.eup %6876 }
 0x436   :  { %756 = vrot.lane.b32.xlu0 %v6877_v62, %s7247_s22 }
 0x4a8   :  { %v757_v1 = vpop.permute.xlu0 %756 }
 0x4a9   :  { %v759_v2 = vmul.f32 %v757_v1, %v754_v0 }
 0x4ab   :  { %762 = vrot.lane.b32.xlu0 %v759_v2, %s7249_s29 }
 0x51d   :  { %v763_v3 = vpop.permute.xlu0 %762 }
 0x51e   :  { %6133 = vmatmul.mubr.msk.f32.vlgmr.msra.gmra.mrb[14].mxu1 %vm460_vm2, %v763_v3 }
 0x51f   :  { %6692 = vmatpush3.bf16.msra.mxu1 %v7581_v31  ;;  %6150 = vmatprep.mubr.msk.f32.mxu1 %vm7245_vm1, %v7246_v7 }
 0x520   :  { %6148 = vmatprep.subr.mxu1 %v7246_v7 }
 0x523   :  { %6149 = vmatpush3.msra.mxu1 %v7588_v32 }
 0x524   :  { %6696 = vmatprep.subr.bf16.mxu1 %v7244_v6 }
 0x5f1   :  { %v832_v5 = vpop.f32.mrb[14].mxu1 }
 0x5f2   :  { %v846_v8 = vadd.f32 %v7651_v4, %v832_v5  ;;  %v6134_v9 = vpop.f32.mrb[15].mxu1  ;;  %v836_v11 = vadd.f32 %v832_v5, %v552_v10 }
 0x5f3   :  { %v176_v9 = vld [vmem:[%s8411_s12] sm:$0xff] }
 0x5f4   :  { %848 = vrot.lane.b32.xlu1 %v846_v8, %s7250_s2  ;;  %v5645_v12 = vmul.f32 -1.442695, %v836_v11 }
 0x5f6   :  { %6878 = vpow2.f32 %v5645_v12 }
 0x600   :  { %v6879_v13 = vpop.eup %6878 }
 0x601   :  { %v840_v15 = vadd.f32 1.0, %v6879_v13 }
 0x603   :  { %6880 = vrcp.f32 %v840_v15  ;;  %v7737_v15 = vld [vmem:[%s8411_s12 + $0x10] sm:$0xff] }
 0x60d   :  { %v6881_v16 = vpop.eup %6880 }
 0x60e   :  { %v858_v23 = vsub.f32 1.0, %v6881_v16  ;;  %v864_v25 = vmul.f32 %v6881_v16, %v759_v2 }
 0x666   :  { %v849_v17 = vpop.permute.xlu1 %848 }
 0x667   :  { %v851_v18 = vmul.f32 %v6881_v16, %v849_v17 }
 0x669   :  { %853 = vrot.lane.b32.xlu0 %v851_v18, %s7248_s8 }
 0x6db   :  { %v854_v19 = vpop.permute.xlu0 %853 }
 0x6dc   :  { %v856_v21 = vadd.f32 %v854_v19, %v552_v10  ;;  %v177_v10 = vld [vmem:[%s8411_s12 + $0x8] sm:$0xff] }
 0x6dd   :  { %v7727_v11 = vpack.c.bf16 %v177_v10, %v176_v9 }
 0x6de   :  { %6882 = vtanh.f32 %v856_v21 }
 0x6e8   :  { %v6883_v22 = vpop.eup %6882 }
 0x6e9   :  { %860 = vrot.lane.b32.xlu1 %v6883_v22, %s7249_s29 }
 0x75b   :  { %v861_v24 = vpop.permute.xlu1 %860 }
 0x75c   :  { %v863_v26 = vmul.f32 %v861_v24, %v858_v23 }
 0x75e   :  { %v865_v27 = vadd.f32 %v864_v25, %v863_v26 }
 0x760   :  { %867 = vrot.lane.b32.xlu0 %v865_v27, %s7249_s29 }
 0x7d2   :  { %v868_v28 = vpop.permute.xlu0 %867 }
 0x7d3   :  { %6142 = vmatmul.mubr.msk.f32.vlgmr.msra.gmra.mrb[14].mxu0 %vm460_vm2, %v868_v28 }
 0x7d4   :  { %6695 = vmatpush3.bf16.msra.mxu0 %v7630_v60  ;;  %6159 = vmatprep.mubr.msk.f32.mxu0 %vm7245_vm1, %v7246_v7 }
 0x7d5   :  { %6157 = vmatprep.subr.mxu0 %v7246_v7 }
 0x7d8   :  { %6158 = vmatpush3.msra.mxu0 %v7637_v61 }
 0x7d9   :  { %6699 = vmatprep.subr.bf16.mxu0 %v7244_v6 }
 0x8a6   :  { %v937_v29 = vpop.f32.mrb[14].mxu0 }
 0x8a7   :  { %v5647_v30 = vmul.f32 -1.442695, %v937_v29  ;;  %v6143_v33 = vpop.f32.mrb[15].mxu0  ;;  %v184_v29 = vld [vmem:[%s8414_s15 + $0x8] sm:$0xff] }
 0x8a8   :  { %v7761_v33 = vld [vmem:[%s8414_s15 + $0x10] sm:$0xff] }
 0x8a9   :  { %6884 = vpow2.f32 %v5647_v30 }
 0x8b3   :  { %v6885_v34 = vpop.eup %6884 }
 0x8b4   :  { %v944_v36 = vadd.f32 1.0, %v6885_v34 }
 0x8b6   :  { %6886 = vrcp.f32 %v944_v36 }
 0x8c0   :  { %v6887_v41 = vpop.eup %6886 }
 0x8c1   :  { %v948_v45 = vmul.f32 %v6887_v41, %v868_v28  ;;  %v1023_v63 = vsub.f32 1.0, %v6887_v41 }
 0x8c3   :  { %6151 = vmatmul.mubr.msk.f32.vlgmr.msra.gmra.mrb[16].mxu1 %vm460_vm2, %v948_v45 }
 0x8c4   :  { %6698 = vmatpush3.bf16.msra.mxu1 %v7673_v43  ;;  %6168 = vmatprep.mubr.msk.f32.mxu1 %vm7245_vm1, %v7246_v7 }
 0x8c5   :  { %6166 = vmatprep.subr.mxu1 %v7246_v7 }
 0x8c8   :  { %6167 = vmatpush3.msra.mxu1 %v7689_v50 }
 0x8c9   :  { %6702 = vmatprep.subr.bf16.mxu1 %v7244_v6  ;;  %6169 = vmatmul.mubr.f32.vlgmr.msra.gmra.mrb[18].mxu1 %v7246_v7 }
 0x8ca   :  { %6704 = vmatpush3.bf16.msra.mxu1 %v7691_v51  ;;  %6186 = vmatprep.mubr.msk.f32.mxu1 %vm7245_vm1, %v7246_v7 }
 0x8cb   :  { %6184 = vmatprep.subr.mxu1 %v7246_v7 }
 0x8ce   :  { %6185 = vmatpush3.msra.mxu1 %v7703_v52 }
 0x8cf   :  { %6187 = vmatmul.mubr.msk.f32.vlgmr.msra.gmra.mrb[20].mxu1 %vm460_vm2, %v868_v28  ;;  %6708 = vmatprep.subr.bf16.mxu1 %v7244_v6 }
 0x8d0   :  { %6710 = vmatpush3.bf16.msra.mxu1 %v7551_v14  ;;  %6204 = vmatprep.mubr.msk.f32.mxu1 %vm7245_vm1, %v7246_v7 }
 0x8d1   :  { %6202 = vmatprep.subr.mxu1 %v7246_v7 }
 0x8d4   :  { %6203 = vmatpush3.msra.mxu1 %v7560_v20 }
 0x8d5   :  { %6714 = vmatprep.subr.bf16.mxu1 %v7244_v6 }
 0x996   :  { %v1018_v53 = vpop.f32.mrb[16].mxu1 }
 0x997   :  { %6888 = vtanh.f32 %v1018_v53  ;;  %v6152_v54 = vpop.f32.mrb[17].mxu1 }
 0x99c   :  { %v1199_v55 = vpop.f32.mrb[18].mxu1 }
 0x99d   :  { %v6170_v56 = vpop.f32.mrb[19].mxu1  ;;  %v5651_v3 = vmul.f32 -1.442695, %v1199_v55  ;;  %v5641_v55 = vld [vmem:[%s8415_s16] ss:$0 sm:$0xff] }
 0x99f   :  { %6890 = vpow2.f32 %v5651_v3 }
 0x9a1   :  { %v6889_v57 = vpop.eup %6888 }
 0x9a2   :  { %v7714_v58 = vpop.f32.mrb[20].mxu1  ;;  %v1024_v59 = vsub.f32 %v6889_v57, %v868_v28  ;;  %v183_v28 = vld [vmem:[%s8414_s15] sm:$0xff] }
 0x9a3   :  { %v6188_v62 = vpop.f32.mrb[21].mxu1  ;;  %v7754_v30 = vpack.c.bf16 %v184_v29, %v183_v28 }
 0x9a4   :  { %1026 = vrot.lane.b32.xlu1 %v1024_v59, %s7247_s22 }
 0x9a9   :  { %v6891_v5 = vpop.eup %6890 }
 0x9aa   :  { %v1206_v8 = vadd.f32 1.0, %v6891_v5 }
 0x9ac   :  { %6892 = vrcp.f32 %v1206_v8 }
 0x9b6   :  { %v6893_v12 = vpop.eup %6892 }
 0x9b7   :  { %v1209_v16 = vmul.f32 0.0, %v6893_v12  ;;  %v1284_v39 = vsub.f32 1.0, %v6893_v12 }
 0xa16   :  { %v1027_v0 = vpop.permute.xlu1 %1026 }
 0xa17   :  { %v1029_v1 = vmul.f32 %v1027_v0, %v1023_v63 }
 0xa19   :  { %v7717_v2 = vadd.f32 %v1029_v1, %v865_v27 }
 0xa1b   :  { %1032 = vrot.lane.b32.xlu0 %v7717_v2, %s7249_s29 }
 0xa8d   :  { %v1033_v13 = vpop.permute.xlu0 %1032 }
 0xa8e   :  { %6160 = vmatmul.mubr.msk.f32.vlgmr.msra.gmra.mrb[16].mxu0 %vm460_vm2, %v1033_v13 }
 0xa8f   :  { %6701 = vmatpush3.bf16.msra.mxu0 %v7727_v11  ;;  %6177 = vmatprep.mubr.msk.f32.mxu0 %vm7245_vm1, %v7246_v7 }
 0xa90   :  { %6175 = vmatprep.subr.mxu0 %v7246_v7 }
 0xa93   :  { %6176 = vmatpush3.msra.mxu0 %v7737_v15 }
 0xa94   :  { %6178 = vmatmul.mubr.msk.f32.vlgmr.msra.gmra.mrb[18].mxu0 %vm460_vm2, %v1209_v16  ;;  %6705 = vmatprep.subr.bf16.mxu0 %v7244_v6 }
 0xa95   :  { %6195 = vmatprep.mubr.msk.f32.mxu0 %vm7245_vm1, %v7246_v7  ;;  %6707 = vmatpush3.bf16.msra.mxu0 %v7754_v30 }
 0xa96   :  { %6193 = vmatprep.subr.mxu0 %v7246_v7 }
 0xa99   :  { %6194 = vmatpush3.msra.mxu0 %v7761_v33 }
 0xa9a   :  { %6711 = vmatprep.subr.bf16.mxu0 %v7244_v6 }
 0xb61   :  { %v1102_v17 = vpop.f32.mrb[16].mxu0 }
 0xb62   :  { %v1113_v18 = vadd.f32 %v1102_v17, %v7651_v4  ;;  %v6161_v19 = vpop.f32.mrb[17].mxu0  ;;  %v1106_v24 = vadd.f32 %v1102_v17, %v7595_v35 }
 0xb64   :  { %1115 = vrot.lane.b32.xlu1 %v1113_v18, %s7250_s2  ;;  %v5650_v25 = vmul.f32 -1.442695, %v1106_v24 }
 0xb67   :  { %v1279_v21 = vpop.f32.mrb[18].mxu0 }
 0xb68   :  { %6894 = vtanh.f32 %v1279_v21  ;;  %v6179_v22 = vpop.f32.mrb[19].mxu0 }
 0xb69   :  { %6896 = vpow2.f32 %v5650_v25 }
 0xb72   :  { %v6895_v23 = vpop.eup %6894 }
 0xb73   :  { %1286 = vrot.lane.b32.xlu0 %v6895_v23, %s7247_s22  ;;  %v6897_v26 = vpop.eup %6896 }
 0xb74   :  { %v1110_v27 = vadd.f32 1.0, %v6897_v26 }
 0xb76   :  { %6898 = vrcp.f32 %v1110_v27 }
 0xb80   :  { %v6899_v34 = vpop.eup %6898 }
 0xb81   :  { %v1131_v57 = vmul.f32 %v6899_v34, %v7717_v2  ;;  %v7799_v2 = vld [vmem:[#allocation11] ss:$0 sm:$0xff] }
 0xb82   :  { %v1364_v8 = vadd.f32 %v7799_v2, %v7714_v58 }
 0xbd6   :  { %v1116_v36 = vpop.permute.xlu1 %1115 }
 0xbd7   :  { %v1118_v37 = vmul.f32 %v6899_v34, %v1116_v36 }
 0xbd9   :  { %1120 = vrot.lane.b32.xlu1 %v1118_v37, %s7248_s8 }
 0xbe5   :  { %v1287_v41 = vpop.permute.xlu0 %1286 }
 0xbe6   :  { %v7766_v45 = vmul.f32 %v1287_v41, %v1284_v39 }
 0xbe8   :  { %1368 = vrot.lane.b32.xlu0 %v7766_v45, %s7249_s29 }
 0xc4b   :  { %v1121_v47 = vpop.permute.xlu1 %1120 }
 0xc4c   :  { %v1123_v49 = vadd.f32 %v1121_v47, %v7595_v35  ;;  %v1125_v35 = vsub.f32 1.0, %v6899_v34 }
 0xc4e   :  { %6900 = vtanh.f32 %v1123_v49 }
 0xc58   :  { %v6901_v53 = vpop.eup %6900 }
 0xc59   :  { %1127 = vrot.lane.b32.xlu1 %v6901_v53, %s7249_s29 }
 0xc5a   :  { %v1369_v54 = vpop.permute.xlu0 %1368 }
 0xc5b   :  { %6196 = vmatmul.mubr.msk.f32.vlgmr.msra.gmra.mrb[20].mxu0 %vm460_vm2, %v1369_v54 }
 0xc5c   :  { %6713 = vmatpush3.bf16.msra.mxu0 %v7581_v31  ;;  %6213 = vmatprep.mubr.msk.f32.mxu0 %vm7245_vm1, %v7246_v7 }
 0xc5d   :  { %1449 = vrot.lane.b32.xlu1 %v5641_v55, %s7248_s8  ;;  %6211 = vmatprep.subr.mxu0 %v7246_v7 }
 0xc60   :  { %6212 = vmatpush3.msra.mxu0 %v7588_v32 }
 0xc61   :  { %6717 = vmatprep.subr.bf16.mxu0 %v7244_v6 }
 0xccb   :  { %v1128_v56 = vpop.permute.xlu1 %1127 }
 0xccc   :  { %v1130_v59 = vmul.f32 %v1128_v56, %v1125_v35 }
 0xcce   :  { %v7784_v62 = vadd.f32 %v1131_v57, %v1130_v59 }
 0xccf   :  { %v7788_v63 = vpop.permute.xlu1 %1449 }
 0xcd0   :  { %1478 = vrot.lane.b32.xlu0 %v7784_v62, %s7249_s29 }
 0xd2e   :  { %v1438_v0 = vpop.f32.mrb[20].mxu0 }
 0xd2f   :  { %v1452_v1 = vadd.f32 %v7788_v63, %v1438_v0  ;;  %v6197_v3 = vpop.f32.mrb[21].mxu0  ;;  %v1442_v9 = vadd.f32 %v1438_v0, %v1364_v8 }
 0xd31   :  { %1454 = vrot.lane.b32.xlu0 %v1452_v1, %s7250_s2  ;;  %v5656_v10 = vmul.f32 -1.442695, %v1442_v9 }
 0xd33   :  { %6902 = vpow2.f32 %v5656_v10 }
 0xd3d   :  { %v6903_v12 = vpop.eup %6902 }
 0xd3e   :  { %v1446_v13 = vadd.f32 1.0, %v6903_v12 }
 0xd40   :  { %6904 = vrcp.f32 %v1446_v13 }
 0xd42   :  { %v1479_v5 = vpop.permute.xlu0 %1478 }
 0xd43   :  { %6205 = vmatmul.mubr.msk.f32.vlgmr.msra.gmra.mrb[22].mxu1 %vm460_vm2, %v1479_v5 }
 0xd44   :  { %6716 = vmatpush3.bf16.msra.mxu1 %v7630_v60  ;;  %6222 = vmatprep.mubr.msk.f32.mxu1 %vm7245_vm1, %v7246_v7 }
 0xd45   :  { %6220 = vmatprep.subr.mxu1 %v7246_v7 }
 0xd48   :  { %6221 = vmatpush3.msra.mxu1 %v7637_v61 }
 0xd49   :  { %6720 = vmatprep.subr.bf16.mxu1 %v7244_v6 }
 0xd4a   :  { %v6905_v16 = vpop.eup %6904 }
 0xd4b   :  { %v1464_v29 = vsub.f32 1.0, %v6905_v16  ;;  %v1470_v36 = vmul.f32 %v6905_v16, %v7766_v45 }
 0xda3   :  { %v1455_v17 = vpop.permute.xlu0 %1454 }
 0xda4   :  { %v1457_v18 = vmul.f32 %v6905_v16, %v1455_v17 }
 0xda6   :  { %1459 = vrot.lane.b32.xlu1 %v1457_v18, %s7248_s8 }
 0xe16   :  { %v1548_v19 = vpop.f32.mrb[22].mxu1 }
 0xe17   :  { %v5658_v21 = vmul.f32 -1.442695, %v1548_v19  ;;  %v6206_v22 = vpop.f32.mrb[23].mxu1 }
 0xe18   :  { %v1460_v23 = vpop.permute.xlu1 %1459 }
 0xe19   :  { %6906 = vpow2.f32 %v5658_v21  ;;  %v1462_v24 = vadd.f32 %v1460_v23, %v1364_v8 }
 0xe1b   :  { %6908 = vtanh.f32 %v1462_v24 }
 0xe23   :  { %v6907_v25 = vpop.eup %6906 }
 0xe24   :  { %v1555_v58 = vadd.f32 1.0, %v6907_v25 }
 0xe25   :  { %v6909_v26 = vpop.eup %6908 }
 0xe26   :  { %6910 = vrcp.f32 %v1555_v58  ;;  %1466 = vrot.lane.b32.xlu0 %v6909_v26, %s7249_s29 }
 0xe30   :  { %v6911_v27 = vpop.eup %6910 }
 0xe31   :  { %v1559_v28 = vmul.f32 %v6911_v27, %v1479_v5  ;;  %v1634_v54 = vsub.f32 1.0, %v6911_v27 }
 0xe33   :  { %6214 = vmatmul.mubr.msk.f32.vlgmr.msra.gmra.mrb[22].mxu0 %vm460_vm2, %v1559_v28 }
 0xe34   :  { %6719 = vmatpush3.bf16.msra.mxu0 %v7673_v43  ;;  %6231 = vmatprep.mubr.msk.f32.mxu0 %vm7245_vm1, %v7246_v7 }
 0xe35   :  { %6229 = vmatprep.subr.mxu0 %v7246_v7 }
 0xe38   :  { %6230 = vmatpush3.msra.mxu0 %v7689_v50 }
 0xe39   :  { %6723 = vmatprep.subr.bf16.mxu0 %v7244_v6 }
 0xe98   :  { %v1467_v34 = vpop.permute.xlu0 %1466 }
 0xe99   :  { %v1469_v37 = vmul.f32 %v1467_v34, %v1464_v29 }
 0xe9b   :  { %v7813_v39 = vadd.f32 %v1470_v36, %v1469_v37 }
 0xe9d   :  { %1473 = vrot.lane.b32.xlu1 %v7813_v39, %s7249_s29 }
 0xf06   :  { %v1629_v41 = vpop.f32.mrb[22].mxu0 }
 0xf07   :  { %6912 = vtanh.f32 %v1629_v41  ;;  %v6215_v47 = vpop.f32.mrb[23].mxu0 }
 0xf0f   :  { %v1474_v49 = vpop.permute.xlu1 %1473 }
 0xf10   :  { %1476 = vst.msk [vmem:[#allocation2] sm:$0xff] %vm460_vm2, %v1474_v49  ;;  %6232 = vmatmul.mubr.msk.f32.vlgmr.msra.gmra.mrb[24].mxu0 %vm460_vm2, %v1474_v49 }
 0xf11   :  { %v6913_v53 = vpop.eup %6912  ;;  %6725 = vmatpush3.bf16.msra.mxu0 %v7691_v51  ;;  %6249 = vmatprep.mubr.msk.f32.mxu0 %vm7245_vm1, %v7246_v7 }
 0xf12   :  { %6247 = vmatprep.subr.mxu0 %v7246_v7  ;;  %v1635_v45 = vsub.f32 %v6913_v53, %v1479_v5 }
 0xf14   :  { %1637 = vrot.lane.b32.xlu0 %v1635_v45, %s7247_s22 }
 0xf15   :  { %6248 = vmatpush3.msra.mxu0 %v7703_v52 }
 0xf16   :  { %6250 = vmatmul.mubr.msk.f32.vlgmr.msra.gmra.mrb[26].mxu0 %vm460_vm2, %v1479_v5  ;;  %6729 = vmatprep.subr.bf16.mxu0 %v7244_v6 }
 0xf17   :  { %6731 = vmatpush3.bf16.msra.mxu0 %v7551_v14  ;;  %6267 = vmatprep.mubr.msk.f32.mxu0 %vm7245_vm1, %v7246_v7 }
 0xf18   :  { %6265 = vmatprep.subr.mxu0 %v7246_v7 }
 0xf1b   :  { %6266 = vmatpush3.msra.mxu0 %v7560_v20 }
 0xf1c   :  { %6735 = vmatprep.subr.bf16.mxu0 %v7244_v6 }
 0xf86   :  { %v1638_v55 = vpop.permute.xlu0 %1637 }
 0xf87   :  { %v1640_v35 = vmul.f32 %v1638_v55, %v1634_v54 }
 0xf89   :  { %v7834_v56 = vadd.f32 %v1640_v35, %v7784_v62 }
 0xf8b   :  { %1643 = vrot.lane.b32.xlu1 %v7834_v56, %s7249_s29 }
 0xfe3   :  { %v1812_v57 = vpop.f32.mrb[24].mxu0 }
 0xfe4   :  { %v5663_v59 = vmul.f32 -1.442695, %v1812_v57  ;;  %v6233_v0 = vpop.f32.mrb[25].mxu0 }
 0xfe6   :  { %6914 = vpow2.f32 %v5663_v59 }
 0xfe9   :  { %v7838_v1 = vpop.f32.mrb[26].mxu0 }
 0xfea   :  { %v6251_v3 = vpop.f32.mrb[27].mxu0 }
 0xff0   :  { %v6915_v5 = vpop.eup %6914 }
 0xff1   :  { %v1819_v8 = vadd.f32 1.0, %v6915_v5 }
 0xff3   :  { %6916 = vrcp.f32 %v1819_v8 }
 0xffd   :  { %v1644_v9 = vpop.permute.xlu1 %1643  ;;  %v6917_v10 = vpop.eup %6916 }
 0xffe   :  { %6223 = vmatmul.mubr.msk.f32.vlgmr.msra.gmra.mrb[24].mxu1 %vm460_vm2, %v1644_v9  ;;  %v1822_v62 = vmul.f32 %v6917_v10, %v1474_v49  ;;  %v1897_v28 = vsub.f32 1.0, %v6917_v10 }
 0xfff   :  { %6722 = vmatpush3.bf16.msra.mxu1 %v7727_v11  ;;  %6240 = vmatprep.mubr.msk.f32.mxu1 %vm7245_vm1, %v7246_v7 }
0x1000   :  { %6238 = vmatprep.subr.mxu1 %v7246_v7 }
0x1003   :  { %6239 = vmatpush3.msra.mxu1 %v7737_v15 }
0x1004   :  { %6241 = vmatmul.mubr.msk.f32.vlgmr.msra.gmra.mrb[26].mxu1 %vm460_vm2, %v1822_v62  ;;  %6726 = vmatprep.subr.bf16.mxu1 %v7244_v6 }
0x1005   :  { %6728 = vmatpush3.bf16.msra.mxu1 %v7754_v30  ;;  %6258 = vmatprep.mubr.msk.f32.mxu1 %vm7245_vm1, %v7246_v7 }
0x1006   :  { %6256 = vmatprep.subr.mxu1 %v7246_v7 }
0x1009   :  { %6257 = vmatpush3.msra.mxu1 %v7761_v33 }
0x100a   :  { %6732 = vmatprep.subr.bf16.mxu1 %v7244_v6 }
0x10d1   :  { %v1713_v12 = vpop.f32.mrb[24].mxu1 }
0x10d2   :  { %v1724_v13 = vadd.f32 %v1713_v12, %v7651_v4  ;;  %v6224_v16 = vpop.f32.mrb[25].mxu1  ;;  %v1717_v22 = vadd.f32 %v1713_v12, %v7603_v40 }
0x10d4   :  { %1726 = vrot.lane.b32.xlu0 %v1724_v13, %s7250_s2  ;;  %v5661_v23 = vmul.f32 -1.442695, %v1717_v22 }
0x10d7   :  { %v1892_v17 = vpop.f32.mrb[26].mxu1 }
0x10d8   :  { %6918 = vtanh.f32 %v1892_v17  ;;  %v6242_v18 = vpop.f32.mrb[27].mxu1 }
0x10d9   :  { %6920 = vpow2.f32 %v5661_v23 }
0x10e2   :  { %v6919_v19 = vpop.eup %6918 }
0x10e3   :  { %v1898_v21 = vsub.f32 %v6919_v19, %v1474_v49  ;;  %v6921_v24 = vpop.eup %6920 }
0x10e4   :  { %v1721_v25 = vadd.f32 1.0, %v6921_v24 }
0x10e5   :  { %1900 = vrot.lane.b32.xlu1 %v1898_v21, %s7247_s22 }
0x10e6   :  { %6922 = vrcp.f32 %v1721_v25 }
0x10f0   :  { %v6923_v58 = vpop.eup %6922 }
0x10f1   :  { %v1742_v53 = vmul.f32 %v6923_v58, %v7834_v56  ;;  %v1972_v56 = vadd.f32 %v7799_v2, %v7838_v1 }
0x1146   :  { %v1727_v26 = vpop.permute.xlu0 %1726 }
0x1147   :  { %v1729_v27 = vmul.f32 %v6923_v58, %v1727_v26 }
0x1149   :  { %1731 = vrot.lane.b32.xlu0 %v1729_v27, %s7248_s8 }
0x1157   :  { %v1901_v29 = vpop.permute.xlu1 %1900 }
0x1158   :  { %v1903_v34 = vmul.f32 %v1901_v29, %v1897_v28 }
0x115a   :  { %v7860_v36 = vadd.f32 %v1903_v34, %v7813_v39  ;;  %v1736_v39 = vsub.f32 1.0, %v6923_v58 }
0x115c   :  { %1976 = vrot.lane.b32.xlu1 %v7860_v36, %s7249_s29 }
0x11bb   :  { %v1732_v37 = vpop.permute.xlu0 %1731 }
0x11bc   :  { %v1734_v41 = vadd.f32 %v1732_v37, %v7603_v40 }
0x11be   :  { %6924 = vtanh.f32 %v1734_v41 }
0x11c8   :  { %v6925_v47 = vpop.eup %6924 }
0x11c9   :  { %1738 = vrot.lane.b32.xlu0 %v6925_v47, %s7249_s29 }
0x11ce   :  { %v1977_v49 = vpop.permute.xlu1 %1976 }
0x11cf   :  { %6259 = vmatmul.mubr.msk.f32.vlgmr.msra.gmra.mrb[28].mxu1 %vm460_vm2, %v1977_v49 }
0x11d0   :  { %6734 = vmatpush3.bf16.msra.mxu1 %v7581_v31  ;;  %6276 = vmatprep.mubr.msk.f32.mxu1 %vm7245_vm1, %v7246_v7 }
0x11d1   :  { %6274 = vmatprep.subr.mxu1 %v7246_v7 }
0x11d4   :  { %6275 = vmatpush3.msra.mxu1 %v7588_v32 }
0x11d5   :  { %6738 = vmatprep.subr.bf16.mxu1 %v7244_v6 }
0x123b   :  { %v1739_v40 = vpop.permute.xlu0 %1738 }
0x123c   :  { %v1741_v45 = vmul.f32 %v1739_v40, %v1736_v39 }
0x123e   :  { %v7874_v54 = vadd.f32 %v1742_v53, %v1741_v45 }
0x1240   :  { %2083 = vrot.lane.b32.xlu1 %v7874_v54, %s7249_s29 }
0x12a2   :  { %v2046_v55 = vpop.f32.mrb[28].mxu1 }
0x12a3   :  { %v2057_v35 = vadd.f32 %v2046_v55, %v7788_v63  ;;  %v6260_v57 = vpop.f32.mrb[29].mxu1  ;;  %v2050_v0 = vadd.f32 %v2046_v55, %v1972_v56 }
0x12a5   :  { %2059 = vrot.lane.b32.xlu0 %v2057_v35, %s7250_s2  ;;  %v5667_v3 = vmul.f32 -1.442695, %v2050_v0 }
0x12a7   :  { %6926 = vpow2.f32 %v5667_v3 }
0x12b1   :  { %v6927_v5 = vpop.eup %6926 }
0x12b2   :  { %v2084_v59 = vpop.permute.xlu1 %2083  ;;  %v2054_v8 = vadd.f32 1.0, %v6927_v5 }
0x12b3   :  { %6268 = vmatmul.mubr.msk.f32.vlgmr.msra.gmra.mrb[28].mxu0 %vm460_vm2, %v2084_v59 }
0x12b4   :  { %6737 = vmatpush3.bf16.msra.mxu0 %v7630_v60  ;;  %6285 = vmatprep.mubr.msk.f32.mxu0 %vm7245_vm1, %v7246_v7  ;;  %6928 = vrcp.f32 %v2054_v8 }
0x12b5   :  { %6283 = vmatprep.subr.mxu0 %v7246_v7 }
0x12b8   :  { %6284 = vmatpush3.msra.mxu0 %v7637_v61 }
0x12b9   :  { %6741 = vmatprep.subr.bf16.mxu0 %v7244_v6 }
0x12be   :  { %v6929_v9 = vpop.eup %6928 }
0x12bf   :  { %v2069_v24 = vsub.f32 1.0, %v6929_v9  ;;  %v2075_v58 = vmul.f32 %v6929_v9, %v7860_v36 }
0x1317   :  { %v2060_v10 = vpop.permute.xlu0 %2059 }
0x1318   :  { %v2062_v62 = vmul.f32 %v6929_v9, %v2060_v10 }
0x131a   :  { %2064 = vrot.lane.b32.xlu1 %v2062_v62, %s7248_s8 }
0x1386   :  { %v2153_v12 = vpop.f32.mrb[28].mxu0 }
0x1387   :  { %v5669_v13 = vmul.f32 -1.442695, %v2153_v12  ;;  %v6269_v16 = vpop.f32.mrb[29].mxu0 }
0x1389   :  { %6930 = vpow2.f32 %v5669_v13 }
0x138c   :  { %v2065_v17 = vpop.permute.xlu1 %2064 }
0x138d   :  { %v2067_v18 = vadd.f32 %v2065_v17, %v1972_v56 }
0x138f   :  { %6932 = vtanh.f32 %v2067_v18 }
0x1393   :  { %v6931_v19 = vpop.eup %6930 }
0x1394   :  { %v2160_v1 = vadd.f32 1.0, %v6931_v19 }
0x1396   :  { %6934 = vrcp.f32 %v2160_v1 }
0x1399   :  { %v6933_v21 = vpop.eup %6932 }
0x139a   :  { %2071 = vrot.lane.b32.xlu0 %v6933_v21, %s7249_s29 }
0x13a0   :  { %v6935_v22 = vpop.eup %6934 }
0x13a1   :  { %v2164_v23 = vmul.f32 %v6935_v22, %v2084_v59  ;;  %v2239_v36 = vsub.f32 1.0, %v6935_v22 }
0x13a3   :  { %6277 = vmatmul.mubr.msk.f32.vlgmr.msra.gmra.mrb[30].mxu1 %vm460_vm2, %v2164_v23 }
0x13a4   :  { %6740 = vmatpush3.bf16.msra.mxu1 %v7673_v43  ;;  %6294 = vmatprep.mubr.msk.f32.mxu1 %vm7245_vm1, %v7246_v7 }
0x13a5   :  { %6292 = vmatprep.subr.mxu1 %v7246_v7 }
0x13a8   :  { %6293 = vmatpush3.msra.mxu1 %v7689_v50 }
0x13a9   :  { %6744 = vmatprep.subr.bf16.mxu1 %v7244_v6 }
0x140c   :  { %v2072_v25 = vpop.permute.xlu0 %2071 }
0x140d   :  { %v2074_v26 = vmul.f32 %v2072_v25, %v2069_v24 }
0x140f   :  { %v7899_v27 = vadd.f32 %v2075_v58, %v2074_v26 }
0x1411   :  { %2078 = vrot.lane.b32.xlu1 %v7899_v27, %s7249_s29 }
0x1476   :  { %v2234_v28 = vpop.f32.mrb[30].mxu1 }
0x1477   :  { %6936 = vtanh.f32 %v2234_v28  ;;  %v6278_v29 = vpop.f32.mrb[31].mxu1 }
0x1481   :  { %v6937_v34 = vpop.eup %6936 }
0x1482   :  { %v2240_v37 = vsub.f32 %v6937_v34, %v2084_v59 }
0x1483   :  { %v2079_v41 = vpop.permute.xlu1 %2078 }
0x1484   :  { %2081 = vst.msk [vmem:[#allocation2 + $0x8] sm:$0xff] %vm460_vm2, %v2079_v41  ;;  %6295 = vmatmul.mubr.msk.f32.vlgmr.msra.gmra.mrb[32].mxu1 %vm460_vm2, %v2079_v41  ;;  %2242 = vrot.lane.b32.xlu0 %v2240_v37, %s7247_s22 }
0x1485   :  { %6746 = vmatpush3.bf16.msra.mxu1 %v7691_v51  ;;  %6312 = vmatprep.mubr.msk.f32.mxu1 %vm7245_vm1, %v7246_v7 }
0x1486   :  { %6310 = vmatprep.subr.mxu1 %v7246_v7 }
0x1489   :  { %6311 = vmatpush3.msra.mxu1 %v7703_v52 }
0x148a   :  { %6313 = vmatmul.mubr.msk.f32.vlgmr.msra.gmra.mrb[34].mxu1 %vm460_vm2, %v2084_v59  ;;  %6750 = vmatprep.subr.bf16.mxu1 %v7244_v6 }
0x148b   :  { %6752 = vmatpush3.bf16.msra.mxu1 %v7551_v14  ;;  %6330 = vmatprep.mubr.msk.f32.mxu1 %vm7245_vm1, %v7246_v7 }
0x148c   :  { %6328 = vmatprep.subr.mxu1 %v7246_v7 }
0x148f   :  { %6329 = vmatpush3.msra.mxu1 %v7560_v20 }
0x1490   :  { %6756 = vmatprep.subr.bf16.mxu1 %v7244_v6 }
0x14f6   :  { %v2243_v47 = vpop.permute.xlu0 %2242 }
0x14f7   :  { %v2245_v49 = vmul.f32 %v2243_v47, %v2239_v36 }
0x14f9   :  { %v7920_v39 = vadd.f32 %v2245_v49, %v7874_v54 }
0x14fb   :  { %2248 = vrot.lane.b32.xlu1 %v7920_v39, %s7249_s29 }
0x1557   :  { %v2417_v40 = vpop.f32.mrb[32].mxu1 }
0x1558   :  { %v5674_v53 = vmul.f32 -1.442695, %v2417_v40  ;;  %v6296_v45 = vpop.f32.mrb[33].mxu1 }
0x155a   :  { %6938 = vpow2.f32 %v5674_v53 }
0x155d   :  { %v7924_v55 = vpop.f32.mrb[34].mxu1 }
0x155e   :  { %v6314_v35 = vpop.f32.mrb[35].mxu1 }
0x1564   :  { %v6939_v57 = vpop.eup %6938 }
0x1565   :  { %v2424_v20 = vadd.f32 1.0, %v6939_v57 }
0x1567   :  { %6940 = vrcp.f32 %v2424_v20 }
0x156d   :  { %v2249_v59 = vpop.permute.xlu1 %2248 }
0x156e   :  { %6286 = vmatmul.mubr.msk.f32.vlgmr.msra.gmra.mrb[30].mxu0 %vm460_vm2, %v2249_v59 }
0x156f   :  { %6743 = vmatpush3.bf16.msra.mxu0 %v7727_v11  ;;  %6303 = vmatprep.mubr.msk.f32.mxu0 %vm7245_vm1, %v7246_v7 }
0x1570   :  { %6301 = vmatprep.subr.mxu0 %v7246_v7 }
0x1571   :  { %v6941_v54 = vpop.eup %6940 }
0x1572   :  { %v2427_v56 = vmul.f32 %v6941_v54, %v2079_v41  ;;  %v2502_v21 = vsub.f32 1.0, %v6941_v54 }
0x1573   :  { %6302 = vmatpush3.msra.mxu0 %v7737_v15 }
0x1574   :  { %6304 = vmatmul.mubr.msk.f32.vlgmr.msra.gmra.mrb[32].mxu0 %vm460_vm2, %v2427_v56  ;;  %6747 = vmatprep.subr.bf16.mxu0 %v7244_v6 }
0x1575   :  { %6749 = vmatpush3.bf16.msra.mxu0 %v7754_v30  ;;  %6321 = vmatprep.mubr.msk.f32.mxu0 %vm7245_vm1, %v7246_v7 }
0x1576   :  { %6319 = vmatprep.subr.mxu0 %v7246_v7 }
0x1579   :  { %6320 = vmatpush3.msra.mxu0 %v7761_v33 }
0x157a   :  { %6753 = vmatprep.subr.bf16.mxu0 %v7244_v6 }
0x1641   :  { %v2318_v0 = vpop.f32.mrb[30].mxu0 }
0x1642   :  { %v2329_v3 = vadd.f32 %v2318_v0, %v7651_v4  ;;  %v6287_v5 = vpop.f32.mrb[31].mxu0  ;;  %v2322_v12 = vadd.f32 %v2318_v0, %v7600_v38 }
0x1644   :  { %2331 = vrot.lane.b32.xlu0 %v2329_v3, %s7250_s2  ;;  %v5672_v13 = vmul.f32 -1.442695, %v2322_v12 }
0x1647   :  { %v2497_v8 = vpop.f32.mrb[32].mxu0 }
0x1648   :  { %6942 = vtanh.f32 %v2497_v8  ;;  %v6305_v9 = vpop.f32.mrb[33].mxu0 }
0x1649   :  { %6944 = vpow2.f32 %v5672_v13 }
0x1652   :  { %v6943_v10 = vpop.eup %6942 }
0x1653   :  { %v2503_v62 = vsub.f32 %v6943_v10, %v2079_v41  ;;  %v6945_v16 = vpop.eup %6944 }
0x1654   :  { %v2326_v17 = vadd.f32 1.0, %v6945_v16 }
0x1655   :  { %2505 = vrot.lane.b32.xlu1 %v2503_v62, %s7247_s22 }
0x1656   :  { %6946 = vrcp.f32 %v2326_v17 }
0x1660   :  { %v6947_v18 = vpop.eup %6946 }
0x1661   :  { %v2347_v29 = vmul.f32 %v6947_v18, %v7920_v39 }
0x16b6   :  { %v2332_v19 = vpop.permute.xlu0 %2331 }
0x16b7   :  { %v2334_v1 = vmul.f32 %v6947_v18, %v2332_v19 }
0x16b9   :  { %2336 = vrot.lane.b32.xlu0 %v2334_v1, %s7248_s8 }
0x16c7   :  { %v2506_v22 = vpop.permute.xlu1 %2505 }
0x16c8   :  { %v2508_v23 = vmul.f32 %v2506_v22, %v2502_v21 }
0x16ca   :  { %v7946_v24 = vadd.f32 %v2508_v23, %v7899_v27  ;;  %v2341_v27 = vsub.f32 1.0, %v6947_v18 }
0x16cc   :  { %2581 = vrot.lane.b32.xlu1 %v7946_v24, %s7249_s29 }
0x172b   :  { %v2337_v25 = vpop.permute.xlu0 %2336 }
0x172c   :  { %v2339_v58 = vadd.f32 %v2337_v25, %v7600_v38 }
0x172e   :  { %6948 = vtanh.f32 %v2339_v58 }
0x1738   :  { %v6949_v26 = vpop.eup %6948 }
0x1739   :  { %2343 = vrot.lane.b32.xlu0 %v6949_v26, %s7249_s29 }
0x173e   :  { %v2582_v28 = vpop.permute.xlu1 %2581 }
0x173f   :  { %6322 = vmatmul.mubr.msk.f32.vlgmr.msra.gmra.mrb[34].mxu0 %vm460_vm2, %v2582_v28 }
0x1740   :  { %6755 = vmatpush3.bf16.msra.mxu0 %v7581_v31  ;;  %6339 = vmatprep.mubr.msk.f32.mxu0 %vm7245_vm1, %v7246_v7 }
0x1741   :  { %6337 = vmatprep.subr.mxu0 %v7246_v7 }
0x1744   :  { %6338 = vmatpush3.msra.mxu0 %v7588_v32  ;;  %v2577_v32 = vadd.f32 %v7799_v2, %v7924_v55 }
0x1745   :  { %6759 = vmatprep.subr.bf16.mxu0 %v7244_v6 }
0x17ab   :  { %v2344_v38 = vpop.permute.xlu0 %2343 }
0x17ac   :  { %v2346_v34 = vmul.f32 %v2344_v38, %v2341_v27 }
0x17ae   :  { %v7960_v37 = vadd.f32 %v2347_v29, %v2346_v34 }
0x17b0   :  { %2688 = vrot.lane.b32.xlu1 %v7960_v37, %s7249_s29 }
0x1812   :  { %v2651_v41 = vpop.f32.mrb[34].mxu0 }
0x1813   :  { %v2662_v36 = vadd.f32 %v2651_v41, %v7788_v63  ;;  %v6323_v47 = vpop.f32.mrb[35].mxu0  ;;  %v2655_v39 = vadd.f32 %v2651_v41, %v2577_v32 }
0x1815   :  { %2664 = vrot.lane.b32.xlu0 %v2662_v36, %s7250_s2  ;;  %v5678_v40 = vmul.f32 -1.442695, %v2655_v39 }
0x1817   :  { %6950 = vpow2.f32 %v5678_v40 }
0x1821   :  { %v6951_v53 = vpop.eup %6950 }
0x1822   :  { %v2689_v49 = vpop.permute.xlu1 %2688  ;;  %v2659_v45 = vadd.f32 1.0, %v6951_v53 }
0x1823   :  { %6331 = vmatmul.mubr.msk.f32.vlgmr.msra.gmra.mrb[36].mxu1 %vm460_vm2, %v2689_v49 }
0x1824   :  { %6758 = vmatpush3.bf16.msra.mxu1 %v7630_v60  ;;  %6348 = vmatprep.mubr.msk.f32.mxu1 %vm7245_vm1, %v7246_v7  ;;  %6952 = vrcp.f32 %v2659_v45 }
0x1825   :  { %6346 = vmatprep.subr.mxu1 %v7246_v7 }
0x1828   :  { %6347 = vmatpush3.msra.mxu1 %v7637_v61 }
0x1829   :  { %6762 = vmatprep.subr.bf16.mxu1 %v7244_v6 }
0x182e   :  { %v6953_v35 = vpop.eup %6952 }
0x182f   :  { %v2674_v10 = vsub.f32 1.0, %v6953_v35  ;;  %v2680_v12 = vmul.f32 %v6953_v35, %v7946_v24 }
0x1887   :  { %v2665_v57 = vpop.permute.xlu0 %2664 }
0x1888   :  { %v2667_v20 = vmul.f32 %v6953_v35, %v2665_v57 }
0x188a   :  { %2669 = vrot.lane.b32.xlu1 %v2667_v20, %s7248_s8 }
0x18f6   :  { %v2758_v59 = vpop.f32.mrb[36].mxu1 }
0x18f7   :  { %v5680_v54 = vmul.f32 -1.442695, %v2758_v59  ;;  %v6332_v56 = vpop.f32.mrb[37].mxu1 }
0x18f9   :  { %6954 = vpow2.f32 %v5680_v54 }
0x18fc   :  { %v2670_v61 = vpop.permute.xlu1 %2669 }
0x18fd   :  { %v2672_v0 = vadd.f32 %v2670_v61, %v2577_v32 }
0x18ff   :  { %6956 = vtanh.f32 %v2672_v0 }
0x1903   :  { %v6955_v3 = vpop.eup %6954 }
0x1904   :  { %v2765_v55 = vadd.f32 1.0, %v6955_v3 }
0x1906   :  { %6958 = vrcp.f32 %v2765_v55 }
0x1909   :  { %v6957_v5 = vpop.eup %6956 }
0x190a   :  { %2676 = vrot.lane.b32.xlu0 %v6957_v5, %s7249_s29 }
0x1910   :  { %v6959_v8 = vpop.eup %6958 }
0x1911   :  { %v2769_v9 = vmul.f32 %v6959_v8, %v2689_v49 }
0x1913   :  { %6340 = vmatmul.mubr.msk.f32.vlgmr.msra.gmra.mrb[36].mxu0 %vm460_vm2, %v2769_v9  ;;  %v8051_v9 = vld [vmem:[%s8405_s6 + $0x10] sm:$0xff] }
0x1914   :  { %6761 = vmatpush3.bf16.msra.mxu0 %v7673_v43  ;;  %6357 = vmatprep.mubr.msk.f32.mxu0 %vm7245_vm1, %v7246_v7 }
0x1915   :  { %6355 = vmatprep.subr.mxu0 %v7246_v7 }
0x1918   :  { %6356 = vmatpush3.msra.mxu0 %v7689_v50  ;;  %v8006_v50 = vld [vmem:[%s8404_s5 + $0x10] sm:$0xff] }
0x1919   :  { %6765 = vmatprep.subr.bf16.mxu0 %v7244_v6 }
0x197c   :  { %v2677_v62 = vpop.permute.xlu0 %2676 }
0x197d   :  { %v2679_v13 = vmul.f32 %v2677_v62, %v2674_v10 }
0x197f   :  { %v7985_v16 = vadd.f32 %v2680_v12, %v2679_v13 }
0x1981   :  { %2683 = vrot.lane.b32.xlu1 %v7985_v16, %s7249_s29 }
0x19e6   :  { %v2839_v17 = vpop.f32.mrb[36].mxu0 }
0x19e7   :  { %6960 = vtanh.f32 %v2839_v17  ;;  %v6341_v18 = vpop.f32.mrb[37].mxu0 }
0x19f1   :  { %v6961_v19 = vpop.eup %6960 }
0x19f2   :  { %v2845_v1 = vsub.f32 %v6961_v19, %v2689_v49 }
0x19f3   :  { %v2684_v21 = vpop.permute.xlu1 %2683 }
0x19f4   :  { %2686 = vst.msk [vmem:[#allocation2 + $0x10] sm:$0xff] %vm460_vm2, %v2684_v21  ;;  %6358 = vmatmul.mubr.msk.f32.vlgmr.msra.gmra.mrb[38].mxu0 %vm460_vm2, %v2684_v21  ;;  %2847 = vrot.lane.b32.xlu0 %v2845_v1, %s7247_s22  ;;  %v8070_v1 = vld [vmem:[%s8408_s9 + $0x10] sm:$0xff] }
0x19f5   :  { %6767 = vmatpush3.bf16.msra.mxu0 %v7691_v51  ;;  %6375 = vmatprep.mubr.msk.f32.mxu0 %vm7245_vm1, %v7246_v7 }
0x19f6   :  { %6373 = vmatprep.subr.mxu0 %v7246_v7 }
0x19f9   :  { %6374 = vmatpush3.msra.mxu0 %v7703_v52  ;;  %v2844_v52 = vsub.f32 1.0, %v6959_v8 }
0x19fa   :  { %6376 = vmatmul.mubr.msk.f32.vlgmr.msra.gmra.mrb[40].mxu0 %vm460_vm2, %v2689_v49  ;;  %6771 = vmatprep.subr.bf16.mxu0 %v7244_v6 }
0x19fb   :  { %6773 = vmatpush3.bf16.msra.mxu0 %v7551_v14  ;;  %6393 = vmatprep.mubr.msk.f32.mxu0 %vm7245_vm1, %v7246_v7 }
0x19fc   :  { %6391 = vmatprep.subr.mxu0 %v7246_v7 }
0x19ff   :  { %6392 = vmatpush3.msra.mxu0 %v8006_v50 }
0x1a00   :  { %6777 = vmatprep.subr.bf16.mxu0 %v7244_v6 }
0x1a66   :  { %v2848_v22 = vpop.permute.xlu0 %2847 }
0x1a67   :  { %v2850_v23 = vmul.f32 %v2848_v22, %v2844_v52 }
0x1a69   :  { %v8011_v24 = vadd.f32 %v2850_v23, %v7960_v37 }
0x1a6b   :  { %2853 = vrot.lane.b32.xlu1 %v8011_v24, %s7249_s29 }
0x1ac7   :  { %v3022_v25 = vpop.f32.mrb[38].mxu0 }
0x1ac8   :  { %v5685_v58 = vmul.f32 -1.442695, %v3022_v25  ;;  %v6359_v26 = vpop.f32.mrb[39].mxu0 }
0x1aca   :  { %6962 = vpow2.f32 %v5685_v58 }
0x1acd   :  { %v8015_v28 = vpop.f32.mrb[40].mxu0 }
0x1ace   :  { %v6377_v27 = vpop.f32.mrb[41].mxu0 }
0x1ad4   :  { %v6963_v38 = vpop.eup %6962 }
0x1ad5   :  { %v3029_v29 = vadd.f32 1.0, %v6963_v38 }
0x1ad7   :  { %6964 = vrcp.f32 %v3029_v29 }
0x1add   :  { %v2854_v34 = vpop.permute.xlu1 %2853 }
0x1ade   :  { %6349 = vmatmul.mubr.msk.f32.vlgmr.msra.gmra.mrb[38].mxu1 %vm460_vm2, %v2854_v34 }
0x1adf   :  { %6764 = vmatpush3.bf16.msra.mxu1 %v7727_v11  ;;  %6366 = vmatprep.mubr.msk.f32.mxu1 %vm7245_vm1, %v7246_v7 }
0x1ae0   :  { %6364 = vmatprep.subr.mxu1 %v7246_v7 }
0x1ae1   :  { %v6965_v37 = vpop.eup %6964 }
0x1ae2   :  { %v3032_v41 = vmul.f32 %v6965_v37, %v2684_v21  ;;  %v3107_v54 = vsub.f32 1.0, %v6965_v37 }
0x1ae3   :  { %6365 = vmatpush3.msra.mxu1 %v7737_v15 }
0x1ae4   :  { %6367 = vmatmul.mubr.msk.f32.vlgmr.msra.gmra.mrb[40].mxu1 %vm460_vm2, %v3032_v41  ;;  %6768 = vmatprep.subr.bf16.mxu1 %v7244_v6 }
0x1ae5   :  { %6770 = vmatpush3.bf16.msra.mxu1 %v7754_v30  ;;  %6384 = vmatprep.mubr.msk.f32.mxu1 %vm7245_vm1, %v7246_v7 }
0x1ae6   :  { %6382 = vmatprep.subr.mxu1 %v7246_v7 }
0x1ae9   :  { %6383 = vmatpush3.msra.mxu1 %v7761_v33 }
0x1aea   :  { %6774 = vmatprep.subr.bf16.mxu1 %v7244_v6 }
0x1bb1   :  { %v2923_v36 = vpop.f32.mrb[38].mxu1 }
0x1bb2   :  { %v2934_v47 = vadd.f32 %v2923_v36, %v7651_v4  ;;  %v6350_v49 = vpop.f32.mrb[39].mxu1  ;;  %v2927_v53 = vadd.f32 %v2923_v36, %v7609_v44 }
0x1bb3   :  { %v8086_v49 = vld [vmem:[%s8410_s11 + $0x10] sm:$0xff] }
0x1bb4   :  { %2936 = vrot.lane.b32.xlu0 %v2934_v47, %s7250_s2  ;;  %v5683_v45 = vmul.f32 -1.442695, %v2927_v53 }
0x1bb7   :  { %v3102_v15 = vpop.f32.mrb[40].mxu1 }
0x1bb8   :  { %6966 = vtanh.f32 %v3102_v15  ;;  %v6368_v32 = vpop.f32.mrb[41].mxu1 }
0x1bb9   :  { %6968 = vpow2.f32 %v5683_v45 }
0x1bc2   :  { %v6967_v39 = vpop.eup %6966 }
0x1bc3   :  { %v3108_v40 = vsub.f32 %v6967_v39, %v2684_v21  ;;  %v6969_v33 = vpop.eup %6968  ;;  %v3182_v21 = vadd.f32 %v7799_v2, %v8015_v28 }
0x1bc4   :  { %v2931_v35 = vadd.f32 1.0, %v6969_v33 }
0x1bc5   :  { %3110 = vrot.lane.b32.xlu1 %v3108_v40, %s7247_s22 }
0x1bc6   :  { %6970 = vrcp.f32 %v2931_v35 }
0x1bd0   :  { %v6971_v57 = vpop.eup %6970 }
0x1bd1   :  { %v2952_v62 = vmul.f32 %v6971_v57, %v8011_v24 }
0x1c26   :  { %v2937_v20 = vpop.permute.xlu0 %2936 }
0x1c27   :  { %v2939_v59 = vmul.f32 %v6971_v57, %v2937_v20 }
0x1c29   :  { %2941 = vrot.lane.b32.xlu0 %v2939_v59, %s7248_s8  ;;  %v8105_v59 = vld [vmem:[%s8412_s13 + $0x10] sm:$0xff] }
0x1c37   :  { %v3111_v56 = vpop.permute.xlu1 %3110 }
0x1c38   :  { %v3113_v61 = vmul.f32 %v3111_v56, %v3107_v54 }
0x1c3a   :  { %v8037_v0 = vadd.f32 %v3113_v61, %v7985_v16 }
0x1c3c   :  { %3186 = vrot.lane.b32.xlu1 %v8037_v0, %s7249_s29 }
0x1c9b   :  { %v2942_v3 = vpop.permute.xlu0 %2941 }
0x1c9c   :  { %v2944_v55 = vadd.f32 %v2942_v3, %v7609_v44  ;;  %v2946_v44 = vsub.f32 1.0, %v6971_v57 }
0x1c9e   :  { %6972 = vtanh.f32 %v2944_v55 }
0x1ca8   :  { %v6973_v5 = vpop.eup %6972 }
0x1ca9   :  { %2948 = vrot.lane.b32.xlu0 %v6973_v5, %s7249_s29 }
0x1cae   :  { %v3187_v8 = vpop.permute.xlu1 %3186 }
0x1caf   :  { %6385 = vmatmul.mubr.msk.f32.vlgmr.msra.gmra.mrb[42].mxu1 %vm460_vm2, %v3187_v8 }
0x1cb0   :  { %6776 = vmatpush3.bf16.msra.mxu1 %v7581_v31  ;;  %6402 = vmatprep.mubr.msk.f32.mxu1 %vm7245_vm1, %v7246_v7 }
0x1cb1   :  { %6400 = vmatprep.subr.mxu1 %v7246_v7 }
0x1cb4   :  { %6401 = vmatpush3.msra.mxu1 %v8051_v9 }
0x1cb5   :  { %6780 = vmatprep.subr.bf16.mxu1 %v7244_v6 }
0x1d1b   :  { %v2949_v10 = vpop.permute.xlu0 %2948 }
0x1d1c   :  { %v2951_v12 = vmul.f32 %v2949_v10, %v2946_v44 }
0x1d1e   :  { %v8056_v13 = vadd.f32 %v2952_v62, %v2951_v12 }
0x1d20   :  { %3293 = vrot.lane.b32.xlu1 %v8056_v13, %s7249_s29 }
0x1d82   :  { %v3256_v16 = vpop.f32.mrb[42].mxu1 }
0x1d83   :  { %v3267_v17 = vadd.f32 %v3256_v16, %v7788_v63  ;;  %v6386_v18 = vpop.f32.mrb[43].mxu1  ;;  %v3260_v52 = vadd.f32 %v3256_v16, %v3182_v21 }
0x1d84   :  { %v8143_v18 = vld [vmem:[%s8414_s15 + $0x10] sm:$0xff] }
0x1d85   :  { %3269 = vrot.lane.b32.xlu0 %v3267_v17, %s7250_s2  ;;  %v5689_v22 = vmul.f32 -1.442695, %v3260_v52  ;;  %v8131_v17 = vld [vmem:[%s8411_s12 + $0x10] sm:$0xff] }
0x1d87   :  { %6974 = vpow2.f32 %v5689_v22 }
0x1d91   :  { %v6975_v23 = vpop.eup %6974 }
0x1d92   :  { %v3294_v19 = vpop.permute.xlu1 %3293  ;;  %v3264_v24 = vadd.f32 1.0, %v6975_v23 }
0x1d93   :  { %6394 = vmatmul.mubr.msk.f32.vlgmr.msra.gmra.mrb[42].mxu0 %vm460_vm2, %v3294_v19 }
0x1d94   :  { %6779 = vmatpush3.bf16.msra.mxu0 %v7630_v60  ;;  %6411 = vmatprep.mubr.msk.f32.mxu0 %vm7245_vm1, %v7246_v7  ;;  %6976 = vrcp.f32 %v3264_v24 }
0x1d95   :  { %6409 = vmatprep.subr.mxu0 %v7246_v7 }
0x1d98   :  { %6410 = vmatpush3.msra.mxu0 %v8070_v1 }
0x1d99   :  { %6783 = vmatprep.subr.bf16.mxu0 %v7244_v6 }
0x1d9e   :  { %v6977_v25 = vpop.eup %6976 }
0x1d9f   :  { %v3279_v15 = vsub.f32 1.0, %v6977_v25  ;;  %v3285_v39 = vmul.f32 %v6977_v25, %v8037_v0 }
0x1df7   :  { %v3270_v58 = vpop.permute.xlu0 %3269 }
0x1df8   :  { %v3272_v26 = vmul.f32 %v6977_v25, %v3270_v58 }
0x1dfa   :  { %3274 = vrot.lane.b32.xlu1 %v3272_v26, %s7248_s8 }
0x1e66   :  { %v3363_v27 = vpop.f32.mrb[42].mxu0 }
0x1e67   :  { %v5691_v38 = vmul.f32 -1.442695, %v3363_v27  ;;  %v6395_v29 = vpop.f32.mrb[43].mxu0 }
0x1e69   :  { %6978 = vpow2.f32 %v5691_v38 }
0x1e6c   :  { %v3275_v34 = vpop.permute.xlu1 %3274 }
0x1e6d   :  { %v3277_v37 = vadd.f32 %v3275_v34, %v3182_v21 }
0x1e6f   :  { %6980 = vtanh.f32 %v3277_v37 }
0x1e73   :  { %v6979_v41 = vpop.eup %6978 }
0x1e74   :  { %v3370_v2 = vadd.f32 1.0, %v6979_v41 }
0x1e76   :  { %6982 = vrcp.f32 %v3370_v2 }
0x1e79   :  { %v6981_v28 = vpop.eup %6980 }
0x1e7a   :  { %3281 = vrot.lane.b32.xlu0 %v6981_v28, %s7249_s29 }
0x1e80   :  { %v6983_v36 = vpop.eup %6982 }
0x1e81   :  { %v3374_v47 = vmul.f32 %v6983_v36, %v3294_v19  ;;  %v3449_v54 = vsub.f32 1.0, %v6983_v36 }
0x1e83   :  { %6403 = vmatmul.mubr.msk.f32.vlgmr.msra.gmra.mrb[44].mxu1 %vm460_vm2, %v3374_v47 }
0x1e84   :  { %6782 = vmatpush3.bf16.msra.mxu1 %v7673_v43  ;;  %6420 = vmatprep.mubr.msk.f32.mxu1 %vm7245_vm1, %v7246_v7 }
0x1e85   :  { %6418 = vmatprep.subr.mxu1 %v7246_v7 }
0x1e88   :  { %6419 = vmatpush3.msra.mxu1 %v8086_v49 }
0x1e89   :  { %6786 = vmatprep.subr.bf16.mxu1 %v7244_v6 }
0x1eec   :  { %v3282_v32 = vpop.permute.xlu0 %3281 }
0x1eed   :  { %v3284_v40 = vmul.f32 %v3282_v32, %v3279_v15 }
0x1eef   :  { %v8091_v53 = vadd.f32 %v3285_v39, %v3284_v40 }
0x1ef1   :  { %3288 = vrot.lane.b32.xlu1 %v8091_v53, %s7249_s29 }
0x1f56   :  { %v3444_v45 = vpop.f32.mrb[44].mxu1 }
0x1f57   :  { %6984 = vtanh.f32 %v3444_v45  ;;  %v6404_v33 = vpop.f32.mrb[45].mxu1 }
0x1f61   :  { %v6985_v35 = vpop.eup %6984 }
0x1f62   :  { %v3450_v57 = vsub.f32 %v6985_v35, %v3294_v19 }
0x1f63   :  { %v3289_v20 = vpop.permute.xlu1 %3288 }
0x1f64   :  { %3291 = vst.msk [vmem:[#allocation2 + $0x18] sm:$0xff] %vm460_vm2, %v3289_v20  ;;  %6421 = vmatmul.mubr.msk.f32.vlgmr.msra.gmra.mrb[46].mxu1 %vm460_vm2, %v3289_v20  ;;  %3452 = vrot.lane.b32.xlu0 %v3450_v57, %s7247_s22 }
0x1f65   :  { %6788 = vmatpush3.bf16.msra.mxu1 %v7691_v51  ;;  %6438 = vmatprep.mubr.msk.f32.mxu1 %vm7245_vm1, %v7246_v7 }
0x1f66   :  { %6436 = vmatprep.subr.mxu1 %v7246_v7 }
0x1f69   :  { %6437 = vmatpush3.msra.mxu1 %v8105_v59 }
0x1f6a   :  { %6439 = vmatmul.mubr.msk.f32.vlgmr.msra.gmra.mrb[48].mxu1 %vm460_vm2, %v3294_v19  ;;  %6792 = vmatprep.subr.bf16.mxu1 %v7244_v6 }
0x1f6b   :  { %6794 = vmatpush3.bf16.msra.mxu1 %v7551_v14  ;;  %6456 = vmatprep.mubr.msk.f32.mxu1 %vm7245_vm1, %v7246_v7 }
0x1f6c   :  { %6454 = vmatprep.subr.mxu1 %v7246_v7 }
0x1f6f   :  { %6455 = vmatpush3.msra.mxu1 %v8006_v50 }
0x1f70   :  { %6798 = vmatprep.subr.bf16.mxu1 %v7244_v6 }
0x1fd6   :  { %v3453_v56 = vpop.permute.xlu0 %3452 }
0x1fd7   :  { %v3455_v61 = vmul.f32 %v3453_v56, %v3449_v54  ;;  %v8180_v56 = vld [vmem:[#allocation11] ss:$0 sm:$0xff] }
0x1fd9   :  { %v8117_v0 = vadd.f32 %v3455_v61, %v8056_v13 }
0x1fdb   :  { %3458 = vrot.lane.b32.xlu1 %v8117_v0, %s7249_s29 }
0x2037   :  { %v3627_v3 = vpop.f32.mrb[46].mxu1 }
0x2038   :  { %v5696_v55 = vmul.f32 -1.442695, %v3627_v3  ;;  %v6422_v5 = vpop.f32.mrb[47].mxu1 }
0x203a   :  { %6986 = vpow2.f32 %v5696_v55 }
0x203d   :  { %v8121_v8 = vpop.f32.mrb[48].mxu1 }
0x203e   :  { %v6440_v44 = vpop.f32.mrb[49].mxu1  ;;  %v3787_v61 = vadd.f32 %v8180_v56, %v8121_v8 }
0x2044   :  { %v6987_v10 = vpop.eup %6986 }
0x2045   :  { %v3634_v62 = vadd.f32 1.0, %v6987_v10 }
0x2047   :  { %6988 = vrcp.f32 %v3634_v62 }
0x204d   :  { %v3459_v12 = vpop.permute.xlu1 %3458 }
0x204e   :  { %6412 = vmatmul.mubr.msk.f32.vlgmr.msra.gmra.mrb[44].mxu0 %vm460_vm2, %v3459_v12 }
0x204f   :  { %6785 = vmatpush3.bf16.msra.mxu0 %v7727_v11  ;;  %6429 = vmatprep.mubr.msk.f32.mxu0 %vm7245_vm1, %v7246_v7 }
0x2050   :  { %6427 = vmatprep.subr.mxu0 %v7246_v7 }
0x2051   :  { %v6989_v13 = vpop.eup %6988 }
0x2052   :  { %v3637_v16 = vmul.f32 %v6989_v13, %v3289_v20  ;;  %v3712_v41 = vsub.f32 1.0, %v6989_v13 }
0x2053   :  { %6428 = vmatpush3.msra.mxu0 %v8131_v17 }
0x2054   :  { %6430 = vmatmul.mubr.msk.f32.vlgmr.msra.gmra.mrb[46].mxu0 %vm460_vm2, %v3637_v16  ;;  %6789 = vmatprep.subr.bf16.mxu0 %v7244_v6 }
0x2055   :  { %6791 = vmatpush3.bf16.msra.mxu0 %v7754_v30  ;;  %6447 = vmatprep.mubr.msk.f32.mxu0 %vm7245_vm1, %v7246_v7 }
0x2056   :  { %6445 = vmatprep.subr.mxu0 %v7246_v7 }
0x2059   :  { %6446 = vmatpush3.msra.mxu0 %v8143_v18 }
0x205a   :  { %6795 = vmatprep.subr.bf16.mxu0 %v7244_v6 }
0x2121   :  { %v3528_v19 = vpop.f32.mrb[44].mxu0 }
0x2122   :  { %v3539_v21 = vadd.f32 %v3528_v19, %v7651_v4  ;;  %v6413_v52 = vpop.f32.mrb[45].mxu0  ;;  %v3532_v58 = vadd.f32 %v3528_v19, %v7606_v42 }
0x2124   :  { %3541 = vrot.lane.b32.xlu0 %v3539_v21, %s7250_s2  ;;  %v5694_v26 = vmul.f32 -1.442695, %v3532_v58 }
0x2127   :  { %v3707_v22 = vpop.f32.mrb[46].mxu0 }
0x2128   :  { %6990 = vtanh.f32 %v3707_v22  ;;  %v6431_v23 = vpop.f32.mrb[47].mxu0 }
0x2129   :  { %6992 = vpow2.f32 %v5694_v26 }
0x2132   :  { %v6991_v24 = vpop.eup %6990 }
0x2133   :  { %v3713_v25 = vsub.f32 %v6991_v24, %v3289_v20  ;;  %v6993_v27 = vpop.eup %6992 }
0x2134   :  { %v3536_v38 = vadd.f32 1.0, %v6993_v27 }
0x2135   :  { %3715 = vrot.lane.b32.xlu1 %v3713_v25, %s7247_s22 }
0x2136   :  { %6994 = vrcp.f32 %v3536_v38 }
0x2140   :  { %v6995_v29 = vpop.eup %6994 }
0x2141   :  { %v3551_v40 = vsub.f32 1.0, %v6995_v29 }
0x2196   :  { %v3542_v34 = vpop.permute.xlu0 %3541 }
0x2197   :  { %v3544_v37 = vmul.f32 %v6995_v29, %v3542_v34 }
0x2199   :  { %3546 = vrot.lane.b32.xlu0 %v3544_v37, %s7248_s8 }
0x21a7   :  { %v3716_v2 = vpop.permute.xlu1 %3715 }
0x21a8   :  { %v3718_v28 = vmul.f32 %v3716_v2, %v3712_v41 }
0x21aa   :  { %v8153_v36 = vadd.f32 %v3718_v28, %v8091_v53  ;;  %v3557_v53 = vmul.f32 %v6995_v29, %v8117_v0 }
0x21ac   :  { %3791 = vrot.lane.b32.xlu1 %v8153_v36, %s7249_s29 }
0x220b   :  { %v3547_v47 = vpop.permute.xlu0 %3546 }
0x220c   :  { %v3549_v15 = vadd.f32 %v3547_v47, %v7606_v42 }
0x220e   :  { %6996 = vtanh.f32 %v3549_v15 }
0x2218   :  { %v6997_v32 = vpop.eup %6996 }
0x2219   :  { %3553 = vrot.lane.b32.xlu0 %v6997_v32, %s7249_s29 }
0x221e   :  { %v3792_v39 = vpop.permute.xlu1 %3791 }
0x221f   :  { %6448 = vmatmul.mubr.msk.f32.vlgmr.msra.gmra.mrb[48].mxu0 %vm460_vm2, %v3792_v39 }
0x2220   :  { %6797 = vmatpush3.bf16.msra.mxu0 %v7581_v31  ;;  %6465 = vmatprep.mubr.msk.f32.mxu0 %vm7245_vm1, %v7246_v7 }
0x2221   :  { %6463 = vmatprep.subr.mxu0 %v7246_v7 }
0x2224   :  { %6464 = vmatpush3.msra.mxu0 %v8051_v9 }
0x2225   :  { %6801 = vmatprep.subr.bf16.mxu0 %v7244_v6 }
0x228b   :  { %v3554_v42 = vpop.permute.xlu0 %3553 }
0x228c   :  { %v3556_v45 = vmul.f32 %v3554_v42, %v3551_v40 }
0x228e   :  { %v8167_v33 = vadd.f32 %v3557_v53, %v3556_v45 }
0x2290   :  { %3898 = vrot.lane.b32.xlu1 %v8167_v33, %s7249_s29 }
0x22f2   :  { %v3861_v35 = vpop.f32.mrb[48].mxu0 }
0x22f3   :  { %v3872_v57 = vadd.f32 %v3861_v35, %v7788_v63  ;;  %v6449_v20 = vpop.f32.mrb[49].mxu0  ;;  %v3865_v0 = vadd.f32 %v3861_v35, %v3787_v61 }
0x22f5   :  { %3874 = vrot.lane.b32.xlu0 %v3872_v57, %s7250_s2  ;;  %v5700_v3 = vmul.f32 -1.442695, %v3865_v0 }
0x22f7   :  { %6998 = vpow2.f32 %v5700_v3 }
0x2301   :  { %v6999_v55 = vpop.eup %6998 }
0x2302   :  { %v3899_v54 = vpop.permute.xlu1 %3898  ;;  %v3869_v5 = vadd.f32 1.0, %v6999_v55 }
0x2303   :  { %6457 = vmatmul.mubr.msk.f32.vlgmr.msra.gmra.mrb[50].mxu1 %vm460_vm2, %v3899_v54 }
0x2304   :  { %6800 = vmatpush3.bf16.msra.mxu1 %v7630_v60  ;;  %6474 = vmatprep.mubr.msk.f32.mxu1 %vm7245_vm1, %v7246_v7  ;;  %7000 = vrcp.f32 %v3869_v5 }
0x2305   :  { %6472 = vmatprep.subr.mxu1 %v7246_v7 }
0x2308   :  { %6473 = vmatpush3.msra.mxu1 %v8070_v1 }
0x2309   :  { %6804 = vmatprep.subr.bf16.mxu1 %v7244_v6 }
0x230e   :  { %v7001_v44 = vpop.eup %7000 }
0x230f   :  { %v3884_v25 = vsub.f32 1.0, %v7001_v44  ;;  %v3890_v26 = vmul.f32 %v7001_v44, %v8153_v36 }
0x2367   :  { %v3875_v10 = vpop.permute.xlu0 %3874 }
0x2368   :  { %v3877_v62 = vmul.f32 %v7001_v44, %v3875_v10 }
0x236a   :  { %3879 = vrot.lane.b32.xlu1 %v3877_v62, %s7248_s8 }
0x23d6   :  { %v3968_v12 = vpop.f32.mrb[50].mxu1 }
0x23d7   :  { %v5702_v13 = vmul.f32 -1.442695, %v3968_v12  ;;  %v6458_v16 = vpop.f32.mrb[51].mxu1 }
0x23d9   :  { %7002 = vpow2.f32 %v5702_v13 }
0x23dc   :  { %v3880_v19 = vpop.permute.xlu1 %3879 }
0x23dd   :  { %v3882_v21 = vadd.f32 %v3880_v19, %v3787_v61 }
0x23df   :  { %7004 = vtanh.f32 %v3882_v21 }
0x23e3   :  { %v7003_v52 = vpop.eup %7002 }
0x23e4   :  { %v3975_v8 = vadd.f32 1.0, %v7003_v52 }
0x23e6   :  { %7006 = vrcp.f32 %v3975_v8 }
0x23e9   :  { %v7005_v22 = vpop.eup %7004 }
0x23ea   :  { %3886 = vrot.lane.b32.xlu0 %v7005_v22, %s7249_s29 }
0x23f0   :  { %v7007_v23 = vpop.eup %7006 }
0x23f1   :  { %v3979_v24 = vmul.f32 %v7007_v23, %v3899_v54  ;;  %v4054_v28 = vsub.f32 1.0, %v7007_v23 }
0x23f3   :  { %6466 = vmatmul.mubr.msk.f32.vlgmr.msra.gmra.mrb[50].mxu0 %vm460_vm2, %v3979_v24 }
0x23f4   :  { %6803 = vmatpush3.bf16.msra.mxu0 %v7673_v43  ;;  %6483 = vmatprep.mubr.msk.f32.mxu0 %vm7245_vm1, %v7246_v7 }
0x23f5   :  { %6481 = vmatprep.subr.mxu0 %v7246_v7 }
0x23f8   :  { %6482 = vmatpush3.msra.mxu0 %v8086_v49 }
0x23f9   :  { %6807 = vmatprep.subr.bf16.mxu0 %v7244_v6 }
0x245c   :  { %v3887_v58 = vpop.permute.xlu0 %3886 }
0x245d   :  { %v3889_v27 = vmul.f32 %v3887_v58, %v3884_v25 }
0x245f   :  { %v8194_v38 = vadd.f32 %v3890_v26, %v3889_v27 }
0x2461   :  { %3893 = vrot.lane.b32.xlu1 %v8194_v38, %s7249_s29 }
0x24c6   :  { %v4049_v29 = vpop.f32.mrb[50].mxu0 }
0x24c7   :  { %7008 = vtanh.f32 %v4049_v29  ;;  %v6467_v34 = vpop.f32.mrb[51].mxu0 }
0x24d1   :  { %v7009_v37 = vpop.eup %7008 }
0x24d2   :  { %v4055_v41 = vsub.f32 %v7009_v37, %v3899_v54 }
0x24d3   :  { %v3894_v2 = vpop.permute.xlu1 %3893 }
0x24d4   :  { %3896 = vst.msk [vmem:[#allocation2 + $0x20] sm:$0xff] %vm460_vm2, %v3894_v2  ;;  %6484 = vmatmul.mubr.msk.f32.vlgmr.msra.gmra.mrb[52].mxu0 %vm460_vm2, %v3894_v2  ;;  %4057 = vrot.lane.b32.xlu0 %v4055_v41, %s7247_s22 }
0x24d5   :  { %6809 = vmatpush3.bf16.msra.mxu0 %v7691_v51  ;;  %6501 = vmatprep.mubr.msk.f32.mxu0 %vm7245_vm1, %v7246_v7 }
0x24d6   :  { %6499 = vmatprep.subr.mxu0 %v7246_v7 }
0x24d9   :  { %6500 = vmatpush3.msra.mxu0 %v8105_v59 }
0x24da   :  { %6502 = vmatmul.mubr.msk.f32.vlgmr.msra.gmra.mrb[54].mxu0 %vm460_vm2, %v3899_v54  ;;  %6813 = vmatprep.subr.bf16.mxu0 %v7244_v6 }
0x24db   :  { %6815 = vmatpush3.bf16.msra.mxu0 %v7551_v14  ;;  %6519 = vmatprep.mubr.msk.f32.mxu0 %vm7245_vm1, %v7246_v7 }
0x24dc   :  { %6517 = vmatprep.subr.mxu0 %v7246_v7 }
0x24df   :  { %6518 = vmatpush3.msra.mxu0 %v8006_v50 }
0x24e0   :  { %6819 = vmatprep.subr.bf16.mxu0 %v7244_v6 }
0x2546   :  { %v4058_v36 = vpop.permute.xlu0 %4057 }
0x2547   :  { %v4060_v47 = vmul.f32 %v4058_v36, %v4054_v28 }
0x2549   :  { %v8215_v15 = vadd.f32 %v4060_v47, %v8167_v33 }
0x254b   :  { %4063 = vrot.lane.b32.xlu1 %v8215_v15, %s7249_s29 }
0x25a7   :  { %v4232_v32 = vpop.f32.mrb[52].mxu0 }
0x25a8   :  { %v5707_v14 = vmul.f32 -1.442695, %v4232_v32  ;;  %v6485_v39 = vpop.f32.mrb[53].mxu0 }
0x25aa   :  { %7010 = vpow2.f32 %v5707_v14 }
0x25ad   :  { %v8219_v40 = vpop.f32.mrb[54].mxu0 }
0x25ae   :  { %v6503_v42 = vpop.f32.mrb[55].mxu0 }
0x25b4   :  { %v7011_v53 = vpop.eup %7010 }
0x25b5   :  { %v4239_v50 = vadd.f32 1.0, %v7011_v53 }
0x25b7   :  { %7012 = vrcp.f32 %v4239_v50 }
0x25bd   :  { %v4064_v45 = vpop.permute.xlu1 %4063 }
0x25be   :  { %6475 = vmatmul.mubr.msk.f32.vlgmr.msra.gmra.mrb[52].mxu1 %vm460_vm2, %v4064_v45 }
0x25bf   :  { %6806 = vmatpush3.bf16.msra.mxu1 %v7727_v11  ;;  %6492 = vmatprep.mubr.msk.f32.mxu1 %vm7245_vm1, %v7246_v7 }
0x25c0   :  { %6490 = vmatprep.subr.mxu1 %v7246_v7 }
0x25c1   :  { %v7013_v33 = vpop.eup %7012 }
0x25c2   :  { %v4242_v35 = vmul.f32 %v7013_v33, %v3894_v2  ;;  %v4317_v19 = vsub.f32 1.0, %v7013_v33 }
0x25c3   :  { %6491 = vmatpush3.msra.mxu1 %v8131_v17 }
0x25c4   :  { %6493 = vmatmul.mubr.msk.f32.vlgmr.msra.gmra.mrb[54].mxu1 %vm460_vm2, %v4242_v35  ;;  %6810 = vmatprep.subr.bf16.mxu1 %v7244_v6 }
0x25c5   :  { %6812 = vmatpush3.bf16.msra.mxu1 %v7754_v30  ;;  %6510 = vmatprep.mubr.msk.f32.mxu1 %vm7245_vm1, %v7246_v7 }
0x25c6   :  { %6508 = vmatprep.subr.mxu1 %v7246_v7 }
0x25c9   :  { %6509 = vmatpush3.msra.mxu1 %v8143_v18 }
0x25ca   :  { %6816 = vmatprep.subr.bf16.mxu1 %v7244_v6 }
0x2691   :  { %v4133_v57 = vpop.f32.mrb[52].mxu1 }
0x2692   :  { %v4144_v20 = vadd.f32 %v4133_v57, %v7651_v4  ;;  %v6476_v54 = vpop.f32.mrb[53].mxu1  ;;  %v4137_v5 = vadd.f32 %v4133_v57, %v7615_v48 }
0x2694   :  { %4146 = vrot.lane.b32.xlu0 %v4144_v20, %s7250_s2  ;;  %v5705_v44 = vmul.f32 -1.442695, %v4137_v5 }
0x2697   :  { %v4312_v61 = vpop.f32.mrb[54].mxu1 }
0x2698   :  { %7014 = vtanh.f32 %v4312_v61  ;;  %v6494_v0 = vpop.f32.mrb[55].mxu1 }
0x2699   :  { %7016 = vpow2.f32 %v5705_v44 }
0x26a2   :  { %v7015_v3 = vpop.eup %7014 }
0x26a3   :  { %v4318_v55 = vsub.f32 %v7015_v3, %v3894_v2  ;;  %v7017_v10 = vpop.eup %7016 }
0x26a4   :  { %v4141_v62 = vadd.f32 1.0, %v7017_v10 }
0x26a5   :  { %4320 = vrot.lane.b32.xlu1 %v4318_v55, %s7247_s22 }
0x26a6   :  { %7018 = vrcp.f32 %v4141_v62 }
0x26b0   :  { %v7019_v12 = vpop.eup %7018 }
0x26b1   :  { %v4156_v58 = vsub.f32 1.0, %v7019_v12  ;;  %v4162_v26 = vmul.f32 %v7019_v12, %v8215_v15 }
0x2706   :  { %v4147_v13 = vpop.permute.xlu0 %4146 }
0x2707   :  { %v4149_v16 = vmul.f32 %v7019_v12, %v4147_v13 }
0x2709   :  { %4151 = vrot.lane.b32.xlu0 %v4149_v16, %s7248_s8 }
0x2717   :  { %v4321_v21 = vpop.permute.xlu1 %4320 }
0x2718   :  { %v4323_v52 = vmul.f32 %v4321_v21, %v4317_v19 }
0x271a   :  { %v8241_v8 = vadd.f32 %v4323_v52, %v8194_v38 }
0x271c   :  { %4396 = vrot.lane.b32.xlu1 %v8241_v8, %s7249_s29 }
0x277b   :  { %v4152_v22 = vpop.permute.xlu0 %4151 }
0x277c   :  { %v4154_v23 = vadd.f32 %v4152_v22, %v7615_v48 }
0x277e   :  { %7020 = vtanh.f32 %v4154_v23 }
0x2788   :  { %v7021_v24 = vpop.eup %7020 }
0x2789   :  { %4158 = vrot.lane.b32.xlu0 %v7021_v24, %s7249_s29 }
0x278e   :  { %v4397_v25 = vpop.permute.xlu1 %4396 }
0x278f   :  { %6511 = vmatmul.mubr.msk.f32.vlgmr.msra.gmra.mrb[56].mxu1 %vm460_vm2, %v4397_v25 }
0x2790   :  { %6818 = vmatpush3.bf16.msra.mxu1 %v7581_v31  ;;  %6528 = vmatprep.mubr.msk.f32.mxu1 %vm7245_vm1, %v7246_v7 }
0x2791   :  { %6526 = vmatprep.subr.mxu1 %v7246_v7 }
0x2794   :  { %6527 = vmatpush3.msra.mxu1 %v8051_v9  ;;  %v4392_v9 = vadd.f32 %v8180_v56, %v8219_v40 }
0x2795   :  { %6822 = vmatprep.subr.bf16.mxu1 %v7244_v6 }
0x27fb   :  { %v4159_v48 = vpop.permute.xlu0 %4158 }
0x27fc   :  { %v4161_v27 = vmul.f32 %v4159_v48, %v4156_v58 }
0x27fe   :  { %v8255_v38 = vadd.f32 %v4162_v26, %v4161_v27 }
0x2800   :  { %4503 = vrot.lane.b32.xlu1 %v8255_v38, %s7249_s29 }
0x2862   :  { %v4466_v31 = vpop.f32.mrb[56].mxu1 }
0x2863   :  { %v4477_v29 = vadd.f32 %v4466_v31, %v7788_v63  ;;  %v6512_v34 = vpop.f32.mrb[57].mxu1  ;;  %v4470_v41 = vadd.f32 %v4466_v31, %v4392_v9 }
0x2865   :  { %4479 = vrot.lane.b32.xlu0 %v4477_v29, %s7250_s2  ;;  %v5711_v2 = vmul.f32 -1.442695, %v4470_v41 }
0x2867   :  { %7022 = vpow2.f32 %v5711_v2 }
0x2871   :  { %v7023_v28 = vpop.eup %7022 }
0x2872   :  { %v4504_v37 = vpop.permute.xlu1 %4503  ;;  %v4474_v36 = vadd.f32 1.0, %v7023_v28 }
0x2873   :  { %6520 = vmatmul.mubr.msk.f32.vlgmr.msra.gmra.mrb[56].mxu0 %vm460_vm2, %v4504_v37 }
0x2874   :  { %6821 = vmatpush3.bf16.msra.mxu0 %v7630_v60  ;;  %6537 = vmatprep.mubr.msk.f32.mxu0 %vm7245_vm1, %v7246_v7  ;;  %7024 = vrcp.f32 %v4474_v36 }
0x2875   :  { %6535 = vmatprep.subr.mxu0 %v7246_v7 }
0x2878   :  { %6536 = vmatpush3.msra.mxu0 %v8070_v1 }
0x2879   :  { %6825 = vmatprep.subr.bf16.mxu0 %v7244_v6 }
0x287e   :  { %v7025_v47 = vpop.eup %7024 }
0x287f   :  { %v4489_v35 = vsub.f32 1.0, %v7025_v47  ;;  %v4495_v20 = vmul.f32 %v7025_v47, %v8241_v8 }
0x28d7   :  { %v4480_v60 = vpop.permute.xlu0 %4479 }
0x28d8   :  { %v4482_v15 = vmul.f32 %v7025_v47, %v4480_v60 }
0x28da   :  { %4484 = vrot.lane.b32.xlu1 %v4482_v15, %s7248_s8 }
0x2946   :  { %v4573_v32 = vpop.f32.mrb[56].mxu0 }
0x2947   :  { %v5713_v14 = vmul.f32 -1.442695, %v4573_v32  ;;  %v6521_v39 = vpop.f32.mrb[57].mxu0 }
0x2949   :  { %7026 = vpow2.f32 %v5713_v14 }
0x294c   :  { %v4485_v1 = vpop.permute.xlu1 %4484 }
0x294d   :  { %v4487_v42 = vadd.f32 %v4485_v1, %v4392_v9 }
0x294f   :  { %7028 = vtanh.f32 %v4487_v42 }
0x2953   :  { %v7027_v53 = vpop.eup %7026 }
0x2954   :  { %v4580_v40 = vadd.f32 1.0, %v7027_v53 }
0x2956   :  { %7030 = vrcp.f32 %v4580_v40 }
0x2959   :  { %v7029_v50 = vpop.eup %7028 }
0x295a   :  { %4491 = vrot.lane.b32.xlu0 %v7029_v50, %s7249_s29 }
0x2960   :  { %v7031_v45 = vpop.eup %7030 }
0x2961   :  { %v4584_v33 = vmul.f32 %v7031_v45, %v4504_v37  ;;  %v4659_v10 = vsub.f32 1.0, %v7031_v45 }
0x2963   :  { %6529 = vmatmul.mubr.msk.f32.vlgmr.msra.gmra.mrb[58].mxu1 %vm460_vm2, %v4584_v33 }
0x2964   :  { %6824 = vmatpush3.bf16.msra.mxu1 %v7673_v43  ;;  %6546 = vmatprep.mubr.msk.f32.mxu1 %vm7245_vm1, %v7246_v7 }
0x2965   :  { %6544 = vmatprep.subr.mxu1 %v7246_v7 }
0x2968   :  { %6545 = vmatpush3.msra.mxu1 %v8086_v49 }
0x2969   :  { %6828 = vmatprep.subr.bf16.mxu1 %v7244_v6 }
0x29cc   :  { %v4492_v57 = vpop.permute.xlu0 %4491 }
0x29cd   :  { %v4494_v54 = vmul.f32 %v4492_v57, %v4489_v35 }
0x29cf   :  { %v4496_v61 = vadd.f32 %v4495_v20, %v4494_v54 }
0x29d1   :  { %4498 = vrot.lane.b32.xlu1 %v4496_v61, %s7249_s29 }
0x2a36   :  { %v4654_v0 = vpop.f32.mrb[58].mxu1 }
0x2a37   :  { %7032 = vtanh.f32 %v4654_v0  ;;  %v6530_v3 = vpop.f32.mrb[59].mxu1 }
0x2a41   :  { %v7033_v55 = vpop.eup %7032 }
0x2a42   :  { %v4660_v5 = vsub.f32 %v7033_v55, %v4504_v37 }
0x2a43   :  { %v4499_v44 = vpop.permute.xlu1 %4498 }
0x2a44   :  { %4501 = vst.msk [vmem:[#allocation2 + $0x28] sm:$0xff] %vm460_vm2, %v4499_v44  ;;  %6547 = vmatmul.mubr.msk.f32.vlgmr.msra.gmra.mrb[60].mxu1 %vm460_vm2, %v4499_v44  ;;  %4662 = vrot.lane.b32.xlu0 %v4660_v5, %s7247_s22 }
0x2a45   :  { %6830 = vmatpush3.bf16.msra.mxu1 %v7691_v51  ;;  %6564 = vmatprep.mubr.msk.f32.mxu1 %vm7245_vm1, %v7246_v7 }
0x2a46   :  { %6562 = vmatprep.subr.mxu1 %v7246_v7 }
0x2a49   :  { %6563 = vmatpush3.msra.mxu1 %v8105_v59 }
0x2a4a   :  { %6565 = vmatmul.mubr.msk.f32.vlgmr.msra.gmra.mrb[62].mxu1 %vm460_vm2, %v4504_v37  ;;  %6834 = vmatprep.subr.bf16.mxu1 %v7244_v6 }
0x2a4b   :  { %6836 = vmatpush3.bf16.msra.mxu1 %v7673_v43  ;;  %6582 = vmatprep.mubr.msk.f32.mxu1 %vm7245_vm1, %v7246_v7 }
0x2a4c   :  { %6580 = vmatprep.subr.mxu1 %v7246_v7 }
0x2a4f   :  { %6581 = vmatpush3.msra.mxu1 %v8086_v49 }
0x2a50   :  { %6840 = vmatprep.subr.bf16.mxu1 %v7244_v6 }
0x2ab6   :  { %v4663_v62 = vpop.permute.xlu0 %4662 }
0x2ab7   :  { %v4665_v12 = vmul.f32 %v4663_v62, %v4659_v10  ;;  %v187_v10 = vld [vmem:[#allocation12] sm:$0xff]  ;;  %v188_v62 = vld [vmem:[#allocation12 + $0x8] sm:$0xff] }
0x2ab9   :  { %v8298_v13 = vadd.f32 %v4665_v12, %v8255_v38  ;;  %v6846_v12 = vpack.c.bf16 %v188_v62, %v187_v10 }
0x2abb   :  { %4668 = vrot.lane.b32.xlu1 %v8298_v13, %s7249_s29 }
0x2b17   :  { %v4837_v16 = vpop.f32.mrb[60].mxu1 }
0x2b18   :  { %v5718_v43 = vmul.f32 -1.442695, %v4837_v16  ;;  %v6548_v19 = vpop.f32.mrb[61].mxu1 }
0x2b1a   :  { %7034 = vpow2.f32 %v5718_v43 }
0x2b1d   :  { %v4996_v21 = vpop.f32.mrb[62].mxu1 }
0x2b1e   :  { %v6566_v52 = vpop.f32.mrb[63].mxu1  ;;  %v4997_v36 = vadd.f32 %v8180_v56, %v4996_v21 }
0x2b24   :  { %v7035_v8 = vpop.eup %7034 }
0x2b25   :  { %v4844_v22 = vadd.f32 1.0, %v7035_v8 }
0x2b27   :  { %7036 = vrcp.f32 %v4844_v22 }
0x2b2d   :  { %v4669_v49 = vpop.permute.xlu1 %4668 }
0x2b2e   :  { %6538 = vmatmul.mubr.msk.f32.vlgmr.msra.gmra.mrb[58].mxu0 %vm460_vm2, %v4669_v49 }
0x2b2f   :  { %6827 = vmatpush3.bf16.msra.mxu0 %v7727_v11  ;;  %6555 = vmatprep.mubr.msk.f32.mxu0 %vm7245_vm1, %v7246_v7 }
0x2b30   :  { %6553 = vmatprep.subr.mxu0 %v7246_v7 }
0x2b31   :  { %v7037_v23 = vpop.eup %7036 }
0x2b32   :  { %v4847_v24 = vmul.f32 %v7037_v23, %v4499_v44  ;;  %v4922_v31 = vsub.f32 1.0, %v7037_v23 }
0x2b33   :  { %6554 = vmatpush3.msra.mxu0 %v8131_v17 }
0x2b34   :  { %6556 = vmatmul.mubr.msk.f32.vlgmr.msra.gmra.mrb[60].mxu0 %vm460_vm2, %v4847_v24  ;;  %6831 = vmatprep.subr.bf16.mxu0 %v7244_v6  ;;  %v189_v24 = vld [vmem:[#allocation12 + $0x10] sm:$0xff] }
0x2b35   :  { %6833 = vmatpush3.bf16.msra.mxu0 %v7754_v30  ;;  %6573 = vmatprep.mubr.msk.f32.mxu0 %vm7245_vm1, %v7246_v7 }
0x2b36   :  { %6571 = vmatprep.subr.mxu0 %v7246_v7 }
0x2b39   :  { %6572 = vmatpush3.msra.mxu0 %v8143_v18 }
0x2b3a   :  { %6837 = vmatprep.subr.bf16.mxu0 %v7244_v6 }
0x2c01   :  { %v4738_v25 = vpop.f32.mrb[58].mxu0 }
0x2c02   :  { %v6539_v58 = vpop.f32.mrb[59].mxu0  ;;  %v4749_v42 = vadd.f32 %v4738_v25, %v7651_v4  ;;  %v4742_v53 = vadd.f32 %v4738_v25, %v7612_v46  ;;  %v5450_v25 = vld [vmem:[#allocation2] sm:$0xff] }
0x2c03   :  { %v5451_v58 = vld [vmem:[#allocation2 + $0x8] sm:$0xff] }
0x2c04   :  { %v5716_v40 = vmul.f32 -1.442695, %v4742_v53 }
0x2c07   :  { %v4917_v48 = vpop.f32.mrb[60].mxu0 }
0x2c08   :  { %7038 = vtanh.f32 %v4917_v48  ;;  %v6557_v26 = vpop.f32.mrb[61].mxu0  ;;  %v5453_v48 = vld [vmem:[#allocation2 + $0x18] sm:$0xff] }
0x2c12   :  { %v7039_v27 = vpop.eup %7038 }
0x2c13   :  { %v4923_v38 = vsub.f32 %v7039_v27, %v4499_v44 }
0x2c15   :  { %4925 = vrot.lane.b32.xlu0 %v4923_v38, %s7247_s22 }
0x2c87   :  { %v4926_v29 = vpop.permute.xlu0 %4925 }
0x2c88   :  { %v4928_v34 = vmul.f32 %v4926_v29, %v4922_v31 }
0x2c8a   :  { %v4929_v37 = vadd.f32 %v4928_v34, %v4496_v61 }
0x2c8c   :  { %5001 = vrot.lane.b32.xlu1 %v4929_v37, %s7249_s29 }
0x2cfe   :  { %v5002_v9 = vpop.permute.xlu1 %5001 }
0x2cff   :  { %6574 = vmatmul.mubr.msk.f32.vlgmr.msra.gmra.mrb[62].mxu0 %vm460_vm2, %v5002_v9  ;;  %v5729_v9 = vld [vmem:[%s8417_s18] ss:$0 sm:$0xff]  ;;  %s7251_s18 = smov [#allocation14]  }
0x2d00   :  { %6839 = vmatpush3.bf16.msra.mxu0 %v7727_v11  ;;  %6591 = vmatprep.mubr.msk.f32.mxu0 %vm7245_vm1, %v7246_v7 }
0x2d01   :  { %6589 = vmatprep.subr.mxu0 %v7246_v7 }
0x2d04   :  { %6590 = vmatpush3.msra.mxu0 %v8131_v17 }
0x2d05   :  { %6843 = vmatprep.subr.bf16.mxu0 %v7244_v6 }
0x2dd2   :  { %v5071_v41 = vpop.f32.mrb[62].mxu0 }
0x2dd3   :  { %v5082_v2 = vadd.f32 %v5071_v41, %v7788_v63  ;;  %v6575_v28 = vpop.f32.mrb[63].mxu0  ;;  %v5075_v47 = vadd.f32 %v5071_v41, %v4997_v36 }
0x2dd5   :  { %5084 = vrot.lane.b32.xlu0 %v5082_v2, %s7250_s2  ;;  %v5722_v60 = vmul.f32 -1.442695, %v5075_v47 }
0x2dd7   :  { %7040 = vpow2.f32 %v5722_v60 }
0x2de1   :  { %v7041_v11 = vpop.eup %7040 }
0x2de2   :  { %v5079_v15 = vadd.f32 1.0, %v7041_v11 }
0x2de4   :  { %7042 = vrcp.f32 %v5079_v15 }
0x2dee   :  { %v7043_v32 = vpop.eup %7042 }
0x2def   :  { %v5094_v33 = vsub.f32 1.0, %v7043_v32  ;;  %v5100_v57 = vmul.f32 %v7043_v32, %v4929_v37 }
0x2e47   :  { %v5085_v14 = vpop.permute.xlu0 %5084 }
0x2e48   :  { %v5087_v39 = vmul.f32 %v7043_v32, %v5085_v14 }
0x2e4a   :  { %5089 = vrot.lane.b32.xlu1 %v5087_v39, %s7248_s8 }
0x2ebc   :  { %v5090_v6 = vpop.permute.xlu1 %5089 }
0x2ebd   :  { %v5092_v17 = vadd.f32 %v5090_v6, %v4997_v36 }
0x2ebf   :  { %7044 = vtanh.f32 %v5092_v17 }
0x2ec0   :  { %7046 = vpow2.f32 %v5716_v40 }
0x2ec9   :  { %v7045_v1 = vpop.eup %7044 }
0x2eca   :  { %5096 = vrot.lane.b32.xlu0 %v7045_v1, %s7249_s29  ;;  %v7047_v50 = vpop.eup %7046 }
0x2ecb   :  { %v4746_v45 = vadd.f32 1.0, %v7047_v50 }
0x2ecd   :  { %7048 = vrcp.f32 %v4746_v45 }
0x2ece   :  { %4751 = vrot.lane.b32.xlu0 %v4749_v42, %s7250_s2 }
0x2ed7   :  { %v7049_v4 = vpop.eup %7048 }
0x2ed8   :  { %v4761_v16 = vsub.f32 1.0, %v7049_v4  ;;  %v4767_v43 = vmul.f32 %v7049_v4, %v8298_v13 }
0x2f3c   :  { %v5097_v35 = vpop.permute.xlu0 %5096 }
0x2f3d   :  { %v5099_v20 = vmul.f32 %v5097_v35, %v5094_v33 }
0x2f3f   :  { %v8333_v54 = vadd.f32 %v5100_v57, %v5099_v20 }
0x2f40   :  { %v4752_v61 = vpop.permute.xlu0 %4751 }
0x2f41   :  { %5103 = vrot.lane.b32.xlu1 %v8333_v54, %s7249_s29  ;;  %v4754_v0 = vmul.f32 %v7049_v4, %v4752_v61 }
0x2f45   :  { %4756 = vrot.lane.b32.xlu1 %v4754_v0, %s7248_s8 }
0x2fb3   :  { %v8338_v3 = vpop.permute.xlu1 %5103 }
0x2fb4   :  { %5106 = vst.msk [vmem:[#allocation2 + $0x30] sm:$0xff] %vm460_vm2, %v8338_v3  ;;  %6583 = vmatmul.mubr.msk.f32.vlgmr.msra.gmra.mrb[64].mxu1 %vm460_vm2, %v8338_v3 }
0x2fb5   :  { %6842 = vmatpush3.bf16.msra.mxu1 %v7691_v51  ;;  %6600 = vmatprep.mubr.msk.f32.mxu1 %vm7245_vm1, %v7246_v7 }
0x2fb6   :  { %6598 = vmatprep.subr.mxu1 %v7246_v7 }
0x2fb7   :  { %v4757_v55 = vpop.permute.xlu1 %4756 }
0x2fb8   :  { %v4759_v5 = vadd.f32 %v4757_v55, %v7612_v46 }
0x2fb9   :  { %6599 = vmatpush3.msra.mxu1 %v8105_v59 }
0x2fba   :  { %7050 = vtanh.f32 %v4759_v5  ;;  %6847 = vmatprep.subr.bf16.mxu1 %v6846_v12 }
0x2fbb   :  { %v5456_v26 = vld [vmem:[#allocation2 + $0x30] sm:$0xff] }
0x2fc4   :  { %v7051_v44 = vpop.eup %7050 }
0x2fc5   :  { %4763 = vrot.lane.b32.xlu1 %v7051_v44, %s7249_s29 }
0x3037   :  { %v4764_v51 = vpop.permute.xlu1 %4763 }
0x3038   :  { %v4766_v19 = vmul.f32 %v4764_v51, %v4761_v16 }
0x303a   :  { %v4768_v21 = vadd.f32 %v4767_v43, %v4766_v19 }
0x303c   :  { %5269 = vrot.lane.b32.xlu1 %v4768_v21, %s7249_s29 }
0x3087   :  { %v5175_v52 = vpop.f32.mrb[64].mxu1 }
0x3088   :  { %v5724_v46 = vmul.f32 -1.442695, %v5175_v52  ;;  %v6584_v8 = vpop.f32.mrb[65].mxu1 }
0x308a   :  { %7052 = vpow2.f32 %v5724_v46 }
0x3094   :  { %v7053_v59 = vpop.eup %7052 }
0x3095   :  { %v5182_v22 = vadd.f32 1.0, %v7053_v59 }
0x3097   :  { %7054 = vrcp.f32 %v5182_v22 }
0x30a1   :  { %v7055_v49 = vpop.eup %7054 }
0x30a2   :  { %v5185_v23 = vmul.f32 %v7055_v49, %v8338_v3  ;;  %v5260_v17 = vsub.f32 1.0, %v7055_v49 }
0x30a4   :  { %6592 = vmatmul.mubr.msk.f32.vlgmr.msra.gmra.mrb[64].mxu0 %vm460_vm2, %v5185_v23 }
0x30a5   :  { %6845 = vmatpush3.bf16.msra.mxu0 %v7754_v30  ;;  %6609 = vmatprep.mubr.msk.f32.mxu0 %vm7245_vm1, %v7246_v7  ;;  %v5452_v30 = vld [vmem:[#allocation2 + $0x10] sm:$0xff] }
0x30a6   :  { %6607 = vmatprep.subr.mxu0 %v7246_v7  ;;  %v5454_v7 = vld [vmem:[#allocation2 + $0x20] sm:$0xff] }
0x30a9   :  { %6608 = vmatpush3.msra.mxu0 %v8143_v18  ;;  %v5455_v18 = vld [vmem:[#allocation2 + $0x28] sm:$0xff] }
0x30ae   :  { %v5270_v13 = vpop.permute.xlu1 %5269 }
0x30af   :  { %6601 = vmatmul.mubr.msk.f32.vlgmr.msra.gmra.mrb[66].mxu1 %vm460_vm2, %v5270_v13 }
0x30b0   :  { %6849 = vmatpush3.bf16.msra.mxu1 %v6846_v12  ;;  %6618 = vmatprep.mubr.msk.f32.mxu1 %vm460_vm2, %v5450_v25 }
0x30b1   :  { %6616 = vmatprep.subr.mxu1 %v189_v24 }
0x30b4   :  { %6617 = vmatpush3.msra.mxu1 %v189_v24 }
0x30b5   :  { %6619 = vmatmul.mubr.msk.f32.vlgmr.msra.gmra.mrb[68].mxu1 %vm460_vm2, %v5451_v58 }
0x30b6   :  { %6621 = vmatprep.mubr.msk.f32.mxu1 %vm460_vm2, %v5452_v30 }
0x30b9   :  { %6622 = vmatmul.mubr.msk.f32.gmra.mrb[70].mxu1 %vm460_vm2, %v5453_v48 }
0x30ba   :  { %6624 = vmatprep.mubr.msk.f32.mxu1 %vm460_vm2, %v5454_v7 }
0x30bd   :  { %6625 = vmatmul.mubr.msk.f32.gmra.mrb[72].mxu1 %vm460_vm2, %v5455_v18 }
0x30be   :  { %6627 = vmatprep.mubr.msk.f32.mxu1 %vm460_vm2, %v5456_v26 }
0x3177   :  { %v5255_v27 = vpop.f32.mrb[64].mxu0 }
0x3178   :  { %7056 = vtanh.f32 %v5255_v27  ;;  %v6593_v38 = vpop.f32.mrb[65].mxu0 }
0x3182   :  { %v7057_v31 = vpop.eup %7056  ;;  %v5339_v29 = vpop.f32.mrb[66].mxu1 }
0x3183   :  { %v6602_v34 = vpop.f32.mrb[67].mxu1  ;;  %v5261_v37 = vsub.f32 %v7057_v31, %v8338_v3  ;;  %v5340_v35 = vadd.f32 %v8180_v56, %v5339_v29 }
0x3185   :  { %5263 = vrot.lane.b32.xlu0 %v5261_v37, %s7247_s22  ;;  %s5606_s22 = sshll.u32 %s7251_s18, 4  ;;  %s5607_s22 = int_to_ptr.vmem [resolvable:$true] %s5606_s22 }
0x3186   :  { %p7209_p7 = scmp.lt.s32.totalorder %s5607_s22, %s5607_s22 }
0x3188   :  { %v6620_v41 = vpop.f32.mrb[68].mxu1 }
0x3189   :  { %v5560_v2 = vadd.f32 %v6620_v41, %v5729_v9  ;;  %v5554_v28 = vpop.f32.mrb[69].mxu1 }
0x318a   :  { %v5555_v36 = vadd.f32 %v5729_v9, %v5554_v28 }
0x318b   :  { %5594 = vst [vmem:[#allocation14 + $0x8] sm:$0xff] %v5560_v2 }
0x318c   :  { %5593 = vst [vmem:[#allocation14] sm:$0xff] %v5555_v36  ;;  %v6623_v47 = vpop.f32.mrb[70].mxu1 }
0x318d   :  { %v5570_v60 = vadd.f32 %v6623_v47, %v5729_v9  ;;  %v5564_v11 = vpop.f32.mrb[71].mxu1 }
0x318e   :  { %v5565_v15 = vadd.f32 %v5729_v9, %v5564_v11 }
0x318f   :  { %5596 = vst [vmem:[#allocation14 + $0x18] sm:$0xff] %v5570_v60 }
0x3190   :  { %5595 = vst [vmem:[#allocation14 + $0x10] sm:$0xff] %v5565_v15  ;;  %v6626_v32 = vpop.f32.mrb[72].mxu1 }
0x3191   :  { %v5580_v14 = vadd.f32 %v6626_v32, %v5729_v9  ;;  %v5574_v39 = vpop.f32.mrb[73].mxu1 }
0x3192   :  { %v5575_v6 = vadd.f32 %v5729_v9, %v5574_v39 }
0x3193   :  { %5598 = vst [vmem:[#allocation14 + $0x28] sm:$0xff] %v5580_v14 }
0x3194   :  { %5597 = vst [vmem:[#allocation14 + $0x20] sm:$0xff] %v5575_v6 }
0x31f7   :  { %v5264_v1 = vpop.permute.xlu0 %5263 }
0x31f8   :  { %v5266_v42 = vmul.f32 %v5264_v1, %v5260_v17 }
0x31fa   :  { %v5267_v53 = vadd.f32 %v5266_v42, %v8333_v54 }
0x31fc   :  { %5344 = vrot.lane.b32.xlu0 %v5267_v53, %s7249_s29 }
0x326e   :  { %v5345_v40 = vpop.permute.xlu0 %5344 }
0x326f   :  { %6610 = vmatmul.mubr.msk.f32.vlgmr.msra.gmra.mrb[66].mxu0 %vm460_vm2, %v5345_v40 }
0x3342   :  { %v5414_v50 = vpop.f32.mrb[66].mxu0 }
0x3343   :  { %v5425_v45 = vadd.f32 %v5414_v50, %v7788_v63  ;;  %v6611_v33 = vpop.f32.mrb[67].mxu0  ;;  %v5418_v57 = vadd.f32 %v5414_v50, %v5340_v35 }
0x3345   :  { %5427 = vrot.lane.b32.xlu0 %v5425_v45, %s7250_s2  ;;  %v5728_v20 = vmul.f32 -1.442695, %v5418_v57 }
0x3347   :  { %7058 = vpow2.f32 %v5728_v20 }
0x3351   :  { %v7059_v61 = vpop.eup %7058 }
0x3352   :  { %v5422_v4 = vadd.f32 1.0, %v7059_v61 }
0x3354   :  { %7060 = vrcp.f32 %v5422_v4 }
0x335e   :  { %v7061_v54 = vpop.eup %7060 }
0x335f   :  { %v5437_v44 = vsub.f32 1.0, %v7061_v54  ;;  %v5443_v56 = vmul.f32 %v7061_v54, %v5267_v53 }
0x33b7   :  { %v5428_v0 = vpop.permute.xlu0 %5427 }
0x33b8   :  { %v5430_v3 = vmul.f32 %v7061_v54, %v5428_v0 }
0x33ba   :  { %5432 = vrot.lane.b32.xlu1 %v5430_v3, %s7248_s8  ;;  %s7204_s8 = scalar_lea.vmem %s5607_s22, 1024 }
0x33bb   :  { %p7205_p6 = scmp.ne.s32.totalorder %s5607_s22, %s7204_s8  ;;  %p7210_p8 = scmp.lt.s32.totalorder %s7204_s8, %s7204_s8 }
0x33bd   :  { %p7211_p9 = por %p7210_p8, %p7209_p7 }
0x33bf   :  { %p7212_p10 = pnand %p7211_p9, %p7205_p6 }
0x342c   :  { %v5433_v55 = vpop.permute.xlu1 %5432 }
0x342d   :  { %v5435_v5 = vadd.f32 %v5433_v55, %v5340_v35 }
0x342f   :  { %7062 = vtanh.f32 %v5435_v5 }
0x3439   :  { %v7063_v63 = vpop.eup %7062 }
0x343a   :  { %5439 = vrot.lane.b32.xlu0 %v7063_v63, %s7249_s29 }
0x34ac   :  { %v5440_v10 = vpop.permute.xlu0 %5439 }
0x34ad   :  { %v5442_v62 = vmul.f32 %v5440_v10, %v5437_v44 }
0x34af   :  { %v5444_v12 = vadd.f32 %v5443_v56, %v5442_v62 }
0x34b1   :  { %5446 = vrot.lane.b32.xlu1 %v5444_v12, %s7249_s29 }
0x3523   :  { %v5447_v16 = vpop.permute.xlu1 %5446 }
0x3524   :  { %5449 = vst.msk [vmem:[#allocation2 + $0x38] sm:$0xff] %vm460_vm2, %v5447_v16 }
0x352b   :  { %v5457_v51 = vld [vmem:[#allocation2 + $0x38] sm:$0xff] }
0x352c   :  { %6628 = vmatmul.mubr.msk.f32.gmra.mrb[74].mxu1 %vm460_vm2, %v5457_v51 }
0x35ff   :  { %v6629_v43 = vpop.f32.mrb[74].mxu1 }
0x3600   :  { %v5590_v19 = vadd.f32 %v6629_v43, %v5729_v9  ;;  %v5584_v21 = vpop.f32.mrb[75].mxu1 }
0x3601   :  { %v5585_v52 = vadd.f32 %v5729_v9, %v5584_v21 }
0x3602   :  { %5600 = vst [vmem:[#allocation14 + $0x38] sm:$0xff] %v5590_v19 }
0x3603   :  { %5599 = vst [vmem:[#allocation14 + $0x30] sm:$0xff] %v5585_v52 }
0x3604   :  { %7215 = shalt.err (!%p7212_p10)
}
0x3605   :  { %s7216_s27 = scalar_lea.hbm %s8418_s19, 1024 }
0x3606   :  { %p7217_p11 = scmp.ne.s32.totalorder %s8418_s19, %s7216_s27  ;;  %p7220_p12 = scmp.lt.u32.totalorder %s7216_s27, %s8418_s19 }
0x3608   :  { %p7222_p13 = pnand %p7220_p12, %p7217_p11 }
0x360a   :  { %7225 = shalt.err (!%p7222_p13)
}
0x360b   :  { %5612 = dma.vmem_to_hbm [thread:$0]  %s5607_s22, 1024, %s8418_s19, [#allocation5], %s7242_s14, %s7242_s14, %s7243_s10  }
0x360c   :  { %7234 = dma.done.wait [#allocation5], 1024  }
0x360d   :  { %7235 = vsyncadd [#allocation5], 4294966272 }
0x360e   :  { %5616 = vsyncpa [#allocation4], 1 }
0x360f   :  { %5617 = vsyncpa [#allocation7], 1 }
0x3610   :  { %5618 = vsyncpa [#allocation10], 1 }
0x3611   :  { %5619 = vsyncpa [#allocation13], 1 }
0x3612   :  { %5620 = vsyncpa [#allocation5], 1 }

</bundles_post_ra>
